<compile_context>
chip_gen: v7x
topology: tpu7x:2x2x1
jax: 0.10.0
libtpu: 0.0.40
codegen_flags: <defaults>
</compile_context>

<pallas_src>
import jax
import jax.numpy as jnp
from jax.experimental import pallas as pl
from jax.experimental.pallas import tpu as pltpu

NEG_SLOPE = 0.01          # nn.LeakyReLU default negative_slope
NUM_CLASSES = 52


def _leaky(y):
    return jnp.where(y > 0, y, NEG_SLOPE * y)


# ----------------------------------------------------------------------------
# Fused conv stack: (Conv + folded BN + LeakyReLU + MaxPool2d(2)) x 3
# One grid step per image; activations live in VMEM scratch.
# ----------------------------------------------------------------------------
def _conv_stack_kernel(p1_ref, w1_ref, s1_ref, b1_ref,
                       w2_ref, s2_ref, b2_ref,
                       w3_ref, s3_ref, b3_ref,
                       feat_ref,
                       act1_ref, act2_ref, ws1_ref, ws2_ref, ws3_ref):
    # Hoist the folded-BN parameters (broadcasts emitted once per use site,
    # loops below are not unrolled).
    s1 = s1_ref[...]          # (1, 24) f32
    b1 = b1_ref[...]
    s2 = s2_ref[...]          # (1, 48) f32
    b2 = b2_ref[...]
    s3 = s3_ref[...]          # (1, 64) f32
    b3 = b3_ref[...]
    w1 = w1_ref[...]          # (49, 24) bf16

    # ---------------- layer 1: im2col matmul, 88x88 conv -> 44x44 pooled -----
    # p1 rows are ordered h*88 + w; columns are kh*7 + kw.
    def l1_body(hp, carry):
        rows = p1_ref[pl.ds(hp * 176, 176), :]                  # 2 conv rows
        y = jnp.dot(rows, w1, preferred_element_type=jnp.float32)  # (176, 24)
        y = _leaky(y * s1 + b1)
        ws1_ref[...] = jnp.maximum(y[0:88, :], y[88:176, :])    # H-pool
        pooled = jnp.maximum(ws1_ref[pl.ds(0, 44, stride=2), :],
                             ws1_ref[pl.ds(1, 44, stride=2), :])  # W-pool
        act1_ref[pl.ds(hp * 44, 44), :] = pooled                # rows hp*44+wp
        return carry

    jax.lax.fori_loop(0, 44, l1_body, 0)

    # ---------------- layer 2: 5x5 conv 24->48, K folded to 120 --------------
    def l2_row(h):            # one conv output row, (40, 48) f32 post BN+LReLU
        acc = jnp.zeros((40, 48), jnp.float32)
        for kh in range(5):
            base = (h + kh) * 44
            patch = jnp.concatenate(
                [act1_ref[pl.ds(base + kw, 40), :] for kw in range(5)], axis=1)
            acc = acc + jnp.dot(patch.astype(jnp.bfloat16), w2_ref[kh],
                                preferred_element_type=jnp.float32)
        return _leaky(acc * s2 + b2)

    def l2_body(hp, carry):
        h = 2 * hp
        ws2_ref[...] = jnp.maximum(l2_row(h), l2_row(h + 1))    # H-pool (40,48)
        pooled = jnp.maximum(ws2_ref[pl.ds(0, 20, stride=2), :],
                             ws2_ref[pl.ds(1, 20, stride=2), :])  # (20, 48)
        act2_ref[pl.ds(hp * 20, 20), :] = pooled
        return carry

    jax.lax.fori_loop(0, 20, l2_body, 0)

    # ---------------- layer 3: 5x5 conv 48->64, K folded to 240 --------------
    def l3_row(h):            # one conv output row, (16, 64) f32 post BN+LReLU
        acc = jnp.zeros((16, 64), jnp.float32)
        for kh in range(5):
            base = (h + kh) * 20
            patch = jnp.concatenate(
                [act2_ref[pl.ds(base + kw, 16), :] for kw in range(5)], axis=1)
            acc = acc + jnp.dot(patch.astype(jnp.bfloat16), w3_ref[kh],
                                preferred_element_type=jnp.float32)
        return _leaky(acc * s3 + b3)

    def l3_body(hp, carry):
        h = 2 * hp
        ws3_ref[...] = jnp.maximum(l3_row(h), l3_row(h + 1))    # H-pool (16,64)
        pooled = jnp.maximum(ws3_ref[pl.ds(0, 8, stride=2), :],
                             ws3_ref[pl.ds(1, 8, stride=2), :])   # (8, 64)
        feat_ref[pl.ds(hp * 8, 8), :] = pooled                  # rows h*8+w
        return carry

    jax.lax.fori_loop(0, 8, l3_body, 0)


def conv_stack(p1, w1, s1, b1, w2, s2, b2, w3, s3, b3):
    N = p1.shape[0]
    return pl.pallas_call(
        _conv_stack_kernel,
        out_shape=jax.ShapeDtypeStruct((N, 64, 64), jnp.float32),
        grid=(N,),
        in_specs=[
            pl.BlockSpec((None, 7744, 49), lambda n: (n, 0, 0)),   # im2col
            pl.BlockSpec((49, 24), lambda n: (0, 0)),              # w1
            pl.BlockSpec((1, 24), lambda n: (0, 0)),               # scale1
            pl.BlockSpec((1, 24), lambda n: (0, 0)),               # shift1
            pl.BlockSpec((5, 120, 48), lambda n: (0, 0, 0)),       # w2 (kh,K,C)
            pl.BlockSpec((1, 48), lambda n: (0, 0)),
            pl.BlockSpec((1, 48), lambda n: (0, 0)),
            pl.BlockSpec((5, 240, 64), lambda n: (0, 0, 0)),       # w3 (kh,K,C)
            pl.BlockSpec((1, 64), lambda n: (0, 0)),
            pl.BlockSpec((1, 64), lambda n: (0, 0)),
        ],
        out_specs=pl.BlockSpec((None, 64, 64), lambda n: (n, 0, 0)),
        scratch_shapes=[
            pltpu.VMEM((44 * 44, 24), jnp.float32),   # act1 (rows = h*44 + w)
            pltpu.VMEM((20 * 20, 48), jnp.float32),   # act2 (rows = h*20 + w)
            pltpu.VMEM((88, 24), jnp.float32),        # W-pool scratch, layer 1
            pltpu.VMEM((40, 48), jnp.float32),        # W-pool scratch, layer 2
            pltpu.VMEM((16, 64), jnp.float32),        # W-pool scratch, layer 3
        ],
        compiler_params=pltpu.CompilerParams(
            dimension_semantics=("parallel",),        # 2 TCs on v7x
            vmem_limit_bytes=32 * 1024 * 1024,
        ),
    )(p1, w1, s1, b1, w2, s2, b2, w3, s3, b3)


# ----------------------------------------------------------------------------
# fc1 (+ReLU) + fc2 head, K-tiled so the fc1 weight DMA overlaps compute.
# ----------------------------------------------------------------------------
def _fc_kernel(x_ref, w1_ref, b1_ref, w2_ref, b2_ref, o_ref, acc_ref):
    k = pl.program_id(0)

    @pl.when(k == 0)
    def _init():
        acc_ref[...] = jnp.zeros_like(acc_ref)

    acc_ref[...] += jnp.dot(x_ref[...].astype(jnp.bfloat16), w1_ref[...],
                            preferred_element_type=jnp.float32)

    @pl.when(k == pl.num_programs(0) - 1)
    def _finish():
        h = jnp.maximum(acc_ref[...] + b1_ref[...], 0.0)        # relu(fc1(x))
        o = jnp.dot(h.astype(jnp.bfloat16), w2_ref[...],
                    preferred_element_type=jnp.float32)
        o_ref[...] = o + b2_ref[...]                            # fc2


def fc_head(x, w1, b1, w2, b2, *, tk=1024):
    N, Din = x.shape
    H = w1.shape[1]
    C = w2.shape[1]
    return pl.pallas_call(
        _fc_kernel,
        out_shape=jax.ShapeDtypeStruct((N, C), jnp.float32),
        grid=(Din // tk,),
        in_specs=[
            pl.BlockSpec((N, tk), lambda k: (0, k)),
            pl.BlockSpec((tk, H), lambda k: (k, 0)),
            pl.BlockSpec((1, H), lambda k: (0, 0)),
            pl.BlockSpec((H, C), lambda k: (0, 0)),
            pl.BlockSpec((1, C), lambda k: (0, 0)),
        ],
        out_specs=pl.BlockSpec((N, C), lambda k: (0, 0)),
        scratch_shapes=[pltpu.VMEM((N, H), jnp.float32)],
        compiler_params=pltpu.CompilerParams(
            dimension_semantics=("arbitrary",)),
    )(x, w1, b1, w2, b2)


# ----------------------------------------------------------------------------
# Parameters (deterministic, synthetic), BN folding / weight re-layout, forward
# ----------------------------------------------------------------------------
def _fold_bn(gamma, beta, mean, var, conv_bias, eps=1e-5):
    scale = gamma / jnp.sqrt(var + eps)
    shift = beta + scale * (conv_bias - mean)
    return (scale.reshape(1, -1).astype(jnp.float32),
            shift.reshape(1, -1).astype(jnp.float32))


def init_params(key):
    ks = iter(jax.random.split(key, 24))
    nrm = lambda k, s, sc: sc * jax.random.normal(k, s, jnp.float32)

    def bn(c):
        return (1.0 + nrm(next(ks), (c,), 0.1),                         # gamma
                nrm(next(ks), (c,), 0.1),                               # beta
                nrm(next(ks), (c,), 0.1),                               # mean
                1.0 + 0.2 * jax.random.uniform(next(ks), (c,), jnp.float32))  # var

    p = {}
    p["conv1_w"], p["conv1_b"], p["bn1"] = nrm(next(ks), (24, 1, 7, 7), 0.1), nrm(next(ks), (24,), 0.1), bn(24)
    p["conv2_w"], p["conv2_b"], p["bn2"] = nrm(next(ks), (48, 24, 5, 5), 0.04), nrm(next(ks), (48,), 0.04), bn(48)
    p["conv3_w"], p["conv3_b"], p["bn3"] = nrm(next(ks), (64, 48, 5, 5), 0.03), nrm(next(ks), (64,), 0.03), bn(64)
    p["fc1_w"], p["fc1_b"] = nrm(next(ks), (256, 4096), 0.02), nrm(next(ks), (256,), 0.02)
    p["fc2_w"], p["fc2_b"] = nrm(next(ks), (NUM_CLASSES, 256), 0.06), nrm(next(ks), (NUM_CLASSES,), 0.06)
    return p


def prepare_params(p):
    """One-time: fold BN, re-layout weights for the kernels, cast matmul operands to bf16."""
    q = {}
    # conv1: (24,1,7,7) -> (kh*7+kw, cout) = (49, 24) for the im2col matmul
    q["w1"] = jnp.transpose(p["conv1_w"], (2, 3, 1, 0)).reshape(49, 24).astype(jnp.bfloat16)
    q["s1"], q["b1"] = _fold_bn(*p["bn1"], p["conv1_b"])
    # conv2/3: (Cout,Cin,KH,KW) -> (KH, KW*Cin, Cout) so kw*Cin folds into matmul K
    q["w2"] = jnp.transpose(p["conv2_w"], (2, 3, 1, 0)).reshape(5, 5 * 24, 48).astype(jnp.bfloat16)
    q["s2"], q["b2"] = _fold_bn(*p["bn2"], p["conv2_b"])
    q["w3"] = jnp.transpose(p["conv3_w"], (2, 3, 1, 0)).reshape(5, 5 * 48, 64).astype(jnp.bfloat16)
    q["s3"], q["b3"] = _fold_bn(*p["bn3"], p["conv3_b"])
    # fc1: torch flattens NCHW (c*64 + h*8 + w); our features are HWC
    # ((h*8+w)*64 + c), so permute fc1's input dimension to match.
    w1 = p["fc1_w"].reshape(256, 64, 8, 8).transpose(2, 3, 1, 0).reshape(4096, 256)
    q["fc1_w"] = w1.astype(jnp.bfloat16)
    q["fc1_b"] = p["fc1_b"].reshape(1, -1).astype(jnp.float32)
    q["fc2_w"] = p["fc2_w"].T.astype(jnp.bfloat16)
    q["fc2_b"] = p["fc2_b"].reshape(1, -1).astype(jnp.float32)
    return q


def convnet_90_forward(params, x_nchw):
    x = x_nchw[:, 0, :, :].astype(jnp.float32)            # (N, 90, 90), Cin = 1
    N = x.shape[0]
    # layer-1 padding=2 for the 7x7 conv
    xp = jnp.pad(x, ((0, 0), (2, 2), (2, 2)))             # (N, 94, 94)
    # layer-1 im2col: row = h*88 + w, col = kh*7 + kw
    slabs = [xp[:, kh:kh + 88, kw:kw + 88] for kh in range(7) for kw in range(7)]
    p1 = jnp.stack(slabs, axis=-1).reshape(N, 88 * 88, 49).astype(jnp.bfloat16)

    feat = conv_stack(p1,
                      params["w1"], params["s1"], params["b1"],
                      params["w2"], params["s2"], params["b2"],
                      params["w3"], params["s3"], params["b3"])   # (N, 64, 64)
    feat = feat.reshape(N, 4096)                          # (h*8+w)*64 + c order

    return fc_head(feat, params["fc1_w"], params["fc1_b"],
                   params["fc2_w"], params["fc2_b"])


if __name__ == "__main__":
    key = jax.random.PRNGKey(0)
    pkey, xkey = jax.random.split(key)
    params = prepare_params(init_params(pkey))

    # Input spatial size 90x90 is dictated by the module (fc1 = Linear(4096, 256)).
    x = jax.random.normal(xkey, (2, 1, 90, 90), jnp.float32)      # NCHW, batch=2

    fwd = jax.jit(convnet_90_forward)
    out = jax.block_until_ready(fwd(params, x))
    assert out.shape == (2, NUM_CLASSES), out.shape
    assert bool(jnp.all(jnp.isfinite(out)))
    print("KERNEL_OK")
</pallas_src>

<mosaic_0001>
module attributes {stable_mosaic.version = 11 : i64} {
  func.func @_conv_stack_kernel(%arg0: i32, %arg1: memref<1x7744x49xbf16, #tpu.memory_space<vmem>>, %arg2: memref<49x24xbf16, #tpu.memory_space<vmem>>, %arg3: memref<1x24xf32, #tpu.memory_space<vmem>>, %arg4: memref<1x24xf32, #tpu.memory_space<vmem>>, %arg5: memref<5x120x48xbf16, #tpu.memory_space<vmem>>, %arg6: memref<1x48xf32, #tpu.memory_space<vmem>>, %arg7: memref<1x48xf32, #tpu.memory_space<vmem>>, %arg8: memref<5x240x64xbf16, #tpu.memory_space<vmem>>, %arg9: memref<1x64xf32, #tpu.memory_space<vmem>>, %arg10: memref<1x64xf32, #tpu.memory_space<vmem>>, %arg11: memref<1x64x64xf32, #tpu.memory_space<vmem>>, %arg12: memref<1936x24xf32, #tpu.memory_space<vmem>>, %arg13: memref<400x48xf32, #tpu.memory_space<vmem>>, %arg14: memref<88x24xf32, #tpu.memory_space<vmem>>, %arg15: memref<40x48xf32, #tpu.memory_space<vmem>>, %arg16: memref<16x64xf32, #tpu.memory_space<vmem>>) attributes {dimension_semantics = [#tpu.dimension_semantics<parallel>], iteration_bounds = array<i64: 2>, scalar_prefetch = 0 : i64, scratch_operands = 5 : i64, tpu.core_type = #tpu.core_type<tc>, window_params = [{transform_indices = @transform_0, window_bounds = array<i64: 1, 7744, 49>}, {pipeline_mode = #tpu.pipeline_mode<synchronous>, transform_indices = @transform_1, window_bounds = array<i64: 49, 24>}, {pipeline_mode = #tpu.pipeline_mode<synchronous>, transform_indices = @transform_2, window_bounds = array<i64: 1, 24>}, {pipeline_mode = #tpu.pipeline_mode<synchronous>, transform_indices = @transform_3, window_bounds = array<i64: 1, 24>}, {pipeline_mode = #tpu.pipeline_mode<synchronous>, transform_indices = @transform_4, window_bounds = array<i64: 5, 120, 48>}, {pipeline_mode = #tpu.pipeline_mode<synchronous>, transform_indices = @transform_5, window_bounds = array<i64: 1, 48>}, {pipeline_mode = #tpu.pipeline_mode<synchronous>, transform_indices = @transform_6, window_bounds = array<i64: 1, 48>}, {pipeline_mode = #tpu.pipeline_mode<synchronous>, transform_indices = @transform_7, window_bounds = array<i64: 5, 240, 64>}, {pipeline_mode = #tpu.pipeline_mode<synchronous>, transform_indices = @transform_8, window_bounds = array<i64: 1, 64>}, {pipeline_mode = #tpu.pipeline_mode<synchronous>, transform_indices = @transform_9, window_bounds = array<i64: 1, 64>}, {transform_indices = @transform_10, window_bounds = array<i64: 1, 64, 64>}]} {
    %c0 = arith.constant 0 : index
    %c0_0 = arith.constant 0 : index
    %0 = vector.load %arg3[%c0, %c0_0] : memref<1x24xf32, #tpu.memory_space<vmem>>, vector<1x24xf32>
    %c0_1 = arith.constant 0 : index
    %c0_2 = arith.constant 0 : index
    %1 = vector.load %arg4[%c0_1, %c0_2] : memref<1x24xf32, #tpu.memory_space<vmem>>, vector<1x24xf32>
    %c0_3 = arith.constant 0 : index
    %c0_4 = arith.constant 0 : index
    %2 = vector.load %arg6[%c0_3, %c0_4] : memref<1x48xf32, #tpu.memory_space<vmem>>, vector<1x48xf32>
    %c0_5 = arith.constant 0 : index
    %c0_6 = arith.constant 0 : index
    %3 = vector.load %arg7[%c0_5, %c0_6] : memref<1x48xf32, #tpu.memory_space<vmem>>, vector<1x48xf32>
    %c0_7 = arith.constant 0 : index
    %c0_8 = arith.constant 0 : index
    %4 = vector.load %arg9[%c0_7, %c0_8] : memref<1x64xf32, #tpu.memory_space<vmem>>, vector<1x64xf32>
    %c0_9 = arith.constant 0 : index
    %c0_10 = arith.constant 0 : index
    %5 = vector.load %arg10[%c0_9, %c0_10] : memref<1x64xf32, #tpu.memory_space<vmem>>, vector<1x64xf32>
    %c0_11 = arith.constant 0 : index
    %c0_12 = arith.constant 0 : index
    %6 = vector.load %arg2[%c0_11, %c0_12] : memref<49x24xbf16, #tpu.memory_space<vmem>>, vector<49x24xbf16>
    %c0_i32 = arith.constant 0 : i32
    %c44_i32 = arith.constant 44 : i32
    %7 = arith.addi %c0_i32, %c44_i32 : i32
    %c1_i32 = arith.constant 1 : i32
    scf.for %arg17 = %c0_i32 to %7 step %c1_i32  : i32 {
      %c176_i32 = arith.constant 176 : i32
      %10 = arith.muli %arg17, %c176_i32 : i32
      %c0_20 = arith.constant 0 : index
      %11 = arith.index_cast %10 : i32 to index
      %c0_21 = arith.constant 0 : index
      %12 = vector.load %arg1[%c0_20, %11, %c0_21] : memref<1x7744x49xbf16, #tpu.memory_space<vmem>>, vector<1x176x49xbf16>
      %13 = vector.shape_cast %12 : vector<1x176x49xbf16> to vector<176x49xbf16>
      %cst = arith.constant dense<0.000000e+00> : vector<176x24xf32>
      %14 = tpu.matmul %13, %6, %cst {dimension_numbers = #tpu.dot_dimension_numbers<[1], [0], [0], [1], [0, 0, 1, 1], [], []>} : vector<176x49xbf16>, vector<49x24xbf16>, vector<176x24xf32> -> vector<176x24xf32>
      %15 = vector.broadcast %0 : vector<1x24xf32> to vector<176x24xf32>
      %16 = arith.mulf %14, %15 : vector<176x24xf32>
      %17 = vector.broadcast %1 : vector<1x24xf32> to vector<176x24xf32>
      %18 = arith.addf %16, %17 : vector<176x24xf32>
      %cst_22 = arith.constant 0.000000e+00 : f32
      %19 = vector.broadcast %cst_22 : f32 to vector<176x24xf32>
      %20 = arith.cmpf ogt, %18, %19 : vector<176x24xf32>
      %cst_23 = arith.constant 0.00999999977 : f32
      %21 = vector.broadcast %cst_23 : f32 to vector<176x24xf32>
      %22 = arith.mulf %21, %18 : vector<176x24xf32>
      %23 = arith.select %20, %18, %22 : vector<176x24xi1>, vector<176x24xf32>
      %24 = vector.extract_strided_slice %23 {offsets = [0, 0], sizes = [88, 24], strides = [1, 1]} : vector<176x24xf32> to vector<88x24xf32>
      %25 = vector.extract_strided_slice %23 {offsets = [88, 0], sizes = [88, 24], strides = [1, 1]} : vector<176x24xf32> to vector<88x24xf32>
      %26 = arith.maximumf %24, %25 : vector<88x24xf32>
      %c0_24 = arith.constant 0 : index
      %c0_25 = arith.constant 0 : index
      %27 = vector.load %arg14[%c0_24, %c0_25] : memref<88x24xf32, #tpu.memory_space<vmem>>, vector<88x24xf32>
      tpu.vector_store %arg14[%c0_24, %c0_25], %26 {strides = array<i32>} : memref<88x24xf32, #tpu.memory_space<vmem>>, vector<88x24xf32>,
      %c0_26 = arith.constant 0 : index
      %c0_27 = arith.constant 0 : index
      %28 = tpu.strided_load %arg14[%c0_26, %c0_27] {strides = array<i32: 2, 1>} : memref<88x24xf32, #tpu.memory_space<vmem>>, vector<44x24xf32>
      %c1 = arith.constant 1 : index
      %c0_28 = arith.constant 0 : index
      %29 = tpu.strided_load %arg14[%c1, %c0_28] {strides = array<i32: 2, 1>} : memref<88x24xf32, #tpu.memory_space<vmem>>, vector<44x24xf32>
      %30 = arith.maximumf %28, %29 : vector<44x24xf32>
      %c44_i32_29 = arith.constant 44 : i32
      %31 = arith.muli %arg17, %c44_i32_29 : i32
      %32 = arith.index_cast %31 : i32 to index
      %c0_30 = arith.constant 0 : index
      %33 = vector.load %arg12[%32, %c0_30] : memref<1936x24xf32, #tpu.memory_space<vmem>>, vector<44x24xf32>
      tpu.vector_store %arg12[%32, %c0_30], %30 {strides = array<i32>} : memref<1936x24xf32, #tpu.memory_space<vmem>>, vector<44x24xf32>,
    }
    %c44_i32_13 = arith.constant 44 : i32
    %c0_i32_14 = arith.constant 0 : i32
    %c20_i32 = arith.constant 20 : i32
    %8 = arith.addi %c0_i32_14, %c20_i32 : i32
    %c1_i32_15 = arith.constant 1 : i32
    scf.for %arg17 = %c0_i32_14 to %8 step %c1_i32_15  : i32 {
      %c2_i32 = arith.constant 2 : i32
      %10 = arith.muli %c2_i32, %arg17 : i32
      %cst = arith.constant 0.000000e+00 : f32
      %11 = vector.broadcast %cst : f32 to vector<40x48xf32>
      %c0_i32_20 = arith.constant 0 : i32
      %12 = arith.addi %10, %c0_i32_20 : i32
      %c44_i32_21 = arith.constant 44 : i32
      %13 = arith.muli %12, %c44_i32_21 : i32
      %c0_i32_22 = arith.constant 0 : i32
      %14 = arith.addi %13, %c0_i32_22 : i32
      %15 = arith.index_cast %14 : i32 to index
      %c0_23 = arith.constant 0 : index
      %16 = vector.load %arg12[%15, %c0_23] : memref<1936x24xf32, #tpu.memory_space<vmem>>, vector<40x24xf32>
      %c1_i32_24 = arith.constant 1 : i32
      %17 = arith.addi %13, %c1_i32_24 : i32
      %18 = arith.index_cast %17 : i32 to index
      %c0_25 = arith.constant 0 : index
      %19 = vector.load %arg12[%18, %c0_25] : memref<1936x24xf32, #tpu.memory_space<vmem>>, vector<40x24xf32>
      %c2_i32_26 = arith.constant 2 : i32
      %20 = arith.addi %13, %c2_i32_26 : i32
      %21 = arith.index_cast %20 : i32 to index
      %c0_27 = arith.constant 0 : index
      %22 = vector.load %arg12[%21, %c0_27] : memref<1936x24xf32, #tpu.memory_space<vmem>>, vector<40x24xf32>
      %c3_i32 = arith.constant 3 : i32
      %23 = arith.addi %13, %c3_i32 : i32
      %24 = arith.index_cast %23 : i32 to index
      %c0_28 = arith.constant 0 : index
      %25 = vector.load %arg12[%24, %c0_28] : memref<1936x24xf32, #tpu.memory_space<vmem>>, vector<40x24xf32>
      %c4_i32 = arith.constant 4 : i32
      %26 = arith.addi %13, %c4_i32 : i32
      %27 = arith.index_cast %26 : i32 to index
      %c0_29 = arith.constant 0 : index
      %28 = vector.load %arg12[%27, %c0_29] : memref<1936x24xf32, #tpu.memory_space<vmem>>, vector<40x24xf32>
      %29 = tpu.concatenate %16, %19, %22, %25, %28 in 1 : vector<40x24xf32>, vector<40x24xf32>, vector<40x24xf32>, vector<40x24xf32>, vector<40x24xf32> -> vector<40x120xf32>
      %30 = arith.truncf %29 : vector<40x120xf32> to vector<40x120xbf16>
      %c0_30 = arith.constant 0 : index
      %c0_31 = arith.constant 0 : index
      %c0_32 = arith.constant 0 : index
      %31 = vector.load %arg5[%c0_30, %c0_31, %c0_32] : memref<5x120x48xbf16, #tpu.memory_space<vmem>>, vector<1x120x48xbf16>
      %32 = vector.shape_cast %31 : vector<1x120x48xbf16> to vector<120x48xbf16>
      %cst_33 = arith.constant dense<0.000000e+00> : vector<40x48xf32>
      %33 = tpu.matmul %30, %32, %cst_33 {dimension_numbers = #tpu.dot_dimension_numbers<[1], [0], [0], [1], [0, 0, 1, 1], [], []>} : vector<40x120xbf16>, vector<120x48xbf16>, vector<40x48xf32> -> vector<40x48xf32>
      %34 = arith.addf %11, %33 : vector<40x48xf32>
      %c1_i32_34 = arith.constant 1 : i32
      %35 = arith.addi %10, %c1_i32_34 : i32
      %c44_i32_35 = arith.constant 44 : i32
      %36 = arith.muli %35, %c44_i32_35 : i32
      %c0_i32_36 = arith.constant 0 : i32
      %37 = arith.addi %36, %c0_i32_36 : i32
      %38 = arith.index_cast %37 : i32 to index
      %c0_37 = arith.constant 0 : index
      %39 = vector.load %arg12[%38, %c0_37] : memref<1936x24xf32, #tpu.memory_space<vmem>>, vector<40x24xf32>
      %c1_i32_38 = arith.constant 1 : i32
      %40 = arith.addi %36, %c1_i32_38 : i32
      %41 = arith.index_cast %40 : i32 to index
      %c0_39 = arith.constant 0 : index
      %42 = vector.load %arg12[%41, %c0_39] : memref<1936x24xf32, #tpu.memory_space<vmem>>, vector<40x24xf32>
      %c2_i32_40 = arith.constant 2 : i32
      %43 = arith.addi %36, %c2_i32_40 : i32
      %44 = arith.index_cast %43 : i32 to index
      %c0_41 = arith.constant 0 : index
      %45 = vector.load %arg12[%44, %c0_41] : memref<1936x24xf32, #tpu.memory_space<vmem>>, vector<40x24xf32>
      %c3_i32_42 = arith.constant 3 : i32
      %46 = arith.addi %36, %c3_i32_42 : i32
      %47 = arith.index_cast %46 : i32 to index
      %c0_43 = arith.constant 0 : index
      %48 = vector.load %arg12[%47, %c0_43] : memref<1936x24xf32, #tpu.memory_space<vmem>>, vector<40x24xf32>
      %c4_i32_44 = arith.constant 4 : i32
      %49 = arith.addi %36, %c4_i32_44 : i32
      %50 = arith.index_cast %49 : i32 to index
      %c0_45 = arith.constant 0 : index
      %51 = vector.load %arg12[%50, %c0_45] : memref<1936x24xf32, #tpu.memory_space<vmem>>, vector<40x24xf32>
      %52 = tpu.concatenate %39, %42, %45, %48, %51 in 1 : vector<40x24xf32>, vector<40x24xf32>, vector<40x24xf32>, vector<40x24xf32>, vector<40x24xf32> -> vector<40x120xf32>
      %53 = arith.truncf %52 : vector<40x120xf32> to vector<40x120xbf16>
      %c1 = arith.constant 1 : index
      %c0_46 = arith.constant 0 : index
      %c0_47 = arith.constant 0 : index
      %54 = vector.load %arg5[%c1, %c0_46, %c0_47] : memref<5x120x48xbf16, #tpu.memory_space<vmem>>, vector<1x120x48xbf16>
      %55 = vector.shape_cast %54 : vector<1x120x48xbf16> to vector<120x48xbf16>
      %cst_48 = arith.constant dense<0.000000e+00> : vector<40x48xf32>
      %56 = tpu.matmul %53, %55, %cst_48 {dimension_numbers = #tpu.dot_dimension_numbers<[1], [0], [0], [1], [0, 0, 1, 1], [], []>} : vector<40x120xbf16>, vector<120x48xbf16>, vector<40x48xf32> -> vector<40x48xf32>
      %57 = arith.addf %34, %56 : vector<40x48xf32>
      %c2_i32_49 = arith.constant 2 : i32
      %58 = arith.addi %10, %c2_i32_49 : i32
      %c44_i32_50 = arith.constant 44 : i32
      %59 = arith.muli %58, %c44_i32_50 : i32
      %c0_i32_51 = arith.constant 0 : i32
      %60 = arith.addi %59, %c0_i32_51 : i32
      %61 = arith.index_cast %60 : i32 to index
      %c0_52 = arith.constant 0 : index
      %62 = vector.load %arg12[%61, %c0_52] : memref<1936x24xf32, #tpu.memory_space<vmem>>, vector<40x24xf32>
      %c1_i32_53 = arith.constant 1 : i32
      %63 = arith.addi %59, %c1_i32_53 : i32
      %64 = arith.index_cast %63 : i32 to index
      %c0_54 = arith.constant 0 : index
      %65 = vector.load %arg12[%64, %c0_54] : memref<1936x24xf32, #tpu.memory_space<vmem>>, vector<40x24xf32>
      %c2_i32_55 = arith.constant 2 : i32
      %66 = arith.addi %59, %c2_i32_55 : i32
      %67 = arith.index_cast %66 : i32 to index
      %c0_56 = arith.constant 0 : index
      %68 = vector.load %arg12[%67, %c0_56] : memref<1936x24xf32, #tpu.memory_space<vmem>>, vector<40x24xf32>
      %c3_i32_57 = arith.constant 3 : i32
      %69 = arith.addi %59, %c3_i32_57 : i32
      %70 = arith.index_cast %69 : i32 to index
      %c0_58 = arith.constant 0 : index
      %71 = vector.load %arg12[%70, %c0_58] : memref<1936x24xf32, #tpu.memory_space<vmem>>, vector<40x24xf32>
      %c4_i32_59 = arith.constant 4 : i32
      %72 = arith.addi %59, %c4_i32_59 : i32
      %73 = arith.index_cast %72 : i32 to index
      %c0_60 = arith.constant 0 : index
      %74 = vector.load %arg12[%73, %c0_60] : memref<1936x24xf32, #tpu.memory_space<vmem>>, vector<40x24xf32>
      %75 = tpu.concatenate %62, %65, %68, %71, %74 in 1 : vector<40x24xf32>, vector<40x24xf32>, vector<40x24xf32>, vector<40x24xf32>, vector<40x24xf32> -> vector<40x120xf32>
      %76 = arith.truncf %75 : vector<40x120xf32> to vector<40x120xbf16>
      %c2 = arith.constant 2 : index
      %c0_61 = arith.constant 0 : index
      %c0_62 = arith.constant 0 : index
      %77 = vector.load %arg5[%c2, %c0_61, %c0_62] : memref<5x120x48xbf16, #tpu.memory_space<vmem>>, vector<1x120x48xbf16>
      %78 = vector.shape_cast %77 : vector<1x120x48xbf16> to vector<120x48xbf16>
      %cst_63 = arith.constant dense<0.000000e+00> : vector<40x48xf32>
      %79 = tpu.matmul %76, %78, %cst_63 {dimension_numbers = #tpu.dot_dimension_numbers<[1], [0], [0], [1], [0, 0, 1, 1], [], []>} : vector<40x120xbf16>, vector<120x48xbf16>, vector<40x48xf32> -> vector<40x48xf32>
      %80 = arith.addf %57, %79 : vector<40x48xf32>
      %c3_i32_64 = arith.constant 3 : i32
      %81 = arith.addi %10, %c3_i32_64 : i32
      %c44_i32_65 = arith.constant 44 : i32
      %82 = arith.muli %81, %c44_i32_65 : i32
      %c0_i32_66 = arith.constant 0 : i32
      %83 = arith.addi %82, %c0_i32_66 : i32
      %84 = arith.index_cast %83 : i32 to index
      %c0_67 = arith.constant 0 : index
      %85 = vector.load %arg12[%84, %c0_67] : memref<1936x24xf32, #tpu.memory_space<vmem>>, vector<40x24xf32>
      %c1_i32_68 = arith.constant 1 : i32
      %86 = arith.addi %82, %c1_i32_68 : i32
      %87 = arith.index_cast %86 : i32 to index
      %c0_69 = arith.constant 0 : index
      %88 = vector.load %arg12[%87, %c0_69] : memref<1936x24xf32, #tpu.memory_space<vmem>>, vector<40x24xf32>
      %c2_i32_70 = arith.constant 2 : i32
      %89 = arith.addi %82, %c2_i32_70 : i32
      %90 = arith.index_cast %89 : i32 to index
      %c0_71 = arith.constant 0 : index
      %91 = vector.load %arg12[%90, %c0_71] : memref<1936x24xf32, #tpu.memory_space<vmem>>, vector<40x24xf32>
      %c3_i32_72 = arith.constant 3 : i32
      %92 = arith.addi %82, %c3_i32_72 : i32
      %93 = arith.index_cast %92 : i32 to index
      %c0_73 = arith.constant 0 : index
      %94 = vector.load %arg12[%93, %c0_73] : memref<1936x24xf32, #tpu.memory_space<vmem>>, vector<40x24xf32>
      %c4_i32_74 = arith.constant 4 : i32
      %95 = arith.addi %82, %c4_i32_74 : i32
      %96 = arith.index_cast %95 : i32 to index
      %c0_75 = arith.constant 0 : index
      %97 = vector.load %arg12[%96, %c0_75] : memref<1936x24xf32, #tpu.memory_space<vmem>>, vector<40x24xf32>
      %98 = tpu.concatenate %85, %88, %91, %94, %97 in 1 : vector<40x24xf32>, vector<40x24xf32>, vector<40x24xf32>, vector<40x24xf32>, vector<40x24xf32> -> vector<40x120xf32>
      %99 = arith.truncf %98 : vector<40x120xf32> to vector<40x120xbf16>
      %c3 = arith.constant 3 : index
      %c0_76 = arith.constant 0 : index
      %c0_77 = arith.constant 0 : index
      %100 = vector.load %arg5[%c3, %c0_76, %c0_77] : memref<5x120x48xbf16, #tpu.memory_space<vmem>>, vector<1x120x48xbf16>
      %101 = vector.shape_cast %100 : vector<1x120x48xbf16> to vector<120x48xbf16>
      %cst_78 = arith.constant dense<0.000000e+00> : vector<40x48xf32>
      %102 = tpu.matmul %99, %101, %cst_78 {dimension_numbers = #tpu.dot_dimension_numbers<[1], [0], [0], [1], [0, 0, 1, 1], [], []>} : vector<40x120xbf16>, vector<120x48xbf16>, vector<40x48xf32> -> vector<40x48xf32>
      %103 = arith.addf %80, %102 : vector<40x48xf32>
      %c4_i32_79 = arith.constant 4 : i32
      %104 = arith.addi %10, %c4_i32_79 : i32
      %c44_i32_80 = arith.constant 44 : i32
      %105 = arith.muli %104, %c44_i32_80 : i32
      %c0_i32_81 = arith.constant 0 : i32
      %106 = arith.addi %105, %c0_i32_81 : i32
      %107 = arith.index_cast %106 : i32 to index
      %c0_82 = arith.constant 0 : index
      %108 = vector.load %arg12[%107, %c0_82] : memref<1936x24xf32, #tpu.memory_space<vmem>>, vector<40x24xf32>
      %c1_i32_83 = arith.constant 1 : i32
      %109 = arith.addi %105, %c1_i32_83 : i32
      %110 = arith.index_cast %109 : i32 to index
      %c0_84 = arith.constant 0 : index
      %111 = vector.load %arg12[%110, %c0_84] : memref<1936x24xf32, #tpu.memory_space<vmem>>, vector<40x24xf32>
      %c2_i32_85 = arith.constant 2 : i32
      %112 = arith.addi %105, %c2_i32_85 : i32
      %113 = arith.index_cast %112 : i32 to index
      %c0_86 = arith.constant 0 : index
      %114 = vector.load %arg12[%113, %c0_86] : memref<1936x24xf32, #tpu.memory_space<vmem>>, vector<40x24xf32>
      %c3_i32_87 = arith.constant 3 : i32
      %115 = arith.addi %105, %c3_i32_87 : i32
      %116 = arith.index_cast %115 : i32 to index
      %c0_88 = arith.constant 0 : index
      %117 = vector.load %arg12[%116, %c0_88] : memref<1936x24xf32, #tpu.memory_space<vmem>>, vector<40x24xf32>
      %c4_i32_89 = arith.constant 4 : i32
      %118 = arith.addi %105, %c4_i32_89 : i32
      %119 = arith.index_cast %118 : i32 to index
      %c0_90 = arith.constant 0 : index
      %120 = vector.load %arg12[%119, %c0_90] : memref<1936x24xf32, #tpu.memory_space<vmem>>, vector<40x24xf32>
      %121 = tpu.concatenate %108, %111, %114, %117, %120 in 1 : vector<40x24xf32>, vector<40x24xf32>, vector<40x24xf32>, vector<40x24xf32>, vector<40x24xf32> -> vector<40x120xf32>
      %122 = arith.truncf %121 : vector<40x120xf32> to vector<40x120xbf16>
      %c4 = arith.constant 4 : index
      %c0_91 = arith.constant 0 : index
      %c0_92 = arith.constant 0 : index
      %123 = vector.load %arg5[%c4, %c0_91, %c0_92] : memref<5x120x48xbf16, #tpu.memory_space<vmem>>, vector<1x120x48xbf16>
      %124 = vector.shape_cast %123 : vector<1x120x48xbf16> to vector<120x48xbf16>
      %cst_93 = arith.constant dense<0.000000e+00> : vector<40x48xf32>
      %125 = tpu.matmul %122, %124, %cst_93 {dimension_numbers = #tpu.dot_dimension_numbers<[1], [0], [0], [1], [0, 0, 1, 1], [], []>} : vector<40x120xbf16>, vector<120x48xbf16>, vector<40x48xf32> -> vector<40x48xf32>
      %126 = arith.addf %103, %125 : vector<40x48xf32>
      %127 = vector.broadcast %2 : vector<1x48xf32> to vector<40x48xf32>
      %128 = arith.mulf %126, %127 : vector<40x48xf32>
      %129 = vector.broadcast %3 : vector<1x48xf32> to vector<40x48xf32>
      %130 = arith.addf %128, %129 : vector<40x48xf32>
      %cst_94 = arith.constant 0.000000e+00 : f32
      %131 = vector.broadcast %cst_94 : f32 to vector<40x48xf32>
      %132 = arith.cmpf ogt, %130, %131 : vector<40x48xf32>
      %cst_95 = arith.constant 0.00999999977 : f32
      %133 = vector.broadcast %cst_95 : f32 to vector<40x48xf32>
      %134 = arith.mulf %133, %130 : vector<40x48xf32>
      %135 = arith.select %132, %130, %134 : vector<40x48xi1>, vector<40x48xf32>
      %c1_i32_96 = arith.constant 1 : i32
      %136 = arith.addi %10, %c1_i32_96 : i32
      %cst_97 = arith.constant 0.000000e+00 : f32
      %137 = vector.broadcast %cst_97 : f32 to vector<40x48xf32>
      %c0_i32_98 = arith.constant 0 : i32
      %138 = arith.addi %136, %c0_i32_98 : i32
      %c44_i32_99 = arith.constant 44 : i32
      %139 = arith.muli %138, %c44_i32_99 : i32
      %c0_i32_100 = arith.constant 0 : i32
      %140 = arith.addi %139, %c0_i32_100 : i32
      %141 = arith.index_cast %140 : i32 to index
      %c0_101 = arith.constant 0 : index
      %142 = vector.load %arg12[%141, %c0_101] : memref<1936x24xf32, #tpu.memory_space<vmem>>, vector<40x24xf32>
      %c1_i32_102 = arith.constant 1 : i32
      %143 = arith.addi %139, %c1_i32_102 : i32
      %144 = arith.index_cast %143 : i32 to index
      %c0_103 = arith.constant 0 : index
      %145 = vector.load %arg12[%144, %c0_103] : memref<1936x24xf32, #tpu.memory_space<vmem>>, vector<40x24xf32>
      %c2_i32_104 = arith.constant 2 : i32
      %146 = arith.addi %139, %c2_i32_104 : i32
      %147 = arith.index_cast %146 : i32 to index
      %c0_105 = arith.constant 0 : index
      %148 = vector.load %arg12[%147, %c0_105] : memref<1936x24xf32, #tpu.memory_space<vmem>>, vector<40x24xf32>
      %c3_i32_106 = arith.constant 3 : i32
      %149 = arith.addi %139, %c3_i32_106 : i32
      %150 = arith.index_cast %149 : i32 to index
      %c0_107 = arith.constant 0 : index
      %151 = vector.load %arg12[%150, %c0_107] : memref<1936x24xf32, #tpu.memory_space<vmem>>, vector<40x24xf32>
      %c4_i32_108 = arith.constant 4 : i32
      %152 = arith.addi %139, %c4_i32_108 : i32
      %153 = arith.index_cast %152 : i32 to index
      %c0_109 = arith.constant 0 : index
      %154 = vector.load %arg12[%153, %c0_109] : memref<1936x24xf32, #tpu.memory_space<vmem>>, vector<40x24xf32>
      %155 = tpu.concatenate %142, %145, %148, %151, %154 in 1 : vector<40x24xf32>, vector<40x24xf32>, vector<40x24xf32>, vector<40x24xf32>, vector<40x24xf32> -> vector<40x120xf32>
      %156 = arith.truncf %155 : vector<40x120xf32> to vector<40x120xbf16>
      %c0_110 = arith.constant 0 : index
      %c0_111 = arith.constant 0 : index
      %c0_112 = arith.constant 0 : index
      %157 = vector.load %arg5[%c0_110, %c0_111, %c0_112] : memref<5x120x48xbf16, #tpu.memory_space<vmem>>, vector<1x120x48xbf16>
      %158 = vector.shape_cast %157 : vector<1x120x48xbf16> to vector<120x48xbf16>
      %cst_113 = arith.constant dense<0.000000e+00> : vector<40x48xf32>
      %159 = tpu.matmul %156, %158, %cst_113 {dimension_numbers = #tpu.dot_dimension_numbers<[1], [0], [0], [1], [0, 0, 1, 1], [], []>} : vector<40x120xbf16>, vector<120x48xbf16>, vector<40x48xf32> -> vector<40x48xf32>
      %160 = arith.addf %137, %159 : vector<40x48xf32>
      %c1_i32_114 = arith.constant 1 : i32
      %161 = arith.addi %136, %c1_i32_114 : i32
      %c44_i32_115 = arith.constant 44 : i32
      %162 = arith.muli %161, %c44_i32_115 : i32
      %c0_i32_116 = arith.constant 0 : i32
      %163 = arith.addi %162, %c0_i32_116 : i32
      %164 = arith.index_cast %163 : i32 to index
      %c0_117 = arith.constant 0 : index
      %165 = vector.load %arg12[%164, %c0_117] : memref<1936x24xf32, #tpu.memory_space<vmem>>, vector<40x24xf32>
      %c1_i32_118 = arith.constant 1 : i32
      %166 = arith.addi %162, %c1_i32_118 : i32
      %167 = arith.index_cast %166 : i32 to index
      %c0_119 = arith.constant 0 : index
      %168 = vector.load %arg12[%167, %c0_119] : memref<1936x24xf32, #tpu.memory_space<vmem>>, vector<40x24xf32>
      %c2_i32_120 = arith.constant 2 : i32
      %169 = arith.addi %162, %c2_i32_120 : i32
      %170 = arith.index_cast %169 : i32 to index
      %c0_121 = arith.constant 0 : index
      %171 = vector.load %arg12[%170, %c0_121] : memref<1936x24xf32, #tpu.memory_space<vmem>>, vector<40x24xf32>
      %c3_i32_122 = arith.constant 3 : i32
      %172 = arith.addi %162, %c3_i32_122 : i32
      %173 = arith.index_cast %172 : i32 to index
      %c0_123 = arith.constant 0 : index
      %174 = vector.load %arg12[%173, %c0_123] : memref<1936x24xf32, #tpu.memory_space<vmem>>, vector<40x24xf32>
      %c4_i32_124 = arith.constant 4 : i32
      %175 = arith.addi %162, %c4_i32_124 : i32
      %176 = arith.index_cast %175 : i32 to index
      %c0_125 = arith.constant 0 : index
      %177 = vector.load %arg12[%176, %c0_125] : memref<1936x24xf32, #tpu.memory_space<vmem>>, vector<40x24xf32>
      %178 = tpu.concatenate %165, %168, %171, %174, %177 in 1 : vector<40x24xf32>, vector<40x24xf32>, vector<40x24xf32>, vector<40x24xf32>, vector<40x24xf32> -> vector<40x120xf32>
      %179 = arith.truncf %178 : vector<40x120xf32> to vector<40x120xbf16>
      %c1_126 = arith.constant 1 : index
      %c0_127 = arith.constant 0 : index
      %c0_128 = arith.constant 0 : index
      %180 = vector.load %arg5[%c1_126, %c0_127, %c0_128] : memref<5x120x48xbf16, #tpu.memory_space<vmem>>, vector<1x120x48xbf16>
      %181 = vector.shape_cast %180 : vector<1x120x48xbf16> to vector<120x48xbf16>
      %cst_129 = arith.constant dense<0.000000e+00> : vector<40x48xf32>
      %182 = tpu.matmul %179, %181, %cst_129 {dimension_numbers = #tpu.dot_dimension_numbers<[1], [0], [0], [1], [0, 0, 1, 1], [], []>} : vector<40x120xbf16>, vector<120x48xbf16>, vector<40x48xf32> -> vector<40x48xf32>
      %183 = arith.addf %160, %182 : vector<40x48xf32>
      %c2_i32_130 = arith.constant 2 : i32
      %184 = arith.addi %136, %c2_i32_130 : i32
      %c44_i32_131 = arith.constant 44 : i32
      %185 = arith.muli %184, %c44_i32_131 : i32
      %c0_i32_132 = arith.constant 0 : i32
      %186 = arith.addi %185, %c0_i32_132 : i32
      %187 = arith.index_cast %186 : i32 to index
      %c0_133 = arith.constant 0 : index
      %188 = vector.load %arg12[%187, %c0_133] : memref<1936x24xf32, #tpu.memory_space<vmem>>, vector<40x24xf32>
      %c1_i32_134 = arith.constant 1 : i32
      %189 = arith.addi %185, %c1_i32_134 : i32
      %190 = arith.index_cast %189 : i32 to index
      %c0_135 = arith.constant 0 : index
      %191 = vector.load %arg12[%190, %c0_135] : memref<1936x24xf32, #tpu.memory_space<vmem>>, vector<40x24xf32>
      %c2_i32_136 = arith.constant 2 : i32
      %192 = arith.addi %185, %c2_i32_136 : i32
      %193 = arith.index_cast %192 : i32 to index
      %c0_137 = arith.constant 0 : index
      %194 = vector.load %arg12[%193, %c0_137] : memref<1936x24xf32, #tpu.memory_space<vmem>>, vector<40x24xf32>
      %c3_i32_138 = arith.constant 3 : i32
      %195 = arith.addi %185, %c3_i32_138 : i32
      %196 = arith.index_cast %195 : i32 to index
      %c0_139 = arith.constant 0 : index
      %197 = vector.load %arg12[%196, %c0_139] : memref<1936x24xf32, #tpu.memory_space<vmem>>, vector<40x24xf32>
      %c4_i32_140 = arith.constant 4 : i32
      %198 = arith.addi %185, %c4_i32_140 : i32
      %199 = arith.index_cast %198 : i32 to index
      %c0_141 = arith.constant 0 : index
      %200 = vector.load %arg12[%199, %c0_141] : memref<1936x24xf32, #tpu.memory_space<vmem>>, vector<40x24xf32>
      %201 = tpu.concatenate %188, %191, %194, %197, %200 in 1 : vector<40x24xf32>, vector<40x24xf32>, vector<40x24xf32>, vector<40x24xf32>, vector<40x24xf32> -> vector<40x120xf32>
      %202 = arith.truncf %201 : vector<40x120xf32> to vector<40x120xbf16>
      %c2_142 = arith.constant 2 : index
      %c0_143 = arith.constant 0 : index
      %c0_144 = arith.constant 0 : index
      %203 = vector.load %arg5[%c2_142, %c0_143, %c0_144] : memref<5x120x48xbf16, #tpu.memory_space<vmem>>, vector<1x120x48xbf16>
      %204 = vector.shape_cast %203 : vector<1x120x48xbf16> to vector<120x48xbf16>
      %cst_145 = arith.constant dense<0.000000e+00> : vector<40x48xf32>
      %205 = tpu.matmul %202, %204, %cst_145 {dimension_numbers = #tpu.dot_dimension_numbers<[1], [0], [0], [1], [0, 0, 1, 1], [], []>} : vector<40x120xbf16>, vector<120x48xbf16>, vector<40x48xf32> -> vector<40x48xf32>
      %206 = arith.addf %183, %205 : vector<40x48xf32>
      %c3_i32_146 = arith.constant 3 : i32
      %207 = arith.addi %136, %c3_i32_146 : i32
      %c44_i32_147 = arith.constant 44 : i32
      %208 = arith.muli %207, %c44_i32_147 : i32
      %c0_i32_148 = arith.constant 0 : i32
      %209 = arith.addi %208, %c0_i32_148 : i32
      %210 = arith.index_cast %209 : i32 to index
      %c0_149 = arith.constant 0 : index
      %211 = vector.load %arg12[%210, %c0_149] : memref<1936x24xf32, #tpu.memory_space<vmem>>, vector<40x24xf32>
      %c1_i32_150 = arith.constant 1 : i32
      %212 = arith.addi %208, %c1_i32_150 : i32
      %213 = arith.index_cast %212 : i32 to index
      %c0_151 = arith.constant 0 : index
      %214 = vector.load %arg12[%213, %c0_151] : memref<1936x24xf32, #tpu.memory_space<vmem>>, vector<40x24xf32>
      %c2_i32_152 = arith.constant 2 : i32
      %215 = arith.addi %208, %c2_i32_152 : i32
      %216 = arith.index_cast %215 : i32 to index
      %c0_153 = arith.constant 0 : index
      %217 = vector.load %arg12[%216, %c0_153] : memref<1936x24xf32, #tpu.memory_space<vmem>>, vector<40x24xf32>
      %c3_i32_154 = arith.constant 3 : i32
      %218 = arith.addi %208, %c3_i32_154 : i32
      %219 = arith.index_cast %218 : i32 to index
      %c0_155 = arith.constant 0 : index
      %220 = vector.load %arg12[%219, %c0_155] : memref<1936x24xf32, #tpu.memory_space<vmem>>, vector<40x24xf32>
      %c4_i32_156 = arith.constant 4 : i32
      %221 = arith.addi %208, %c4_i32_156 : i32
      %222 = arith.index_cast %221 : i32 to index
      %c0_157 = arith.constant 0 : index
      %223 = vector.load %arg12[%222, %c0_157] : memref<1936x24xf32, #tpu.memory_space<vmem>>, vector<40x24xf32>
      %224 = tpu.concatenate %211, %214, %217, %220, %223 in 1 : vector<40x24xf32>, vector<40x24xf32>, vector<40x24xf32>, vector<40x24xf32>, vector<40x24xf32> -> vector<40x120xf32>
      %225 = arith.truncf %224 : vector<40x120xf32> to vector<40x120xbf16>
      %c3_158 = arith.constant 3 : index
      %c0_159 = arith.constant 0 : index
      %c0_160 = arith.constant 0 : index
      %226 = vector.load %arg5[%c3_158, %c0_159, %c0_160] : memref<5x120x48xbf16, #tpu.memory_space<vmem>>, vector<1x120x48xbf16>
      %227 = vector.shape_cast %226 : vector<1x120x48xbf16> to vector<120x48xbf16>
      %cst_161 = arith.constant dense<0.000000e+00> : vector<40x48xf32>
      %228 = tpu.matmul %225, %227, %cst_161 {dimension_numbers = #tpu.dot_dimension_numbers<[1], [0], [0], [1], [0, 0, 1, 1], [], []>} : vector<40x120xbf16>, vector<120x48xbf16>, vector<40x48xf32> -> vector<40x48xf32>
      %229 = arith.addf %206, %228 : vector<40x48xf32>
      %c4_i32_162 = arith.constant 4 : i32
      %230 = arith.addi %136, %c4_i32_162 : i32
      %c44_i32_163 = arith.constant 44 : i32
      %231 = arith.muli %230, %c44_i32_163 : i32
      %c0_i32_164 = arith.constant 0 : i32
      %232 = arith.addi %231, %c0_i32_164 : i32
      %233 = arith.index_cast %232 : i32 to index
      %c0_165 = arith.constant 0 : index
      %234 = vector.load %arg12[%233, %c0_165] : memref<1936x24xf32, #tpu.memory_space<vmem>>, vector<40x24xf32>
      %c1_i32_166 = arith.constant 1 : i32
      %235 = arith.addi %231, %c1_i32_166 : i32
      %236 = arith.index_cast %235 : i32 to index
      %c0_167 = arith.constant 0 : index
      %237 = vector.load %arg12[%236, %c0_167] : memref<1936x24xf32, #tpu.memory_space<vmem>>, vector<40x24xf32>
      %c2_i32_168 = arith.constant 2 : i32
      %238 = arith.addi %231, %c2_i32_168 : i32
      %239 = arith.index_cast %238 : i32 to index
      %c0_169 = arith.constant 0 : index
      %240 = vector.load %arg12[%239, %c0_169] : memref<1936x24xf32, #tpu.memory_space<vmem>>, vector<40x24xf32>
      %c3_i32_170 = arith.constant 3 : i32
      %241 = arith.addi %231, %c3_i32_170 : i32
      %242 = arith.index_cast %241 : i32 to index
      %c0_171 = arith.constant 0 : index
      %243 = vector.load %arg12[%242, %c0_171] : memref<1936x24xf32, #tpu.memory_space<vmem>>, vector<40x24xf32>
      %c4_i32_172 = arith.constant 4 : i32
      %244 = arith.addi %231, %c4_i32_172 : i32
      %245 = arith.index_cast %244 : i32 to index
      %c0_173 = arith.constant 0 : index
      %246 = vector.load %arg12[%245, %c0_173] : memref<1936x24xf32, #tpu.memory_space<vmem>>, vector<40x24xf32>
      %247 = tpu.concatenate %234, %237, %240, %243, %246 in 1 : vector<40x24xf32>, vector<40x24xf32>, vector<40x24xf32>, vector<40x24xf32>, vector<40x24xf32> -> vector<40x120xf32>
      %248 = arith.truncf %247 : vector<40x120xf32> to vector<40x120xbf16>
      %c4_174 = arith.constant 4 : index
      %c0_175 = arith.constant 0 : index
      %c0_176 = arith.constant 0 : index
      %249 = vector.load %arg5[%c4_174, %c0_175, %c0_176] : memref<5x120x48xbf16, #tpu.memory_space<vmem>>, vector<1x120x48xbf16>
      %250 = vector.shape_cast %249 : vector<1x120x48xbf16> to vector<120x48xbf16>
      %cst_177 = arith.constant dense<0.000000e+00> : vector<40x48xf32>
      %251 = tpu.matmul %248, %250, %cst_177 {dimension_numbers = #tpu.dot_dimension_numbers<[1], [0], [0], [1], [0, 0, 1, 1], [], []>} : vector<40x120xbf16>, vector<120x48xbf16>, vector<40x48xf32> -> vector<40x48xf32>
      %252 = arith.addf %229, %251 : vector<40x48xf32>
      %253 = vector.broadcast %2 : vector<1x48xf32> to vector<40x48xf32>
      %254 = arith.mulf %252, %253 : vector<40x48xf32>
      %255 = vector.broadcast %3 : vector<1x48xf32> to vector<40x48xf32>
      %256 = arith.addf %254, %255 : vector<40x48xf32>
      %cst_178 = arith.constant 0.000000e+00 : f32
      %257 = vector.broadcast %cst_178 : f32 to vector<40x48xf32>
      %258 = arith.cmpf ogt, %256, %257 : vector<40x48xf32>
      %cst_179 = arith.constant 0.00999999977 : f32
      %259 = vector.broadcast %cst_179 : f32 to vector<40x48xf32>
      %260 = arith.mulf %259, %256 : vector<40x48xf32>
      %261 = arith.select %258, %256, %260 : vector<40x48xi1>, vector<40x48xf32>
      %262 = arith.maximumf %135, %261 : vector<40x48xf32>
      %c0_180 = arith.constant 0 : index
      %c0_181 = arith.constant 0 : index
      %263 = vector.load %arg15[%c0_180, %c0_181] : memref<40x48xf32, #tpu.memory_space<vmem>>, vector<40x48xf32>
      tpu.vector_store %arg15[%c0_180, %c0_181], %262 {strides = array<i32>} : memref<40x48xf32, #tpu.memory_space<vmem>>, vector<40x48xf32>,
      %c0_182 = arith.constant 0 : index
      %c0_183 = arith.constant 0 : index
      %264 = tpu.strided_load %arg15[%c0_182, %c0_183] {strides = array<i32: 2, 1>} : memref<40x48xf32, #tpu.memory_space<vmem>>, vector<20x48xf32>
      %c1_184 = arith.constant 1 : index
      %c0_185 = arith.constant 0 : index
      %265 = tpu.strided_load %arg15[%c1_184, %c0_185] {strides = array<i32: 2, 1>} : memref<40x48xf32, #tpu.memory_space<vmem>>, vector<20x48xf32>
      %266 = arith.maximumf %264, %265 : vector<20x48xf32>
      %c20_i32_186 = arith.constant 20 : i32
      %267 = arith.muli %arg17, %c20_i32_186 : i32
      %268 = arith.index_cast %267 : i32 to index
      %c0_187 = arith.constant 0 : index
      %269 = vector.load %arg13[%268, %c0_187] : memref<400x48xf32, #tpu.memory_space<vmem>>, vector<20x48xf32>
      tpu.vector_store %arg13[%268, %c0_187], %266 {strides = array<i32>} : memref<400x48xf32, #tpu.memory_space<vmem>>, vector<20x48xf32>,
    }
    %c20_i32_16 = arith.constant 20 : i32
    %c0_i32_17 = arith.constant 0 : i32
    %c8_i32 = arith.constant 8 : i32
    %9 = arith.addi %c0_i32_17, %c8_i32 : i32
    %c1_i32_18 = arith.constant 1 : i32
    scf.for %arg17 = %c0_i32_17 to %9 step %c1_i32_18  : i32 {
      %c2_i32 = arith.constant 2 : i32
      %10 = arith.muli %c2_i32, %arg17 : i32
      %cst = arith.constant 0.000000e+00 : f32
      %11 = vector.broadcast %cst : f32 to vector<16x64xf32>
      %c0_i32_20 = arith.constant 0 : i32
      %12 = arith.addi %10, %c0_i32_20 : i32
      %c20_i32_21 = arith.constant 20 : i32
      %13 = arith.muli %12, %c20_i32_21 : i32
      %c0_i32_22 = arith.constant 0 : i32
      %14 = arith.addi %13, %c0_i32_22 : i32
      %15 = arith.index_cast %14 : i32 to index
      %c0_23 = arith.constant 0 : index
      %16 = vector.load %arg13[%15, %c0_23] : memref<400x48xf32, #tpu.memory_space<vmem>>, vector<16x48xf32>
      %c1_i32_24 = arith.constant 1 : i32
      %17 = arith.addi %13, %c1_i32_24 : i32
      %18 = arith.index_cast %17 : i32 to index
      %c0_25 = arith.constant 0 : index
      %19 = vector.load %arg13[%18, %c0_25] : memref<400x48xf32, #tpu.memory_space<vmem>>, vector<16x48xf32>
      %c2_i32_26 = arith.constant 2 : i32
      %20 = arith.addi %13, %c2_i32_26 : i32
      %21 = arith.index_cast %20 : i32 to index
      %c0_27 = arith.constant 0 : index
      %22 = vector.load %arg13[%21, %c0_27] : memref<400x48xf32, #tpu.memory_space<vmem>>, vector<16x48xf32>
      %c3_i32 = arith.constant 3 : i32
      %23 = arith.addi %13, %c3_i32 : i32
      %24 = arith.index_cast %23 : i32 to index
      %c0_28 = arith.constant 0 : index
      %25 = vector.load %arg13[%24, %c0_28] : memref<400x48xf32, #tpu.memory_space<vmem>>, vector<16x48xf32>
      %c4_i32 = arith.constant 4 : i32
      %26 = arith.addi %13, %c4_i32 : i32
      %27 = arith.index_cast %26 : i32 to index
      %c0_29 = arith.constant 0 : index
      %28 = vector.load %arg13[%27, %c0_29] : memref<400x48xf32, #tpu.memory_space<vmem>>, vector<16x48xf32>
      %29 = tpu.concatenate %16, %19, %22, %25, %28 in 1 : vector<16x48xf32>, vector<16x48xf32>, vector<16x48xf32>, vector<16x48xf32>, vector<16x48xf32> -> vector<16x240xf32>
      %30 = arith.truncf %29 : vector<16x240xf32> to vector<16x240xbf16>
      %c0_30 = arith.constant 0 : index
      %c0_31 = arith.constant 0 : index
      %c0_32 = arith.constant 0 : index
      %31 = vector.load %arg8[%c0_30, %c0_31, %c0_32] : memref<5x240x64xbf16, #tpu.memory_space<vmem>>, vector<1x240x64xbf16>
      %32 = vector.shape_cast %31 : vector<1x240x64xbf16> to vector<240x64xbf16>
      %cst_33 = arith.constant dense<0.000000e+00> : vector<16x64xf32>
      %33 = tpu.matmul %30, %32, %cst_33 {dimension_numbers = #tpu.dot_dimension_numbers<[1], [0], [0], [1], [0, 0, 1, 1], [], []>} : vector<16x240xbf16>, vector<240x64xbf16>, vector<16x64xf32> -> vector<16x64xf32>
      %34 = arith.addf %11, %33 : vector<16x64xf32>
      %c1_i32_34 = arith.constant 1 : i32
      %35 = arith.addi %10, %c1_i32_34 : i32
      %c20_i32_35 = arith.constant 20 : i32
      %36 = arith.muli %35, %c20_i32_35 : i32
      %c0_i32_36 = arith.constant 0 : i32
      %37 = arith.addi %36, %c0_i32_36 : i32
      %38 = arith.index_cast %37 : i32 to index
      %c0_37 = arith.constant 0 : index
      %39 = vector.load %arg13[%38, %c0_37] : memref<400x48xf32, #tpu.memory_space<vmem>>, vector<16x48xf32>
      %c1_i32_38 = arith.constant 1 : i32
      %40 = arith.addi %36, %c1_i32_38 : i32
      %41 = arith.index_cast %40 : i32 to index
      %c0_39 = arith.constant 0 : index
      %42 = vector.load %arg13[%41, %c0_39] : memref<400x48xf32, #tpu.memory_space<vmem>>, vector<16x48xf32>
      %c2_i32_40 = arith.constant 2 : i32
      %43 = arith.addi %36, %c2_i32_40 : i32
      %44 = arith.index_cast %43 : i32 to index
      %c0_41 = arith.constant 0 : index
      %45 = vector.load %arg13[%44, %c0_41] : memref<400x48xf32, #tpu.memory_space<vmem>>, vector<16x48xf32>
      %c3_i32_42 = arith.constant 3 : i32
      %46 = arith.addi %36, %c3_i32_42 : i32
      %47 = arith.index_cast %46 : i32 to index
      %c0_43 = arith.constant 0 : index
      %48 = vector.load %arg13[%47, %c0_43] : memref<400x48xf32, #tpu.memory_space<vmem>>, vector<16x48xf32>
      %c4_i32_44 = arith.constant 4 : i32
      %49 = arith.addi %36, %c4_i32_44 : i32
      %50 = arith.index_cast %49 : i32 to index
      %c0_45 = arith.constant 0 : index
      %51 = vector.load %arg13[%50, %c0_45] : memref<400x48xf32, #tpu.memory_space<vmem>>, vector<16x48xf32>
      %52 = tpu.concatenate %39, %42, %45, %48, %51 in 1 : vector<16x48xf32>, vector<16x48xf32>, vector<16x48xf32>, vector<16x48xf32>, vector<16x48xf32> -> vector<16x240xf32>
      %53 = arith.truncf %52 : vector<16x240xf32> to vector<16x240xbf16>
      %c1 = arith.constant 1 : index
      %c0_46 = arith.constant 0 : index
      %c0_47 = arith.constant 0 : index
      %54 = vector.load %arg8[%c1, %c0_46, %c0_47] : memref<5x240x64xbf16, #tpu.memory_space<vmem>>, vector<1x240x64xbf16>
      %55 = vector.shape_cast %54 : vector<1x240x64xbf16> to vector<240x64xbf16>
      %cst_48 = arith.constant dense<0.000000e+00> : vector<16x64xf32>
      %56 = tpu.matmul %53, %55, %cst_48 {dimension_numbers = #tpu.dot_dimension_numbers<[1], [0], [0], [1], [0, 0, 1, 1], [], []>} : vector<16x240xbf16>, vector<240x64xbf16>, vector<16x64xf32> -> vector<16x64xf32>
      %57 = arith.addf %34, %56 : vector<16x64xf32>
      %c2_i32_49 = arith.constant 2 : i32
      %58 = arith.addi %10, %c2_i32_49 : i32
      %c20_i32_50 = arith.constant 20 : i32
      %59 = arith.muli %58, %c20_i32_50 : i32
      %c0_i32_51 = arith.constant 0 : i32
      %60 = arith.addi %59, %c0_i32_51 : i32
      %61 = arith.index_cast %60 : i32 to index
      %c0_52 = arith.constant 0 : index
      %62 = vector.load %arg13[%61, %c0_52] : memref<400x48xf32, #tpu.memory_space<vmem>>, vector<16x48xf32>
      %c1_i32_53 = arith.constant 1 : i32
      %63 = arith.addi %59, %c1_i32_53 : i32
      %64 = arith.index_cast %63 : i32 to index
      %c0_54 = arith.constant 0 : index
      %65 = vector.load %arg13[%64, %c0_54] : memref<400x48xf32, #tpu.memory_space<vmem>>, vector<16x48xf32>
      %c2_i32_55 = arith.constant 2 : i32
      %66 = arith.addi %59, %c2_i32_55 : i32
      %67 = arith.index_cast %66 : i32 to index
      %c0_56 = arith.constant 0 : index
      %68 = vector.load %arg13[%67, %c0_56] : memref<400x48xf32, #tpu.memory_space<vmem>>, vector<16x48xf32>
      %c3_i32_57 = arith.constant 3 : i32
      %69 = arith.addi %59, %c3_i32_57 : i32
      %70 = arith.index_cast %69 : i32 to index
      %c0_58 = arith.constant 0 : index
      %71 = vector.load %arg13[%70, %c0_58] : memref<400x48xf32, #tpu.memory_space<vmem>>, vector<16x48xf32>
      %c4_i32_59 = arith.constant 4 : i32
      %72 = arith.addi %59, %c4_i32_59 : i32
      %73 = arith.index_cast %72 : i32 to index
      %c0_60 = arith.constant 0 : index
      %74 = vector.load %arg13[%73, %c0_60] : memref<400x48xf32, #tpu.memory_space<vmem>>, vector<16x48xf32>
      %75 = tpu.concatenate %62, %65, %68, %71, %74 in 1 : vector<16x48xf32>, vector<16x48xf32>, vector<16x48xf32>, vector<16x48xf32>, vector<16x48xf32> -> vector<16x240xf32>
      %76 = arith.truncf %75 : vector<16x240xf32> to vector<16x240xbf16>
      %c2 = arith.constant 2 : index
      %c0_61 = arith.constant 0 : index
      %c0_62 = arith.constant 0 : index
      %77 = vector.load %arg8[%c2, %c0_61, %c0_62] : memref<5x240x64xbf16, #tpu.memory_space<vmem>>, vector<1x240x64xbf16>
      %78 = vector.shape_cast %77 : vector<1x240x64xbf16> to vector<240x64xbf16>
      %cst_63 = arith.constant dense<0.000000e+00> : vector<16x64xf32>
      %79 = tpu.matmul %76, %78, %cst_63 {dimension_numbers = #tpu.dot_dimension_numbers<[1], [0], [0], [1], [0, 0, 1, 1], [], []>} : vector<16x240xbf16>, vector<240x64xbf16>, vector<16x64xf32> -> vector<16x64xf32>
      %80 = arith.addf %57, %79 : vector<16x64xf32>
      %c3_i32_64 = arith.constant 3 : i32
      %81 = arith.addi %10, %c3_i32_64 : i32
      %c20_i32_65 = arith.constant 20 : i32
      %82 = arith.muli %81, %c20_i32_65 : i32
      %c0_i32_66 = arith.constant 0 : i32
      %83 = arith.addi %82, %c0_i32_66 : i32
      %84 = arith.index_cast %83 : i32 to index
      %c0_67 = arith.constant 0 : index
      %85 = vector.load %arg13[%84, %c0_67] : memref<400x48xf32, #tpu.memory_space<vmem>>, vector<16x48xf32>
      %c1_i32_68 = arith.constant 1 : i32
      %86 = arith.addi %82, %c1_i32_68 : i32
      %87 = arith.index_cast %86 : i32 to index
      %c0_69 = arith.constant 0 : index
      %88 = vector.load %arg13[%87, %c0_69] : memref<400x48xf32, #tpu.memory_space<vmem>>, vector<16x48xf32>
      %c2_i32_70 = arith.constant 2 : i32
      %89 = arith.addi %82, %c2_i32_70 : i32
      %90 = arith.index_cast %89 : i32 to index
      %c0_71 = arith.constant 0 : index
      %91 = vector.load %arg13[%90, %c0_71] : memref<400x48xf32, #tpu.memory_space<vmem>>, vector<16x48xf32>
      %c3_i32_72 = arith.constant 3 : i32
      %92 = arith.addi %82, %c3_i32_72 : i32
      %93 = arith.index_cast %92 : i32 to index
      %c0_73 = arith.constant 0 : index
      %94 = vector.load %arg13[%93, %c0_73] : memref<400x48xf32, #tpu.memory_space<vmem>>, vector<16x48xf32>
      %c4_i32_74 = arith.constant 4 : i32
      %95 = arith.addi %82, %c4_i32_74 : i32
      %96 = arith.index_cast %95 : i32 to index
      %c0_75 = arith.constant 0 : index
      %97 = vector.load %arg13[%96, %c0_75] : memref<400x48xf32, #tpu.memory_space<vmem>>, vector<16x48xf32>
      %98 = tpu.concatenate %85, %88, %91, %94, %97 in 1 : vector<16x48xf32>, vector<16x48xf32>, vector<16x48xf32>, vector<16x48xf32>, vector<16x48xf32> -> vector<16x240xf32>
      %99 = arith.truncf %98 : vector<16x240xf32> to vector<16x240xbf16>
      %c3 = arith.constant 3 : index
      %c0_76 = arith.constant 0 : index
      %c0_77 = arith.constant 0 : index
      %100 = vector.load %arg8[%c3, %c0_76, %c0_77] : memref<5x240x64xbf16, #tpu.memory_space<vmem>>, vector<1x240x64xbf16>
      %101 = vector.shape_cast %100 : vector<1x240x64xbf16> to vector<240x64xbf16>
      %cst_78 = arith.constant dense<0.000000e+00> : vector<16x64xf32>
      %102 = tpu.matmul %99, %101, %cst_78 {dimension_numbers = #tpu.dot_dimension_numbers<[1], [0], [0], [1], [0, 0, 1, 1], [], []>} : vector<16x240xbf16>, vector<240x64xbf16>, vector<16x64xf32> -> vector<16x64xf32>
      %103 = arith.addf %80, %102 : vector<16x64xf32>
      %c4_i32_79 = arith.constant 4 : i32
      %104 = arith.addi %10, %c4_i32_79 : i32
      %c20_i32_80 = arith.constant 20 : i32
      %105 = arith.muli %104, %c20_i32_80 : i32
      %c0_i32_81 = arith.constant 0 : i32
      %106 = arith.addi %105, %c0_i32_81 : i32
      %107 = arith.index_cast %106 : i32 to index
      %c0_82 = arith.constant 0 : index
      %108 = vector.load %arg13[%107, %c0_82] : memref<400x48xf32, #tpu.memory_space<vmem>>, vector<16x48xf32>
      %c1_i32_83 = arith.constant 1 : i32
      %109 = arith.addi %105, %c1_i32_83 : i32
      %110 = arith.index_cast %109 : i32 to index
      %c0_84 = arith.constant 0 : index
      %111 = vector.load %arg13[%110, %c0_84] : memref<400x48xf32, #tpu.memory_space<vmem>>, vector<16x48xf32>
      %c2_i32_85 = arith.constant 2 : i32
      %112 = arith.addi %105, %c2_i32_85 : i32
      %113 = arith.index_cast %112 : i32 to index
      %c0_86 = arith.constant 0 : index
      %114 = vector.load %arg13[%113, %c0_86] : memref<400x48xf32, #tpu.memory_space<vmem>>, vector<16x48xf32>
      %c3_i32_87 = arith.constant 3 : i32
      %115 = arith.addi %105, %c3_i32_87 : i32
      %116 = arith.index_cast %115 : i32 to index
      %c0_88 = arith.constant 0 : index
      %117 = vector.load %arg13[%116, %c0_88] : memref<400x48xf32, #tpu.memory_space<vmem>>, vector<16x48xf32>
      %c4_i32_89 = arith.constant 4 : i32
      %118 = arith.addi %105, %c4_i32_89 : i32
      %119 = arith.index_cast %118 : i32 to index
      %c0_90 = arith.constant 0 : index
      %120 = vector.load %arg13[%119, %c0_90] : memref<400x48xf32, #tpu.memory_space<vmem>>, vector<16x48xf32>
      %121 = tpu.concatenate %108, %111, %114, %117, %120 in 1 : vector<16x48xf32>, vector<16x48xf32>, vector<16x48xf32>, vector<16x48xf32>, vector<16x48xf32> -> vector<16x240xf32>
      %122 = arith.truncf %121 : vector<16x240xf32> to vector<16x240xbf16>
      %c4 = arith.constant 4 : index
      %c0_91 = arith.constant 0 : index
      %c0_92 = arith.constant 0 : index
      %123 = vector.load %arg8[%c4, %c0_91, %c0_92] : memref<5x240x64xbf16, #tpu.memory_space<vmem>>, vector<1x240x64xbf16>
      %124 = vector.shape_cast %123 : vector<1x240x64xbf16> to vector<240x64xbf16>
      %cst_93 = arith.constant dense<0.000000e+00> : vector<16x64xf32>
      %125 = tpu.matmul %122, %124, %cst_93 {dimension_numbers = #tpu.dot_dimension_numbers<[1], [0], [0], [1], [0, 0, 1, 1], [], []>} : vector<16x240xbf16>, vector<240x64xbf16>, vector<16x64xf32> -> vector<16x64xf32>
      %126 = arith.addf %103, %125 : vector<16x64xf32>
      %127 = vector.broadcast %4 : vector<1x64xf32> to vector<16x64xf32>
      %128 = arith.mulf %126, %127 : vector<16x64xf32>
      %129 = vector.broadcast %5 : vector<1x64xf32> to vector<16x64xf32>
      %130 = arith.addf %128, %129 : vector<16x64xf32>
      %cst_94 = arith.constant 0.000000e+00 : f32
      %131 = vector.broadcast %cst_94 : f32 to vector<16x64xf32>
      %132 = arith.cmpf ogt, %130, %131 : vector<16x64xf32>
      %cst_95 = arith.constant 0.00999999977 : f32
      %133 = vector.broadcast %cst_95 : f32 to vector<16x64xf32>
      %134 = arith.mulf %133, %130 : vector<16x64xf32>
      %135 = arith.select %132, %130, %134 : vector<16x64xi1>, vector<16x64xf32>
      %c1_i32_96 = arith.constant 1 : i32
      %136 = arith.addi %10, %c1_i32_96 : i32
      %cst_97 = arith.constant 0.000000e+00 : f32
      %137 = vector.broadcast %cst_97 : f32 to vector<16x64xf32>
      %c0_i32_98 = arith.constant 0 : i32
      %138 = arith.addi %136, %c0_i32_98 : i32
      %c20_i32_99 = arith.constant 20 : i32
      %139 = arith.muli %138, %c20_i32_99 : i32
      %c0_i32_100 = arith.constant 0 : i32
      %140 = arith.addi %139, %c0_i32_100 : i32
      %141 = arith.index_cast %140 : i32 to index
      %c0_101 = arith.constant 0 : index
      %142 = vector.load %arg13[%141, %c0_101] : memref<400x48xf32, #tpu.memory_space<vmem>>, vector<16x48xf32>
      %c1_i32_102 = arith.constant 1 : i32
      %143 = arith.addi %139, %c1_i32_102 : i32
      %144 = arith.index_cast %143 : i32 to index
      %c0_103 = arith.constant 0 : index
      %145 = vector.load %arg13[%144, %c0_103] : memref<400x48xf32, #tpu.memory_space<vmem>>, vector<16x48xf32>
      %c2_i32_104 = arith.constant 2 : i32
      %146 = arith.addi %139, %c2_i32_104 : i32
      %147 = arith.index_cast %146 : i32 to index
      %c0_105 = arith.constant 0 : index
      %148 = vector.load %arg13[%147, %c0_105] : memref<400x48xf32, #tpu.memory_space<vmem>>, vector<16x48xf32>
      %c3_i32_106 = arith.constant 3 : i32
      %149 = arith.addi %139, %c3_i32_106 : i32
      %150 = arith.index_cast %149 : i32 to index
      %c0_107 = arith.constant 0 : index
      %151 = vector.load %arg13[%150, %c0_107] : memref<400x48xf32, #tpu.memory_space<vmem>>, vector<16x48xf32>
      %c4_i32_108 = arith.constant 4 : i32
      %152 = arith.addi %139, %c4_i32_108 : i32
      %153 = arith.index_cast %152 : i32 to index
      %c0_109 = arith.constant 0 : index
      %154 = vector.load %arg13[%153, %c0_109] : memref<400x48xf32, #tpu.memory_space<vmem>>, vector<16x48xf32>
      %155 = tpu.concatenate %142, %145, %148, %151, %154 in 1 : vector<16x48xf32>, vector<16x48xf32>, vector<16x48xf32>, vector<16x48xf32>, vector<16x48xf32> -> vector<16x240xf32>
      %156 = arith.truncf %155 : vector<16x240xf32> to vector<16x240xbf16>
      %c0_110 = arith.constant 0 : index
      %c0_111 = arith.constant 0 : index
      %c0_112 = arith.constant 0 : index
      %157 = vector.load %arg8[%c0_110, %c0_111, %c0_112] : memref<5x240x64xbf16, #tpu.memory_space<vmem>>, vector<1x240x64xbf16>
      %158 = vector.shape_cast %157 : vector<1x240x64xbf16> to vector<240x64xbf16>
      %cst_113 = arith.constant dense<0.000000e+00> : vector<16x64xf32>
      %159 = tpu.matmul %156, %158, %cst_113 {dimension_numbers = #tpu.dot_dimension_numbers<[1], [0], [0], [1], [0, 0, 1, 1], [], []>} : vector<16x240xbf16>, vector<240x64xbf16>, vector<16x64xf32> -> vector<16x64xf32>
      %160 = arith.addf %137, %159 : vector<16x64xf32>
      %c1_i32_114 = arith.constant 1 : i32
      %161 = arith.addi %136, %c1_i32_114 : i32
      %c20_i32_115 = arith.constant 20 : i32
      %162 = arith.muli %161, %c20_i32_115 : i32
      %c0_i32_116 = arith.constant 0 : i32
      %163 = arith.addi %162, %c0_i32_116 : i32
      %164 = arith.index_cast %163 : i32 to index
      %c0_117 = arith.constant 0 : index
      %165 = vector.load %arg13[%164, %c0_117] : memref<400x48xf32, #tpu.memory_space<vmem>>, vector<16x48xf32>
      %c1_i32_118 = arith.constant 1 : i32
      %166 = arith.addi %162, %c1_i32_118 : i32
      %167 = arith.index_cast %166 : i32 to index
      %c0_119 = arith.constant 0 : index
      %168 = vector.load %arg13[%167, %c0_119] : memref<400x48xf32, #tpu.memory_space<vmem>>, vector<16x48xf32>
      %c2_i32_120 = arith.constant 2 : i32
      %169 = arith.addi %162, %c2_i32_120 : i32
      %170 = arith.index_cast %169 : i32 to index
      %c0_121 = arith.constant 0 : index
      %171 = vector.load %arg13[%170, %c0_121] : memref<400x48xf32, #tpu.memory_space<vmem>>, vector<16x48xf32>
      %c3_i32_122 = arith.constant 3 : i32
      %172 = arith.addi %162, %c3_i32_122 : i32
      %173 = arith.index_cast %172 : i32 to index
      %c0_123 = arith.constant 0 : index
      %174 = vector.load %arg13[%173, %c0_123] : memref<400x48xf32, #tpu.memory_space<vmem>>, vector<16x48xf32>
      %c4_i32_124 = arith.constant 4 : i32
      %175 = arith.addi %162, %c4_i32_124 : i32
      %176 = arith.index_cast %175 : i32 to index
      %c0_125 = arith.constant 0 : index
      %177 = vector.load %arg13[%176, %c0_125] : memref<400x48xf32, #tpu.memory_space<vmem>>, vector<16x48xf32>
      %178 = tpu.concatenate %165, %168, %171, %174, %177 in 1 : vector<16x48xf32>, vector<16x48xf32>, vector<16x48xf32>, vector<16x48xf32>, vector<16x48xf32> -> vector<16x240xf32>
      %179 = arith.truncf %178 : vector<16x240xf32> to vector<16x240xbf16>
      %c1_126 = arith.constant 1 : index
      %c0_127 = arith.constant 0 : index
      %c0_128 = arith.constant 0 : index
      %180 = vector.load %arg8[%c1_126, %c0_127, %c0_128] : memref<5x240x64xbf16, #tpu.memory_space<vmem>>, vector<1x240x64xbf16>
      %181 = vector.shape_cast %180 : vector<1x240x64xbf16> to vector<240x64xbf16>
      %cst_129 = arith.constant dense<0.000000e+00> : vector<16x64xf32>
      %182 = tpu.matmul %179, %181, %cst_129 {dimension_numbers = #tpu.dot_dimension_numbers<[1], [0], [0], [1], [0, 0, 1, 1], [], []>} : vector<16x240xbf16>, vector<240x64xbf16>, vector<16x64xf32> -> vector<16x64xf32>
      %183 = arith.addf %160, %182 : vector<16x64xf32>
      %c2_i32_130 = arith.constant 2 : i32
      %184 = arith.addi %136, %c2_i32_130 : i32
      %c20_i32_131 = arith.constant 20 : i32
      %185 = arith.muli %184, %c20_i32_131 : i32
      %c0_i32_132 = arith.constant 0 : i32
      %186 = arith.addi %185, %c0_i32_132 : i32
      %187 = arith.index_cast %186 : i32 to index
      %c0_133 = arith.constant 0 : index
      %188 = vector.load %arg13[%187, %c0_133] : memref<400x48xf32, #tpu.memory_space<vmem>>, vector<16x48xf32>
      %c1_i32_134 = arith.constant 1 : i32
      %189 = arith.addi %185, %c1_i32_134 : i32
      %190 = arith.index_cast %189 : i32 to index
      %c0_135 = arith.constant 0 : index
      %191 = vector.load %arg13[%190, %c0_135] : memref<400x48xf32, #tpu.memory_space<vmem>>, vector<16x48xf32>
      %c2_i32_136 = arith.constant 2 : i32
      %192 = arith.addi %185, %c2_i32_136 : i32
      %193 = arith.index_cast %192 : i32 to index
      %c0_137 = arith.constant 0 : index
      %194 = vector.load %arg13[%193, %c0_137] : memref<400x48xf32, #tpu.memory_space<vmem>>, vector<16x48xf32>
      %c3_i32_138 = arith.constant 3 : i32
      %195 = arith.addi %185, %c3_i32_138 : i32
      %196 = arith.index_cast %195 : i32 to index
      %c0_139 = arith.constant 0 : index
      %197 = vector.load %arg13[%196, %c0_139] : memref<400x48xf32, #tpu.memory_space<vmem>>, vector<16x48xf32>
      %c4_i32_140 = arith.constant 4 : i32
      %198 = arith.addi %185, %c4_i32_140 : i32
      %199 = arith.index_cast %198 : i32 to index
      %c0_141 = arith.constant 0 : index
      %200 = vector.load %arg13[%199, %c0_141] : memref<400x48xf32, #tpu.memory_space<vmem>>, vector<16x48xf32>
      %201 = tpu.concatenate %188, %191, %194, %197, %200 in 1 : vector<16x48xf32>, vector<16x48xf32>, vector<16x48xf32>, vector<16x48xf32>, vector<16x48xf32> -> vector<16x240xf32>
      %202 = arith.truncf %201 : vector<16x240xf32> to vector<16x240xbf16>
      %c2_142 = arith.constant 2 : index
      %c0_143 = arith.constant 0 : index
      %c0_144 = arith.constant 0 : index
      %203 = vector.load %arg8[%c2_142, %c0_143, %c0_144] : memref<5x240x64xbf16, #tpu.memory_space<vmem>>, vector<1x240x64xbf16>
      %204 = vector.shape_cast %203 : vector<1x240x64xbf16> to vector<240x64xbf16>
      %cst_145 = arith.constant dense<0.000000e+00> : vector<16x64xf32>
      %205 = tpu.matmul %202, %204, %cst_145 {dimension_numbers = #tpu.dot_dimension_numbers<[1], [0], [0], [1], [0, 0, 1, 1], [], []>} : vector<16x240xbf16>, vector<240x64xbf16>, vector<16x64xf32> -> vector<16x64xf32>
      %206 = arith.addf %183, %205 : vector<16x64xf32>
      %c3_i32_146 = arith.constant 3 : i32
      %207 = arith.addi %136, %c3_i32_146 : i32
      %c20_i32_147 = arith.constant 20 : i32
      %208 = arith.muli %207, %c20_i32_147 : i32
      %c0_i32_148 = arith.constant 0 : i32
      %209 = arith.addi %208, %c0_i32_148 : i32
      %210 = arith.index_cast %209 : i32 to index
      %c0_149 = arith.constant 0 : index
      %211 = vector.load %arg13[%210, %c0_149] : memref<400x48xf32, #tpu.memory_space<vmem>>, vector<16x48xf32>
      %c1_i32_150 = arith.constant 1 : i32
      %212 = arith.addi %208, %c1_i32_150 : i32
      %213 = arith.index_cast %212 : i32 to index
      %c0_151 = arith.constant 0 : index
      %214 = vector.load %arg13[%213, %c0_151] : memref<400x48xf32, #tpu.memory_space<vmem>>, vector<16x48xf32>
      %c2_i32_152 = arith.constant 2 : i32
      %215 = arith.addi %208, %c2_i32_152 : i32
      %216 = arith.index_cast %215 : i32 to index
      %c0_153 = arith.constant 0 : index
      %217 = vector.load %arg13[%216, %c0_153] : memref<400x48xf32, #tpu.memory_space<vmem>>, vector<16x48xf32>
      %c3_i32_154 = arith.constant 3 : i32
      %218 = arith.addi %208, %c3_i32_154 : i32
      %219 = arith.index_cast %218 : i32 to index
      %c0_155 = arith.constant 0 : index
      %220 = vector.load %arg13[%219, %c0_155] : memref<400x48xf32, #tpu.memory_space<vmem>>, vector<16x48xf32>
      %c4_i32_156 = arith.constant 4 : i32
      %221 = arith.addi %208, %c4_i32_156 : i32
      %222 = arith.index_cast %221 : i32 to index
      %c0_157 = arith.constant 0 : index
      %223 = vector.load %arg13[%222, %c0_157] : memref<400x48xf32, #tpu.memory_space<vmem>>, vector<16x48xf32>
      %224 = tpu.concatenate %211, %214, %217, %220, %223 in 1 : vector<16x48xf32>, vector<16x48xf32>, vector<16x48xf32>, vector<16x48xf32>, vector<16x48xf32> -> vector<16x240xf32>
      %225 = arith.truncf %224 : vector<16x240xf32> to vector<16x240xbf16>
      %c3_158 = arith.constant 3 : index
      %c0_159 = arith.constant 0 : index
      %c0_160 = arith.constant 0 : index
      %226 = vector.load %arg8[%c3_158, %c0_159, %c0_160] : memref<5x240x64xbf16, #tpu.memory_space<vmem>>, vector<1x240x64xbf16>
      %227 = vector.shape_cast %226 : vector<1x240x64xbf16> to vector<240x64xbf16>
      %cst_161 = arith.constant dense<0.000000e+00> : vector<16x64xf32>
      %228 = tpu.matmul %225, %227, %cst_161 {dimension_numbers = #tpu.dot_dimension_numbers<[1], [0], [0], [1], [0, 0, 1, 1], [], []>} : vector<16x240xbf16>, vector<240x64xbf16>, vector<16x64xf32> -> vector<16x64xf32>
      %229 = arith.addf %206, %228 : vector<16x64xf32>
      %c4_i32_162 = arith.constant 4 : i32
      %230 = arith.addi %136, %c4_i32_162 : i32
      %c20_i32_163 = arith.constant 20 : i32
      %231 = arith.muli %230, %c20_i32_163 : i32
      %c0_i32_164 = arith.constant 0 : i32
      %232 = arith.addi %231, %c0_i32_164 : i32
      %233 = arith.index_cast %232 : i32 to index
      %c0_165 = arith.constant 0 : index
      %234 = vector.load %arg13[%233, %c0_165] : memref<400x48xf32, #tpu.memory_space<vmem>>, vector<16x48xf32>
      %c1_i32_166 = arith.constant 1 : i32
      %235 = arith.addi %231, %c1_i32_166 : i32
      %236 = arith.index_cast %235 : i32 to index
      %c0_167 = arith.constant 0 : index
      %237 = vector.load %arg13[%236, %c0_167] : memref<400x48xf32, #tpu.memory_space<vmem>>, vector<16x48xf32>
      %c2_i32_168 = arith.constant 2 : i32
      %238 = arith.addi %231, %c2_i32_168 : i32
      %239 = arith.index_cast %238 : i32 to index
      %c0_169 = arith.constant 0 : index
      %240 = vector.load %arg13[%239, %c0_169] : memref<400x48xf32, #tpu.memory_space<vmem>>, vector<16x48xf32>
      %c3_i32_170 = arith.constant 3 : i32
      %241 = arith.addi %231, %c3_i32_170 : i32
      %242 = arith.index_cast %241 : i32 to index
      %c0_171 = arith.constant 0 : index
      %243 = vector.load %arg13[%242, %c0_171] : memref<400x48xf32, #tpu.memory_space<vmem>>, vector<16x48xf32>
      %c4_i32_172 = arith.constant 4 : i32
      %244 = arith.addi %231, %c4_i32_172 : i32
      %245 = arith.index_cast %244 : i32 to index
      %c0_173 = arith.constant 0 : index
      %246 = vector.load %arg13[%245, %c0_173] : memref<400x48xf32, #tpu.memory_space<vmem>>, vector<16x48xf32>
      %247 = tpu.concatenate %234, %237, %240, %243, %246 in 1 : vector<16x48xf32>, vector<16x48xf32>, vector<16x48xf32>, vector<16x48xf32>, vector<16x48xf32> -> vector<16x240xf32>
      %248 = arith.truncf %247 : vector<16x240xf32> to vector<16x240xbf16>
      %c4_174 = arith.constant 4 : index
      %c0_175 = arith.constant 0 : index
      %c0_176 = arith.constant 0 : index
      %249 = vector.load %arg8[%c4_174, %c0_175, %c0_176] : memref<5x240x64xbf16, #tpu.memory_space<vmem>>, vector<1x240x64xbf16>
      %250 = vector.shape_cast %249 : vector<1x240x64xbf16> to vector<240x64xbf16>
      %cst_177 = arith.constant dense<0.000000e+00> : vector<16x64xf32>
      %251 = tpu.matmul %248, %250, %cst_177 {dimension_numbers = #tpu.dot_dimension_numbers<[1], [0], [0], [1], [0, 0, 1, 1], [], []>} : vector<16x240xbf16>, vector<240x64xbf16>, vector<16x64xf32> -> vector<16x64xf32>
      %252 = arith.addf %229, %251 : vector<16x64xf32>
      %253 = vector.broadcast %4 : vector<1x64xf32> to vector<16x64xf32>
      %254 = arith.mulf %252, %253 : vector<16x64xf32>
      %255 = vector.broadcast %5 : vector<1x64xf32> to vector<16x64xf32>
      %256 = arith.addf %254, %255 : vector<16x64xf32>
      %cst_178 = arith.constant 0.000000e+00 : f32
      %257 = vector.broadcast %cst_178 : f32 to vector<16x64xf32>
      %258 = arith.cmpf ogt, %256, %257 : vector<16x64xf32>
      %cst_179 = arith.constant 0.00999999977 : f32
      %259 = vector.broadcast %cst_179 : f32 to vector<16x64xf32>
      %260 = arith.mulf %259, %256 : vector<16x64xf32>
      %261 = arith.select %258, %256, %260 : vector<16x64xi1>, vector<16x64xf32>
      %262 = arith.maximumf %135, %261 : vector<16x64xf32>
      %c0_180 = arith.constant 0 : index
      %c0_181 = arith.constant 0 : index
      %263 = vector.load %arg16[%c0_180, %c0_181] : memref<16x64xf32, #tpu.memory_space<vmem>>, vector<16x64xf32>
      tpu.vector_store %arg16[%c0_180, %c0_181], %262 {strides = array<i32>} : memref<16x64xf32, #tpu.memory_space<vmem>>, vector<16x64xf32>,
      %c0_182 = arith.constant 0 : index
      %c0_183 = arith.constant 0 : index
      %264 = tpu.strided_load %arg16[%c0_182, %c0_183] {strides = array<i32: 2, 1>} : memref<16x64xf32, #tpu.memory_space<vmem>>, vector<8x64xf32>
      %c1_184 = arith.constant 1 : index
      %c0_185 = arith.constant 0 : index
      %265 = tpu.strided_load %arg16[%c1_184, %c0_185] {strides = array<i32: 2, 1>} : memref<16x64xf32, #tpu.memory_space<vmem>>, vector<8x64xf32>
      %266 = arith.maximumf %264, %265 : vector<8x64xf32>
      %c8_i32_186 = arith.constant 8 : i32
      %267 = arith.muli %arg17, %c8_i32_186 : i32
      %c0_187 = arith.constant 0 : index
      %268 = arith.index_cast %267 : i32 to index
      %c0_188 = arith.constant 0 : index
      %269 = vector.load %arg11[%c0_187, %268, %c0_188] : memref<1x64x64xf32, #tpu.memory_space<vmem>>, vector<1x8x64xf32>
      %270 = vector.shape_cast %269 : vector<1x8x64xf32> to vector<8x64xf32>
      %271 = vector.shape_cast %266 : vector<8x64xf32> to vector<1x8x64xf32>
      tpu.vector_store %arg11[%c0_187, %268, %c0_188], %271 {strides = array<i32>} : memref<1x64x64xf32, #tpu.memory_space<vmem>>, vector<1x8x64xf32>,
    }
    %c8_i32_19 = arith.constant 8 : i32
    return
  }
  func.func @transform_0(%arg0: i32) -> (i32, i32, i32) {
    %c0_i32 = arith.constant 0 : i32
    %c0_i32_0 = arith.constant 0 : i32
    %c0_i32_1 = arith.constant 0 : i32
    return %arg0, %c0_i32, %c0_i32_0 : i32, i32, i32
  }
  func.func @transform_1(%arg0: i32) -> (i32, i32) {
    %c0_i32 = arith.constant 0 : i32
    %c0_i32_0 = arith.constant 0 : i32
    %c0_i32_1 = arith.constant 0 : i32
    return %c0_i32, %c0_i32_0 : i32, i32
  }
  func.func @transform_2(%arg0: i32) -> (i32, i32) {
    %c0_i32 = arith.constant 0 : i32
    %c0_i32_0 = arith.constant 0 : i32
    %c0_i32_1 = arith.constant 0 : i32
    return %c0_i32, %c0_i32_0 : i32, i32
  }
  func.func @transform_3(%arg0: i32) -> (i32, i32) {
    %c0_i32 = arith.constant 0 : i32
    %c0_i32_0 = arith.constant 0 : i32
    %c0_i32_1 = arith.constant 0 : i32
    return %c0_i32, %c0_i32_0 : i32, i32
  }
  func.func @transform_4(%arg0: i32) -> (i32, i32, i32) {
    %c0_i32 = arith.constant 0 : i32
    %c0_i32_0 = arith.constant 0 : i32
    %c0_i32_1 = arith.constant 0 : i32
    %c0_i32_2 = arith.constant 0 : i32
    return %c0_i32, %c0_i32_0, %c0_i32_1 : i32, i32, i32
  }
  func.func @transform_5(%arg0: i32) -> (i32, i32) {
    %c0_i32 = arith.constant 0 : i32
    %c0_i32_0 = arith.constant 0 : i32
    %c0_i32_1 = arith.constant 0 : i32
    return %c0_i32, %c0_i32_0 : i32, i32
  }
  func.func @transform_6(%arg0: i32) -> (i32, i32) {
    %c0_i32 = arith.constant 0 : i32
    %c0_i32_0 = arith.constant 0 : i32
    %c0_i32_1 = arith.constant 0 : i32
    return %c0_i32, %c0_i32_0 : i32, i32
  }
  func.func @transform_7(%arg0: i32) -> (i32, i32, i32) {
    %c0_i32 = arith.constant 0 : i32
    %c0_i32_0 = arith.constant 0 : i32
    %c0_i32_1 = arith.constant 0 : i32
    %c0_i32_2 = arith.constant 0 : i32
    return %c0_i32, %c0_i32_0, %c0_i32_1 : i32, i32, i32
  }
  func.func @transform_8(%arg0: i32) -> (i32, i32) {
    %c0_i32 = arith.constant 0 : i32
    %c0_i32_0 = arith.constant 0 : i32
    %c0_i32_1 = arith.constant 0 : i32
    return %c0_i32, %c0_i32_0 : i32, i32
  }
  func.func @transform_9(%arg0: i32) -> (i32, i32) {
    %c0_i32 = arith.constant 0 : i32
    %c0_i32_0 = arith.constant 0 : i32
    %c0_i32_1 = arith.constant 0 : i32
    return %c0_i32, %c0_i32_0 : i32, i32
  }
  func.func @transform_10(%arg0: i32) -> (i32, i32, i32) {
    %c0_i32 = arith.constant 0 : i32
    %c0_i32_0 = arith.constant 0 : i32
    %c0_i32_1 = arith.constant 0 : i32
    return %arg0, %c0_i32, %c0_i32_0 : i32, i32, i32
  }
}

module attributes {stable_mosaic.version = 11 : i64} {
  func.func @_fc_kernel(%arg0: i32, %arg1: memref<2x1024xf32, #tpu.memory_space<vmem>>, %arg2: memref<1024x256xbf16, #tpu.memory_space<vmem>>, %arg3: memref<1x256xf32, #tpu.memory_space<vmem>>, %arg4: memref<256x52xbf16, #tpu.memory_space<vmem>>, %arg5: memref<1x52xf32, #tpu.memory_space<vmem>>, %arg6: memref<2x52xf32, #tpu.memory_space<vmem>>, %arg7: memref<2x256xf32, #tpu.memory_space<vmem>>) attributes {dimension_semantics = [#tpu.dimension_semantics<arbitrary>], iteration_bounds = array<i64: 4>, scalar_prefetch = 0 : i64, scratch_operands = 1 : i64, tpu.core_type = #tpu.core_type<tc>, window_params = [{transform_indices = @transform_0, window_bounds = array<i64: 2, 1024>}, {transform_indices = @transform_1, window_bounds = array<i64: 1024, 256>}, {pipeline_mode = #tpu.pipeline_mode<synchronous>, transform_indices = @transform_2, window_bounds = array<i64: 1, 256>}, {pipeline_mode = #tpu.pipeline_mode<synchronous>, transform_indices = @transform_3, window_bounds = array<i64: 256, 52>}, {pipeline_mode = #tpu.pipeline_mode<synchronous>, transform_indices = @transform_4, window_bounds = array<i64: 1, 52>}, {pipeline_mode = #tpu.pipeline_mode<synchronous>, transform_indices = @transform_5, window_bounds = array<i64: 2, 52>}]} {
    %c0_i32 = arith.constant 0 : i32
    %0 = arith.cmpi eq, %arg0, %c0_i32 : i32
    %1 = arith.extui %0 : i1 to i32
    %c0_i32_0 = arith.constant 0 : i32
    %2 = arith.cmpi ne, %1, %c0_i32_0 : i32
    scf.if %2 {
      %cst_9 = arith.constant 0.000000e+00 : f32
      %13 = vector.broadcast %cst_9 : f32 to vector<2x256xf32>
      %c0_10 = arith.constant 0 : index
      %c0_11 = arith.constant 0 : index
      %14 = vector.load %arg7[%c0_10, %c0_11] : memref<2x256xf32, #tpu.memory_space<vmem>>, vector<2x256xf32>
      tpu.vector_store %arg7[%c0_10, %c0_11], %13 {strides = array<i32>} : memref<2x256xf32, #tpu.memory_space<vmem>>, vector<2x256xf32>,
    } else {
    }
    %c0 = arith.constant 0 : index
    %c0_1 = arith.constant 0 : index
    %3 = vector.load %arg7[%c0, %c0_1] : memref<2x256xf32, #tpu.memory_space<vmem>>, vector<2x256xf32>
    %c0_2 = arith.constant 0 : index
    %c0_3 = arith.constant 0 : index
    %4 = vector.load %arg1[%c0_2, %c0_3] : memref<2x1024xf32, #tpu.memory_space<vmem>>, vector<2x1024xf32>
    %5 = arith.truncf %4 : vector<2x1024xf32> to vector<2x1024xbf16>
    %c0_4 = arith.constant 0 : index
    %c0_5 = arith.constant 0 : index
    %6 = vector.load %arg2[%c0_4, %c0_5] : memref<1024x256xbf16, #tpu.memory_space<vmem>>, vector<1024x256xbf16>
    %cst = arith.constant dense<0.000000e+00> : vector<2x256xf32>
    %7 = tpu.matmul %5, %6, %cst {dimension_numbers = #tpu.dot_dimension_numbers<[1], [0], [0], [1], [0, 0, 1, 1], [], []>} : vector<2x1024xbf16>, vector<1024x256xbf16>, vector<2x256xf32> -> vector<2x256xf32>
    %8 = arith.addf %3, %7 : vector<2x256xf32>
    %c0_6 = arith.constant 0 : index
    %c0_7 = arith.constant 0 : index
    %9 = vector.load %arg7[%c0_6, %c0_7] : memref<2x256xf32, #tpu.memory_space<vmem>>, vector<2x256xf32>
    tpu.vector_store %arg7[%c0_6, %c0_7], %8 {strides = array<i32>} : memref<2x256xf32, #tpu.memory_space<vmem>>, vector<2x256xf32>,
    %c3_i32 = arith.constant 3 : i32
    %10 = arith.cmpi eq, %arg0, %c3_i32 : i32
    %11 = arith.extui %10 : i1 to i32
    %c0_i32_8 = arith.constant 0 : i32
    %12 = arith.cmpi ne, %11, %c0_i32_8 : i32
    scf.if %12 {
      %c0_9 = arith.constant 0 : index
      %c0_10 = arith.constant 0 : index
      %13 = vector.load %arg7[%c0_9, %c0_10] : memref<2x256xf32, #tpu.memory_space<vmem>>, vector<2x256xf32>
      %c0_11 = arith.constant 0 : index
      %c0_12 = arith.constant 0 : index
      %14 = vector.load %arg3[%c0_11, %c0_12] : memref<1x256xf32, #tpu.memory_space<vmem>>, vector<1x256xf32>
      %15 = vector.broadcast %14 : vector<1x256xf32> to vector<2x256xf32>
      %16 = arith.addf %13, %15 : vector<2x256xf32>
      %cst_13 = arith.constant 0.000000e+00 : f32
      %17 = vector.broadcast %cst_13 : f32 to vector<2x256xf32>
      %18 = arith.maximumf %16, %17 : vector<2x256xf32>
      %19 = arith.truncf %18 : vector<2x256xf32> to vector<2x256xbf16>
      %c0_14 = arith.constant 0 : index
      %c0_15 = arith.constant 0 : index
      %20 = vector.load %arg4[%c0_14, %c0_15] : memref<256x52xbf16, #tpu.memory_space<vmem>>, vector<256x52xbf16>
      %cst_16 = arith.constant dense<0.000000e+00> : vector<2x52xf32>
      %21 = tpu.matmul %19, %20, %cst_16 {dimension_numbers = #tpu.dot_dimension_numbers<[1], [0], [0], [1], [0, 0, 1, 1], [], []>} : vector<2x256xbf16>, vector<256x52xbf16>, vector<2x52xf32> -> vector<2x52xf32>
      %c0_17 = arith.constant 0 : index
      %c0_18 = arith.constant 0 : index
      %22 = vector.load %arg5[%c0_17, %c0_18] : memref<1x52xf32, #tpu.memory_space<vmem>>, vector<1x52xf32>
      %23 = vector.broadcast %22 : vector<1x52xf32> to vector<2x52xf32>
      %24 = arith.addf %21, %23 : vector<2x52xf32>
      %c0_19 = arith.constant 0 : index
      %c0_20 = arith.constant 0 : index
      %25 = vector.load %arg6[%c0_19, %c0_20] : memref<2x52xf32, #tpu.memory_space<vmem>>, vector<2x52xf32>
      tpu.vector_store %arg6[%c0_19, %c0_20], %24 {strides = array<i32>} : memref<2x52xf32, #tpu.memory_space<vmem>>, vector<2x52xf32>,
    } else {
    }
    return
  }
  func.func @transform_0(%arg0: i32) -> (i32, i32) {
    %c0_i32 = arith.constant 0 : i32
    %c0_i32_0 = arith.constant 0 : i32
    return %c0_i32, %arg0 : i32, i32
  }
  func.func @transform_1(%arg0: i32) -> (i32, i32) {
    %c0_i32 = arith.constant 0 : i32
    %c0_i32_0 = arith.constant 0 : i32
    return %arg0, %c0_i32 : i32, i32
  }
  func.func @transform_2(%arg0: i32) -> (i32, i32) {
    %c0_i32 = arith.constant 0 : i32
    %c0_i32_0 = arith.constant 0 : i32
    %c0_i32_1 = arith.constant 0 : i32
    return %c0_i32, %c0_i32_0 : i32, i32
  }
  func.func @transform_3(%arg0: i32) -> (i32, i32) {
    %c0_i32 = arith.constant 0 : i32
    %c0_i32_0 = arith.constant 0 : i32
    %c0_i32_1 = arith.constant 0 : i32
    return %c0_i32, %c0_i32_0 : i32, i32
  }
  func.func @transform_4(%arg0: i32) -> (i32, i32) {
    %c0_i32 = arith.constant 0 : i32
    %c0_i32_0 = arith.constant 0 : i32
    %c0_i32_1 = arith.constant 0 : i32
    return %c0_i32, %c0_i32_0 : i32, i32
  }
  func.func @transform_5(%arg0: i32) -> (i32, i32) {
    %c0_i32 = arith.constant 0 : i32
    %c0_i32_0 = arith.constant 0 : i32
    %c0_i32_1 = arith.constant 0 : i32
    return %c0_i32, %c0_i32_0 : i32, i32
  }
}

</mosaic_0001>

<bundles_post_ra>
// kernel: convnet_90_forward.3
= control target key start
LH: loop header
LB: loop body
LE: loop exit
PB: predicated region body
PF: predicated region fallthrough
CT: control target
= control target key end

     0   :  { %10 = vsyncpa [#allocation4], 0  ;;  %s2009_s18 = smov 0   ;;  %s2275_s0 = inlined_call_operand.vmem [shape: f32[2,4096], index: 0, kind: input, shape index: {}]   ;;  %s2276_s1 = inlined_call_operand.vmem [shape: bf16[4096,256], index: 1, kind: input, shape index: {}]   ;;  %s2277_s2 = inlined_call_operand.vmem [shape: f32[1,256], index: 2, kind: input, shape index: {}]   ;;  %s2278_s3 = inlined_call_operand.vmem [shape: bf16[256,52], index: 3, kind: input, shape index: {}]   ;;  %s2279_s4 = inlined_call_operand.vmem [shape: f32[1,52], index: 4, kind: input, shape index: {}]   ;;  %s2280_s5 = inlined_call_operand.hbm [shape: f32[2,52], index: 5, kind: output, shape index: {}]  }
   0x1 LB: > { %s2015_s19 = sadd.s32 4294967295, %s1974_s18   ;;  %p1521_p0 = scmp.ge.s32.totalorder %s1974_s18, 1  ;;  %s1974_s18 = sphi %s2009_s18, %s16_s18  }
   0x2   : > { %p196_p1 = scmp.lt.s32.totalorder %s1974_s18, 5 }
   0x4   : > { %p197_p2 = pnand %p1521_p0, %p196_p1 }
   0x5   : > { %s1522_s20 = sshll.u32 (!%p197_p2), %s2015_s19, 3  ;;  %s1524_s21 = sshll.u32 (!%p197_p2), %s2015_s19, 7 }
   0x6   : > { %200 = sbr.rel (%p197_p2) target bundleno = 636 (0x27c), region = 40  ;;  %p226_p3 = scmp.lt.s32.totalorder (!%p197_p2), %s1522_s20, 31 }
   0x7   : > { %p232_p4 = scmp.lt.s32.totalorder (!%p197_p2), %s1524_s21, 511  ;;  %p1527_p5 = scmp.ne.s32.totalorder (!%p197_p2), %s2015_s19, 0 }
   0xd   : > { %s2282_s20 = smov (!%p226_p3, %s1522_s20), 31  ;;  %s2284_s21 = smov (!%p232_p4, %s1524_s21), 511 }
   0xe   : > { %s1523_s22 = sshll.u32 %s2282_s20, 1  ;;  %s1678_s26 = sshll.u32 %s2284_s21, 3  ;;  %v1976_v0 = vmov (!%p1527_p5), 0.0  }
   0xf   : > { %s2024_s25 = scalar_lea.vmem %s2275_s0, %s1523_s22  ;;  %s2029_s29 = scalar_lea.vmem %s2276_s1, %s1678_s26  ;;  %243 = vst [vmem:[#allocation2] sm:$0xf] (!%p1527_p5), %v1976_v0 }
  0x10   : > { %242 = sbr.rel (%p1527_p5) target bundleno = 23 (0x17), region = 44 }
  0x17 PF: > { %v1728_v1 = vld [vmem:[%s2029_s29 + $0x4] ss:$8 sps:$4 sm:$0xff]   ;;  %v1732_v3 = vld [vmem:[%s2029_s29] ss:$8 sps:$4 sm:$0xff]   ;;  %v1734_v5 = vld [vmem:[%s2029_s29 + $0x14] ss:$8 sps:$4 sm:$0xff]   ;;  %v253_v39 = vlaneseq }
  0x18   : > { %v1730_v2 = vld [vmem:[%s2029_s29 + $0x204] ss:$8 sps:$4 sm:$0xff]   ;;  %1067 = vmatprep.subr.bf16.mxu1 %v1728_v1  ;;  %v1733_v4 = vld [vmem:[%s2029_s29 + $0x200] ss:$8 sps:$4 sm:$0xff]   ;;  %v1736_v6 = vld [vmem:[%s2029_s29 + $0x214] ss:$8 sps:$4 sm:$0xff]  }
  0x19   : > { %1149 = vmatprep.subr.bf16.mxu0 %v1730_v2  ;;  %1068 = vmatpush1.bf16.msra.mxu1 %v1732_v3  ;;  %v1738_v7 = vld [vmem:[%s2029_s29 + $0x10] ss:$8 sps:$4 sm:$0xff]   ;;  %v1740_v9 = vld [vmem:[%s2029_s29 + $0x24] ss:$8 sps:$4 sm:$0xff]   ;;  %v1744_v11 = vld [vmem:[%s2029_s29 + $0x20] ss:$8 sps:$4 sm:$0xff]  }
  0x1a   : > { %1150 = vmatpush1.bf16.msra.mxu0 %v1733_v4  ;;  %1069 = vmatprep.subr.bf16.mxu1 %v1734_v5  ;;  %v1739_v8 = vld [vmem:[%s2029_s29 + $0x210] ss:$8 sps:$4 sm:$0xff]   ;;  %v1742_v10 = vld [vmem:[%s2029_s29 + $0x224] ss:$8 sps:$4 sm:$0xff]   ;;  %v1745_v12 = vld [vmem:[%s2029_s29 + $0x220] ss:$8 sps:$4 sm:$0xff]  }
  0x1b   : > { %1151 = vmatprep.subr.bf16.mxu0 %v1736_v6  ;;  %v1746_v13 = vld [vmem:[%s2029_s29 + $0x34] ss:$8 sps:$4 sm:$0xff]   ;;  %v1750_v15 = vld [vmem:[%s2029_s29 + $0x30] ss:$8 sps:$4 sm:$0xff]   ;;  %v1752_v17 = vld [vmem:[%s2029_s29 + $0x44] ss:$8 sps:$4 sm:$0xff]  }
  0x1c   : > { %v1748_v14 = vld [vmem:[%s2029_s29 + $0x234] ss:$8 sps:$4 sm:$0xff]   ;;  %v1751_v16 = vld [vmem:[%s2029_s29 + $0x230] ss:$8 sps:$4 sm:$0xff]   ;;  %v1754_v18 = vld [vmem:[%s2029_s29 + $0x244] ss:$8 sps:$4 sm:$0xff]  }
  0x1d   : > { %1070 = vmatpush1.bf16.msra.mxu1 %v1738_v7  ;;  %v1756_v19 = vld [vmem:[%s2029_s29 + $0x40] ss:$8 sps:$4 sm:$0xff]   ;;  %v1758_v21 = vld [vmem:[%s2029_s29 + $0x54] ss:$8 sps:$4 sm:$0xff]   ;;  %v1762_v23 = vld [vmem:[%s2029_s29 + $0x50] ss:$8 sps:$4 sm:$0xff]  }
  0x1e   : > { %1152 = vmatpush1.bf16.msra.mxu0 %v1739_v8  ;;  %1071 = vmatprep.subr.bf16.mxu1 %v1740_v9  ;;  %v1757_v20 = vld [vmem:[%s2029_s29 + $0x240] ss:$8 sps:$4 sm:$0xff]   ;;  %v1760_v22 = vld [vmem:[%s2029_s29 + $0x254] ss:$8 sps:$4 sm:$0xff]   ;;  %v1763_v24 = vld [vmem:[%s2029_s29 + $0x250] ss:$8 sps:$4 sm:$0xff]  }
  0x1f   : > { %1153 = vmatprep.subr.bf16.mxu0 %v1742_v10  ;;  %v1764_v25 = vld [vmem:[%s2029_s29 + $0x64] ss:$8 sps:$4 sm:$0xff]   ;;  %v1768_v27 = vld [vmem:[%s2029_s29 + $0x60] ss:$8 sps:$4 sm:$0xff]   ;;  %v1770_v29 = vld [vmem:[%s2029_s29 + $0x74] ss:$8 sps:$4 sm:$0xff]  }
  0x20   : > { %v1766_v26 = vld [vmem:[%s2029_s29 + $0x264] ss:$8 sps:$4 sm:$0xff]   ;;  %v1769_v28 = vld [vmem:[%s2029_s29 + $0x260] ss:$8 sps:$4 sm:$0xff]   ;;  %v1772_v30 = vld [vmem:[%s2029_s29 + $0x274] ss:$8 sps:$4 sm:$0xff]  }
  0x21   : > { %1072 = vmatpush1.bf16.msra.mxu1 %v1744_v11  ;;  %v1774_v31 = vld [vmem:[%s2029_s29 + $0x70] ss:$8 sps:$4 sm:$0xff]   ;;  %v1776_v33 = vld [vmem:[%s2029_s29 + $0x84] ss:$8 sps:$4 sm:$0xff]   ;;  %v1780_v35 = vld [vmem:[%s2029_s29 + $0x80] ss:$8 sps:$4 sm:$0xff]  }
  0x22   : > { %1154 = vmatpush1.bf16.msra.mxu0 %v1745_v12  ;;  %1073 = vmatprep.subr.bf16.mxu1 %v1746_v13  ;;  %v1775_v32 = vld [vmem:[%s2029_s29 + $0x270] ss:$8 sps:$4 sm:$0xff]   ;;  %v1778_v34 = vld [vmem:[%s2029_s29 + $0x284] ss:$8 sps:$4 sm:$0xff]   ;;  %v1781_v36 = vld [vmem:[%s2029_s29 + $0x280] ss:$8 sps:$4 sm:$0xff]  }
  0x23   : > { %1155 = vmatprep.subr.bf16.mxu0 %v1748_v14  ;;  %v1977_v37 = vmov 1983009808   ;;  %v1782_v40 = vld [vmem:[%s2029_s29 + $0x94] ss:$8 sps:$4 sm:$0xff]   ;;  %v1786_v42 = vld [vmem:[%s2029_s29 + $0x90] ss:$8 sps:$4 sm:$0xff]  }
  0x24   : > { %v251_v38 = vunpack.c.l.s4 %v1977_v37  ;;  %v1784_v41 = vld [vmem:[%s2029_s29 + $0x294] ss:$8 sps:$4 sm:$0xff]   ;;  %v2071_v44 = vshrl.u32 %v253_v39, 7  ;;  %v1787_v45 = vld [vmem:[%s2029_s29 + $0x290] ss:$8 sps:$4 sm:$0xff]   ;;  %v245_v53 = vld [vmem:[%s2024_s25] sm:$0xff] }
  0x25   : > { %1074 = vmatpush1.bf16.msra.mxu1 %v1750_v15  ;;  %v1788_v46 = vld [vmem:[%s2029_s29 + $0xa4] ss:$8 sps:$4 sm:$0xff]   ;;  %v1792_v48 = vld [vmem:[%s2029_s29 + $0xa0] ss:$8 sps:$4 sm:$0xff]   ;;  %v1794_v51 = vld [vmem:[%s2029_s29 + $0xb4] ss:$8 sps:$4 sm:$0xff]   ;;  %v249_v9 = vcombine.high %v245_v53, %v245_v53 }
  0x26   : > { %1156 = vmatpush1.bf16.msra.mxu0 %v1751_v16  ;;  %1075 = vmatprep.subr.bf16.mxu1 %v1752_v17  ;;  %v252_v43 = vunpack.c.0.s8 %v251_v38  ;;  %v1790_v47 = vld [vmem:[%s2029_s29 + $0x2a4] ss:$8 sps:$4 sm:$0xff]   ;;  %v1793_v49 = vld [vmem:[%s2029_s29 + $0x2a0] ss:$8 sps:$4 sm:$0xff]   ;;  %v1796_v52 = vld [vmem:[%s2029_s29 + $0x2b4] ss:$8 sps:$4 sm:$0xff]  }
  0x27   : > { %1157 = vmatprep.subr.bf16.mxu0 %v1754_v18  ;;  %v1798_v54 = vld [vmem:[%s2029_s29 + $0xb0] ss:$8 sps:$4 sm:$0xff]   ;;  %v246_v57 = vld [vmem:[%s2024_s25 + $0x8] sm:$0xff]  ;;  %v1806_v2 = vld [vmem:[%s2029_s29 + $0xd4] ss:$8 sps:$4 sm:$0xff]   ;;  %p1656_p6 = scmp.ne.s32.totalorder %s2015_s19, 3 }
  0x28   : > { %v2079_v50 = vsub.s32 %v252_v43, %v2071_v44  ;;  %v1799_v56 = vld [vmem:[%s2029_s29 + $0x2b0] ss:$8 sps:$4 sm:$0xff]   ;;  %v1800_v58 = vld [vmem:[%s2029_s29 + $0xc4] ss:$8 sps:$4 sm:$0xff]   ;;  %v1804_v0 = vld [vmem:[%s2029_s29 + $0xc0] ss:$8 sps:$4 sm:$0xff]   ;;  %v266_v10 = vcombine.high %v246_v57, %v246_v57 }
  0x29   : > { %1076 = vmatpush1.bf16.msra.mxu1 %v1756_v19  ;;  %v1802_v59 = vld [vmem:[%s2029_s29 + $0x2c4] ss:$8 sps:$4 sm:$0xff]   ;;  %v1805_v1 = vld [vmem:[%s2029_s29 + $0x2c0] ss:$8 sps:$4 sm:$0xff]   ;;  %v1808_v3 = vld [vmem:[%s2029_s29 + $0x2d4] ss:$8 sps:$4 sm:$0xff]  }
  0x2a   : > { %1158 = vmatpush1.bf16.msra.mxu0 %v1757_v20  ;;  %1077 = vmatprep.subr.bf16.mxu1 %v1758_v21  ;;  %v2086_v55 = vrot.slane %v245_v53, %v2079_v50  ;;  %v273_v61 = vrot.slane %v246_v57, %v2079_v50  ;;  %v1810_v5 = vld [vmem:[%s2029_s29 + $0xd0] ss:$8 sps:$4 sm:$0xff]   ;;  %v1812_v7 = vld [vmem:[%s2029_s29 + $0xe4] ss:$8 sps:$4 sm:$0xff]   ;;  %v1816_v11 = vld [vmem:[%s2029_s29 + $0xe0] ss:$8 sps:$4 sm:$0xff]   ;;  %v2108_v15 = vrot.slane %v249_v9, %v2079_v50 }
  0x2b   : > { %1159 = vmatprep.subr.bf16.mxu0 %v1760_v22  ;;  %v1811_v6 = vld [vmem:[%s2029_s29 + $0x2d0] ss:$8 sps:$4 sm:$0xff]   ;;  %v1814_v8 = vld [vmem:[%s2029_s29 + $0x2e4] ss:$8 sps:$4 sm:$0xff]   ;;  %v1817_v12 = vld [vmem:[%s2029_s29 + $0x2e0] ss:$8 sps:$4 sm:$0xff]   ;;  %v2111_v16 = vrot.slane %v266_v10, %v2079_v50 }
  0x2c   : > { %v264_v60 = vcombine.high %v2086_v55, %v2086_v55  ;;  %v281_v63 = vcombine.high %v273_v61, %v273_v61  ;;  %v1818_v13 = vld [vmem:[%s2029_s29 + $0xf4] ss:$8 sps:$4 sm:$0xff]   ;;  %v1822_v17 = vld [vmem:[%s2029_s29 + $0xf0] ss:$8 sps:$4 sm:$0xff]   ;;  %v1827_v19 = vld [vmem:[%s2029_s29 + $0x104] ss:$8 sps:$4 sm:$0xff]   ;;  %v265_v21 = vcombine.high %v2108_v15, %v2108_v15 }
  0x2d   : > { %1078 = vmatpush1.bf16.msra.mxu1 %v1762_v23  ;;  %v1820_v14 = vld [vmem:[%s2029_s29 + $0x2f4] ss:$8 sps:$4 sm:$0xff]   ;;  %v1823_v18 = vld [vmem:[%s2029_s29 + $0x2f0] ss:$8 sps:$4 sm:$0xff]   ;;  %v1831_v20 = vld [vmem:[%s2029_s29 + $0x304] ss:$8 sps:$4 sm:$0xff]   ;;  %v282_v22 = vcombine.high %v2111_v16, %v2111_v16  ;;  %v291_v23 = vpack.c.bf16 %v2086_v55, %v2086_v55 }
  0x2e   : > { %1160 = vmatpush1.bf16.msra.mxu0 %v1763_v24  ;;  %1079 = vmatprep.subr.bf16.mxu1 %v1764_v25  ;;  %v292_v62 = vpack.c.bf16 %v264_v60, %v264_v60  ;;  %v296_v4 = vpack.c.bf16 %v281_v63, %v281_v63  ;;  %v295_v24 = vpack.c.bf16 %v273_v61, %v273_v61  ;;  %v1825_v25 = vld [vmem:[%s2029_s29 + $0x100] ss:$8 sps:$4 sm:$0xff]   ;;  %v1846_v37 = vld [vmem:[%s2029_s29 + $0x134] ss:$8 sps:$4 sm:$0xff]   ;;  %v1844_v39 = vld [vmem:[%s2029_s29 + $0x130] ss:$8 sps:$4 sm:$0xff]  }
  0x2f   : > { %1161 = vmatprep.subr.bf16.mxu0 %v1766_v26  ;;  %v1829_v26 = vld [vmem:[%s2029_s29 + $0x300] ss:$8 sps:$4 sm:$0xff]   ;;  %v1849_v38 = vld [vmem:[%s2029_s29 + $0x334] ss:$8 sps:$4 sm:$0xff]   ;;  %v1868_v57 = vld [vmem:[%s2029_s29 + $0x170] ss:$8 sps:$4 sm:$0xff]  }
  0x30   : > { %1099 = vmatprep.mubr.bf16.mxu1 %v292_v62  ;;  %1181 = vmatprep.mubr.bf16.mxu0 %v296_v4  ;;  %v1850_v43 = vld [vmem:[%s2029_s29 + $0x140] ss:$8 sps:$4 sm:$0xff]   ;;  %v1870_v55 = vld [vmem:[%s2029_s29 + $0x174] ss:$8 sps:$4 sm:$0xff]   ;;  %v1879_v60 = vld [vmem:[%s2029_s29 + $0x384] ss:$8 sps:$4 sm:$0xff]  }
  0x31   : > { %1080 = vmatpush1.bf16.msra.mxu1 %v1768_v27  ;;  %v1834_v27 = vld [vmem:[%s2029_s29 + $0x114] ss:$8 sps:$4 sm:$0xff]   ;;  %v1862_v53 = vld [vmem:[%s2029_s29 + $0x160] ss:$8 sps:$4 sm:$0xff]   ;;  %v1891_v4 = vld [vmem:[%s2029_s29 + $0x3a4] ss:$8 sps:$4 sm:$0xff]  }
  0x32   : > { %1162 = vmatpush1.bf16.msra.mxu0 %v1769_v28  ;;  %1081 = vmatprep.subr.bf16.mxu1 %v1770_v29  ;;  %v1837_v28 = vld [vmem:[%s2029_s29 + $0x314] ss:$8 sps:$4 sm:$0xff]   ;;  %v294_v29 = vpack.c.bf16 %v265_v21, %v265_v21  ;;  %v1874_v61 = vld [vmem:[%s2029_s29 + $0x180] ss:$8 sps:$4 sm:$0xff]   ;;  %v1892_v9 = vld [vmem:[%s2029_s29 + $0x1b0] ss:$8 sps:$4 sm:$0xff]  }
  0x33   : > { %1163 = vmatprep.subr.bf16.mxu0 %v1772_v30  ;;  %v298_v30 = vpack.c.bf16 %v282_v22, %v282_v22  ;;  %v1877_v62 = vld [vmem:[%s2029_s29 + $0x380] ss:$8 sps:$4 sm:$0xff]   ;;  %v1882_v63 = vld [vmem:[%s2029_s29 + $0x194] ss:$8 sps:$4 sm:$0xff]   ;;  %v1895_v10 = vld [vmem:[%s2029_s29 + $0x3b0] ss:$8 sps:$4 sm:$0xff]  }
  0x34   : > { %v1912_v21 = vld [vmem:[%s2029_s29 + $0x1e4] ss:$8 sps:$4 sm:$0xff]   ;;  %vm1458_vm0 = vcmask (!%p1656_p6), 418816  }
  0x35   : > { %1082 = vmatpush1.bf16.msra.mxu1 %v1774_v31  ;;  %v1832_v31 = vld [vmem:[%s2029_s29 + $0x110] ss:$8 sps:$4 sm:$0xff]   ;;  %v1915_v22 = vld [vmem:[%s2029_s29 + $0x3e4] ss:$8 sps:$4 sm:$0xff]  }
  0x36   : > { %1164 = vmatpush1.bf16.msra.mxu0 %v1775_v32  ;;  %1083 = vmatprep.subr.bf16.mxu1 %v1776_v33  ;;  %v1835_v32 = vld [vmem:[%s2029_s29 + $0x310] ss:$8 sps:$4 sm:$0xff]   ;;  %v1840_v33 = vld [vmem:[%s2029_s29 + $0x124] ss:$8 sps:$4 sm:$0xff]  }
  0x37   : > { %1165 = vmatprep.subr.bf16.mxu0 %v1778_v34  ;;  %v1843_v34 = vld [vmem:[%s2029_s29 + $0x324] ss:$8 sps:$4 sm:$0xff]  }
  0x39   : > { %1084 = vmatpush1.bf16.msra.mxu1 %v1780_v35  ;;  %v1838_v35 = vld [vmem:[%s2029_s29 + $0x120] ss:$8 sps:$4 sm:$0xff]  }
  0x3a   : > { %1166 = vmatpush1.bf16.msra.mxu0 %v1781_v36  ;;  %1085 = vmatprep.subr.bf16.mxu1 %v1782_v40  ;;  %v1841_v36 = vld [vmem:[%s2029_s29 + $0x320] ss:$8 sps:$4 sm:$0xff]   ;;  %v1847_v40 = vld [vmem:[%s2029_s29 + $0x330] ss:$8 sps:$4 sm:$0xff]  }
  0x3b   : > { %1167 = vmatprep.subr.bf16.mxu0 %v1784_v41  ;;  %v1852_v41 = vld [vmem:[%s2029_s29 + $0x144] ss:$8 sps:$4 sm:$0xff]  }
  0x3d   : > { %1086 = vmatpush1.bf16.msra.mxu1 %v1786_v42  ;;  %v1855_v42 = vld [vmem:[%s2029_s29 + $0x344] ss:$8 sps:$4 sm:$0xff]  }
  0x3e   : > { %1168 = vmatpush1.bf16.msra.mxu0 %v1787_v45  ;;  %1087 = vmatprep.subr.bf16.mxu1 %v1788_v46  ;;  %v1853_v45 = vld [vmem:[%s2029_s29 + $0x340] ss:$8 sps:$4 sm:$0xff]   ;;  %v1858_v46 = vld [vmem:[%s2029_s29 + $0x154] ss:$8 sps:$4 sm:$0xff]  }
  0x3f   : > { %1169 = vmatprep.subr.bf16.mxu0 %v1790_v47  ;;  %v1861_v47 = vld [vmem:[%s2029_s29 + $0x354] ss:$8 sps:$4 sm:$0xff]  }
  0x41   : > { %1088 = vmatpush1.bf16.msra.mxu1 %v1792_v48  ;;  %v1856_v48 = vld [vmem:[%s2029_s29 + $0x150] ss:$8 sps:$4 sm:$0xff]  }
  0x42   : > { %1170 = vmatpush1.bf16.msra.mxu0 %v1793_v49  ;;  %1089 = vmatprep.subr.bf16.mxu1 %v1794_v51  ;;  %v1859_v49 = vld [vmem:[%s2029_s29 + $0x350] ss:$8 sps:$4 sm:$0xff]   ;;  %v1864_v51 = vld [vmem:[%s2029_s29 + $0x164] ss:$8 sps:$4 sm:$0xff]  }
  0x43   : > { %1171 = vmatprep.subr.bf16.mxu0 %v1796_v52  ;;  %v1867_v52 = vld [vmem:[%s2029_s29 + $0x364] ss:$8 sps:$4 sm:$0xff]  }
  0x45   : > { %1090 = vmatpush1.bf16.msra.mxu1 %v1798_v54  ;;  %v1865_v54 = vld [vmem:[%s2029_s29 + $0x360] ss:$8 sps:$4 sm:$0xff]  }
  0x46   : > { %1172 = vmatpush1.bf16.msra.mxu0 %v1799_v56  ;;  %1091 = vmatprep.subr.bf16.mxu1 %v1800_v58  ;;  %v1873_v56 = vld [vmem:[%s2029_s29 + $0x374] ss:$8 sps:$4 sm:$0xff]   ;;  %v1871_v58 = vld [vmem:[%s2029_s29 + $0x370] ss:$8 sps:$4 sm:$0xff]  }
  0x47   : > { %1173 = vmatprep.subr.bf16.mxu0 %v1802_v59  ;;  %v1876_v59 = vld [vmem:[%s2029_s29 + $0x184] ss:$8 sps:$4 sm:$0xff]  }
  0x49   : > { %1092 = vmatpush1.bf16.msra.mxu1 %v1804_v0  ;;  %v1885_v0 = vld [vmem:[%s2029_s29 + $0x394] ss:$8 sps:$4 sm:$0xff]  }
  0x4a   : > { %1174 = vmatpush1.bf16.msra.mxu0 %v1805_v1  ;;  %1093 = vmatprep.subr.bf16.mxu1 %v1806_v2  ;;  %v1880_v1 = vld [vmem:[%s2029_s29 + $0x190] ss:$8 sps:$4 sm:$0xff]  }
  0x4b   : > { %1175 = vmatprep.subr.bf16.mxu0 %v1808_v3  ;;  %v1883_v2 = vld [vmem:[%s2029_s29 + $0x390] ss:$8 sps:$4 sm:$0xff]   ;;  %v1888_v3 = vld [vmem:[%s2029_s29 + $0x1a4] ss:$8 sps:$4 sm:$0xff]  }
  0x4d   : > { %1094 = vmatpush1.bf16.msra.mxu1 %v1810_v5  ;;  %v1886_v5 = vld [vmem:[%s2029_s29 + $0x1a0] ss:$8 sps:$4 sm:$0xff]  }
  0x4e   : > { %1176 = vmatpush1.bf16.msra.mxu0 %v1811_v6  ;;  %1095 = vmatprep.subr.bf16.mxu1 %v1812_v7  ;;  %v1889_v6 = vld [vmem:[%s2029_s29 + $0x3a0] ss:$8 sps:$4 sm:$0xff]   ;;  %v1894_v7 = vld [vmem:[%s2029_s29 + $0x1b4] ss:$8 sps:$4 sm:$0xff]  }
  0x4f   : > { %1177 = vmatprep.subr.bf16.mxu0 %v1814_v8  ;;  %v1897_v8 = vld [vmem:[%s2029_s29 + $0x3b4] ss:$8 sps:$4 sm:$0xff]  }
  0x51   : > { %1096 = vmatpush1.bf16.msra.mxu1 %v1816_v11  ;;  %v1900_v11 = vld [vmem:[%s2029_s29 + $0x1c4] ss:$8 sps:$4 sm:$0xff]  }
  0x52   : > { %1178 = vmatpush1.bf16.msra.mxu0 %v1817_v12  ;;  %1097 = vmatprep.subr.bf16.mxu1 %v1818_v13  ;;  %v1903_v12 = vld [vmem:[%s2029_s29 + $0x3c4] ss:$8 sps:$4 sm:$0xff]   ;;  %v1898_v13 = vld [vmem:[%s2029_s29 + $0x1c0] ss:$8 sps:$4 sm:$0xff]  }
  0x53   : > { %1179 = vmatprep.subr.bf16.mxu0 %v1820_v14  ;;  %v1901_v14 = vld [vmem:[%s2029_s29 + $0x3c0] ss:$8 sps:$4 sm:$0xff]  }
  0x55   : > { %1098 = vmatpush1.bf16.msra.mxu1 %v1822_v17  ;;  %v1906_v17 = vld [vmem:[%s2029_s29 + $0x1d4] ss:$8 sps:$4 sm:$0xff]  }
  0x56   : > { %1180 = vmatpush1.bf16.msra.mxu0 %v1823_v18  ;;  %1108 = vmatprep.subr.bf16.mxu1 %v1827_v19  ;;  %v1909_v18 = vld [vmem:[%s2029_s29 + $0x3d4] ss:$8 sps:$4 sm:$0xff]   ;;  %v1904_v19 = vld [vmem:[%s2029_s29 + $0x1d0] ss:$8 sps:$4 sm:$0xff]  }
  0x57   : > { %1190 = vmatprep.subr.bf16.mxu0 %v1831_v20  ;;  %v1907_v20 = vld [vmem:[%s2029_s29 + $0x3d0] ss:$8 sps:$4 sm:$0xff]  }
  0x58   : > { %1100 = vmatmul.mubr.bf16.vlgmr.msra.gmra.mrb[0].mxu1 %v291_v23  ;;  %v1910_v23 = vld [vmem:[%s2029_s29 + $0x1e0] ss:$8 sps:$4 sm:$0xff]  }
  0x59   : > { %1182 = vmatmul.mubr.bf16.vlgmr.msra.gmra.mrb[0].mxu0 %v295_v24  ;;  %1109 = vmatpush1.bf16.msra.mxu1 %v1825_v25  ;;  %v1913_v24 = vld [vmem:[%s2029_s29 + $0x3e0] ss:$8 sps:$4 sm:$0xff]   ;;  %v1918_v25 = vld [vmem:[%s2029_s29 + $0x1f4] ss:$8 sps:$4 sm:$0xff]  }
  0x5a   : > { %1191 = vmatpush1.bf16.msra.mxu0 %v1829_v26  ;;  %1110 = vmatprep.subr.bf16.mxu1 %v1834_v27  ;;  %v1921_v26 = vld [vmem:[%s2029_s29 + $0x3f4] ss:$8 sps:$4 sm:$0xff]   ;;  %v1916_v27 = vld [vmem:[%s2029_s29 + $0x1f0] ss:$8 sps:$4 sm:$0xff]  }
  0x5b   : > { %1192 = vmatprep.subr.bf16.mxu0 %v1837_v28  ;;  %1140 = vmatprep.mubr.bf16.mxu1 %v294_v29  ;;  %v1919_v28 = vld [vmem:[%s2029_s29 + $0x3f0] ss:$8 sps:$4 sm:$0xff]   ;;  %v293_v29 = vpack.c.bf16 %v2108_v15, %v2108_v15 }
  0x5c   : > { %1222 = vmatprep.mubr.bf16.mxu0 %v298_v30  ;;  %v297_v30 = vpack.c.bf16 %v2111_v16, %v2111_v16  ;;  %v1922_v16 = vld [vmem:[%s2278_s3 + $0x40] sm:$0xff] (!%p1656_p6)  }
  0x5d   : > { %1111 = vmatpush1.bf16.msra.mxu1 %v1832_v31 }
  0x5e   : > { %1193 = vmatpush1.bf16.msra.mxu0 %v1835_v32  ;;  %1112 = vmatprep.subr.bf16.mxu1 %v1840_v33 }
  0x5f   : > { %1194 = vmatprep.subr.bf16.mxu0 %v1843_v34 }
  0x61   : > { %1113 = vmatpush1.bf16.msra.mxu1 %v1838_v35 }
  0x62   : > { %1195 = vmatpush1.bf16.msra.mxu0 %v1841_v36  ;;  %1114 = vmatprep.subr.bf16.mxu1 %v1846_v37 }
  0x63   : > { %1196 = vmatprep.subr.bf16.mxu0 %v1849_v38 }
  0x65   : > { %1115 = vmatpush1.bf16.msra.mxu1 %v1844_v39 }
  0x66   : > { %1197 = vmatpush1.bf16.msra.mxu0 %v1847_v40  ;;  %1116 = vmatprep.subr.bf16.mxu1 %v1852_v41 }
  0x67   : > { %1198 = vmatprep.subr.bf16.mxu0 %v1855_v42  ;;  %v244_v42 = vld [vmem:[#allocation2] sm:$0xf] }
  0x69   : > { %1117 = vmatpush1.bf16.msra.mxu1 %v1850_v43 }
  0x6a   : > { %1199 = vmatpush1.bf16.msra.mxu0 %v1853_v45  ;;  %1118 = vmatprep.subr.bf16.mxu1 %v1858_v46  ;;  %v1923_v45 = vld [vmem:[%s2278_s3] sm:$0xff] (!%p1656_p6)   ;;  %v1924_v46 = vld [vmem:[%s2278_s3 + $0x48] sm:$0xff] (!%p1656_p6)  }
  0x6b   : > { %1200 = vmatprep.subr.bf16.mxu0 %v1861_v47  ;;  %v1925_v47 = vld [vmem:[%s2278_s3 + $0x8] sm:$0xff] (!%p1656_p6)  }
  0x6d   : > { %1119 = vmatpush1.bf16.msra.mxu1 %v1856_v48  ;;  %v1926_v48 = vld [vmem:[%s2278_s3 + $0x50] sm:$0xff] (!%p1656_p6)  }
  0x6e   : > { %1201 = vmatpush1.bf16.msra.mxu0 %v1859_v49  ;;  %1120 = vmatprep.subr.bf16.mxu1 %v1864_v51  ;;  %v1927_v49 = vld [vmem:[%s2278_s3 + $0x10] sm:$0xff] (!%p1656_p6)   ;;  %v1928_v51 = vld [vmem:[%s2278_s3 + $0x58] sm:$0xff] (!%p1656_p6)  }
  0x6f   : > { %1202 = vmatprep.subr.bf16.mxu0 %v1867_v52  ;;  %v1929_v52 = vld [vmem:[%s2278_s3 + $0x18] sm:$0xff] (!%p1656_p6)  }
  0x71   : > { %1121 = vmatpush1.bf16.msra.mxu1 %v1862_v53  ;;  %v1930_v53 = vld [vmem:[%s2278_s3 + $0x60] sm:$0xff] (!%p1656_p6)  }
  0x72   : > { %1203 = vmatpush1.bf16.msra.mxu0 %v1865_v54  ;;  %1122 = vmatprep.subr.bf16.mxu1 %v1870_v55  ;;  %v1253_v54 = vsub.s32 (!%p1656_p6), 0, %v2071_v44  ;;  %v1257_v55 = vsub.s32 (!%p1656_p6), 1, %v2071_v44  ;;  %v1933_v44 = vld [vmem:[%s2278_s3 + $0x28] sm:$0xff] (!%p1656_p6)  }
  0x73   : > { %1204 = vmatprep.subr.bf16.mxu0 %v1873_v56  ;;  %v1931_v56 = vld [vmem:[%s2278_s3 + $0x20] sm:$0xff] (!%p1656_p6)  }
  0x75   : > { %1123 = vmatpush1.bf16.msra.mxu1 %v1868_v57  ;;  %v1932_v57 = vld [vmem:[%s2278_s3 + $0x68] sm:$0xff] (!%p1656_p6)  }
  0x76   : > { %1205 = vmatpush1.bf16.msra.mxu0 %v1871_v58  ;;  %1124 = vmatprep.subr.bf16.mxu1 %v1876_v59  ;;  %v1249_v58 = vld [vmem:[%s2277_s2] sm:$0x3] (!%p1656_p6) }
  0x77   : > { %1206 = vmatprep.subr.bf16.mxu0 %v1879_v60  ;;  %v1254_v59 = vrot.slane (!%p1656_p6), %v1249_v58, %v1253_v54  ;;  %v1258_v60 = vrot.slane (!%p1656_p6), %v1249_v58, %v1257_v55 }
  0x79   : > { %1125 = vmatpush1.bf16.msra.mxu1 %v1874_v61  ;;  %v1259_v61 = vcombine.low (!%p1656_p6), %v1254_v59, %v1258_v60 }
  0x7a   : > { %1207 = vmatpush1.bf16.msra.mxu0 %v1877_v62  ;;  %1126 = vmatprep.subr.bf16.mxu1 %v1882_v63  ;;  %v1934_v62 = vld [vmem:[%s2278_s3 + $0x70] sm:$0xff] (!%p1656_p6)  }
  0x7b   : > { %1208 = vmatprep.subr.bf16.mxu0 %v1885_v0  ;;  %v1266_v0 = vrot.slane (!%p1656_p6), %v1259_v61, %v2079_v50 }
  0x7d   : > { %1127 = vmatpush1.bf16.msra.mxu1 %v1880_v1  ;;  %v1935_v1 = vld [vmem:[%s2278_s3 + $0x30] sm:$0xff] (!%p1656_p6)  }
  0x7e   : > { %1209 = vmatpush1.bf16.msra.mxu0 %v1883_v2  ;;  %1128 = vmatprep.subr.bf16.mxu1 %v1888_v3  ;;  %v1936_v3 = vld [vmem:[%s2278_s3 + $0x78] sm:$0xff] (!%p1656_p6)  }
  0x7f   : > { %1210 = vmatprep.subr.bf16.mxu0 %v1891_v4 }
  0x81   : > { %1129 = vmatpush1.bf16.msra.mxu1 %v1886_v5  ;;  %v1937_v5 = vld [vmem:[%s2278_s3 + $0x38] sm:$0xff] (!%p1656_p6)  }
  0x82   : > { %1211 = vmatpush1.bf16.msra.mxu0 %v1889_v6  ;;  %1130 = vmatprep.subr.bf16.mxu1 %v1894_v7 }
  0x83   : > { %1212 = vmatprep.subr.bf16.mxu0 %v1897_v8 }
  0x85   : > { %1131 = vmatpush1.bf16.msra.mxu1 %v1892_v9 }
  0x86   : > { %1213 = vmatpush1.bf16.msra.mxu0 %v1895_v10  ;;  %1132 = vmatprep.subr.bf16.mxu1 %v1900_v11  ;;  %v1657_v11 = vld [vmem:[%s2279_s4] ss:$0 sm:$0xff] (!%p1656_p6) }
  0x87   : > { %1214 = vmatprep.subr.bf16.mxu0 %v1903_v12 }
  0x89   : > { %1133 = vmatpush1.bf16.msra.mxu1 %v1898_v13 }
  0x8a   : > { %1215 = vmatpush1.bf16.msra.mxu0 %v1901_v14  ;;  %1134 = vmatprep.subr.bf16.mxu1 %v1906_v17 }
  0x8b   : > { %1216 = vmatprep.subr.bf16.mxu0 %v1909_v18 }
  0x8d   : > { %1135 = vmatpush1.bf16.msra.mxu1 %v1904_v19 }
  0x8e   : > { %1217 = vmatpush1.bf16.msra.mxu0 %v1907_v20  ;;  %1136 = vmatprep.subr.bf16.mxu1 %v1912_v21 }
  0x8f   : > { %1218 = vmatprep.subr.bf16.mxu0 %v1915_v22 }
  0x91   : > { %1137 = vmatpush1.bf16.msra.mxu1 %v1910_v23 }
  0x92   : > { %1219 = vmatpush1.bf16.msra.mxu0 %v1913_v24  ;;  %1138 = vmatprep.subr.bf16.mxu1 %v1918_v25 }
  0x93   : > { %1220 = vmatprep.subr.bf16.mxu0 %v1921_v26 }
  0x95   : > { %1139 = vmatpush1.bf16.msra.mxu1 %v1916_v27 }
  0x96   : > { %1221 = vmatpush1.bf16.msra.mxu0 %v1919_v28 }
  0x97   : > { %1679 = vmatprep.subr.bf16.mxu0 (!%p1656_p6), %v1922_v16 }
  0x98   : > { %1141 = vmatmul.mubr.bf16.vlgmr.msra.gmra.mrb[0].mxu1 %v293_v29 }
  0x99   : > { %1223 = vmatmul.mubr.bf16.vlgmr.msra.gmra.mrb[0].mxu0 %v297_v30 }
  0x9a   : > { %1680 = vmatpush3.bf16.msra.mxu0 (!%p1656_p6), %v1923_v45 }
  0x9b   : > { %1681 = vmatprep.subr.bf16.mxu0 (!%p1656_p6), %v1924_v46 }
  0x9e   : > { %1682 = vmatpush3.bf16.msra.mxu0 (!%p1656_p6), %v1925_v47 }
  0x9f   : > { %1683 = vmatprep.subr.bf16.mxu0 (!%p1656_p6), %v1926_v48 }
  0xa2   : > { %1684 = vmatpush3.bf16.msra.mxu0 (!%p1656_p6), %v1927_v49 }
  0xa3   : > { %1685 = vmatprep.subr.bf16.mxu0 (!%p1656_p6), %v1928_v51 }
  0xa6   : > { %1686 = vmatpush3.bf16.msra.mxu0 (!%p1656_p6), %v1929_v52 }
  0xa7   : > { %1687 = vmatprep.subr.bf16.mxu0 (!%p1656_p6), %v1930_v53 }
  0xaa   : > { %1688 = vmatpush3.bf16.msra.mxu0 (!%p1656_p6), %v1931_v56 }
  0xab   : > { %1689 = vmatprep.subr.bf16.mxu0 (!%p1656_p6), %v1932_v57 }
  0xae   : > { %1690 = vmatpush3.bf16.msra.mxu0 (!%p1656_p6), %v1933_v44 }
  0xaf   : > { %1691 = vmatprep.subr.bf16.mxu0 (!%p1656_p6), %v1934_v62 }
  0xb2   : > { %1692 = vmatpush3.bf16.msra.mxu0 (!%p1656_p6), %v1935_v1 }
  0xb3   : > { %1693 = vmatprep.subr.bf16.mxu0 (!%p1656_p6), %v1936_v3 }
  0xb6   : > { %1694 = vmatpush3.bf16.msra.mxu0 (!%p1656_p6), %v1937_v5 }
 0x16b   : > { %v1142_v31 = vpop.f32.mrb[0].mxu1 }
 0x16c   : > { %v1224_v32 = vpop.f32.mrb[0].mxu0  ;;  %v1144_v34 = vpop.f32.mrb[1].mxu1 }
 0x16d   : > { %v1701_v33 = vadd.f32 %v1224_v32, %v1142_v31  ;;  %v1226_v35 = vpop.f32.mrb[1].mxu0  ;;  %v1146_v37 = vpop.f32.mrb[2].mxu1 }
 0x16e   : > { %v1702_v36 = vadd.f32 %v1226_v35, %v1144_v34  ;;  %v1228_v38 = vpop.f32.mrb[2].mxu0  ;;  %v1147_v39 = vpop.f32.mrb[3].mxu1 }
 0x16f   : > { %v1229_v40 = vpop.f32.mrb[3].mxu0 }
 0x170   : > { %v1233_v41 = vcombine.low %v1701_v33, %v1702_v36  ;;  %1247 = sbr.rel (%p1656_p6) target bundleno = 611 (0x263), region = 48 }
 0x172   : > { %v1240_v15 = vrot.slane %v1233_v41, %v2079_v50 }
 0x174   : > { %v1242_v43 = vadd.f32 %v1240_v15, %v244_v42 }
 0x176   : > { %1243 = vst [vmem:[#allocation2] sm:$0xf] %v1242_v43 }
 0x17d   : > { %v1248_v63 = vld [vmem:[#allocation2] sm:$0xf] }
 0x17e   : > { %v1268_v2 = vadd.f32 %v1266_v0, %v1248_v63 }
 0x180   : > { %v1269_v4 = vmax.f32 %v1268_v2, 0.0 }
 0x182   : > { %v1277_v6 = vrot.slane %v1269_v4, %v2079_v50 }
 0x184   : > { %v1278_v7 = vcombine.high %v1277_v6, %v1277_v6  ;;  %v1281_v8 = vpack.c.bf16 %v1277_v6, %v1277_v6 }
 0x186   : > { %v1282_v9 = vpack.c.bf16 %v1278_v7, %v1278_v7 }
 0x188   : > { %1450 = vmatprep.mubr.bf16.mxu0 %v1282_v9 }
 0x189   : > { %1451 = vmatmul.mubr.bf16.vlgmr.msra.gmra.mrb[0].mxu0 %v1281_v8 }
 0x25c   : > { %v1695_v10 = vpop.f32.mrb[0].mxu0 }
 0x25d   : > { %v1696_v12 = vpop.f32.mrb[1].mxu0 }
 0x25e   : > { %v1697_v13 = vadd.f32 %v1696_v12, %v1695_v10  ;;  %v1698_v14 = vpop.f32.mrb[2].mxu0 }
 0x25f   : > { %v1699_v17 = vpop.f32.mrb[3].mxu0 }
 0x260   : > { %v1453_v18 = vadd.f32 %v1697_v13, %v1657_v11 }
 0x262   : > { %1459 = vst.msk [vmem:[#allocation3] sm:$0x3] %vm1458_vm0, %v1453_v18 }
 0x263 PF: > { %p1715_p7 = scmp.eq.s32.totalorder %s2015_s19, 3  ;;  %s1978_s20 = smov [#allocation3]  }
 0x264   : > { %s1467_s21 = sshll.u32 %s1978_s20, 4  ;;  %s1468_s21 = int_to_ptr.vmem [resolvable:$true] %s1467_s21 }
 0x265   : > { %s1938_s22 = scalar_lea.vmem %s1468_s21, 32  ;;  %p1945_p11 = scmp.lt.s32.totalorder %s1468_s21, %s1468_s21 }
 0x266   : > { %p1939_p8 = scmp.ne.s32.totalorder %s1468_s21, %s1938_s22  ;;  %p1946_p12 = scmp.lt.s32.totalorder %s1938_s22, %s1938_s22 }
 0x268   : > { %p1940_p9 = pnand %p1939_p8, %p1715_p7  ;;  %p1947_p13 = por %p1946_p12, %p1945_p11 }
 0x26a   : > { %p1941_p10 = pneg %p1940_p9 }
 0x26c   : > { %p1948_p0 = pnand %p1947_p13, %p1941_p10 }
 0x26e   : > { %1951 = shalt.err (!%p1948_p0)
}
 0x26f   : > { %s1952_s25 = scalar_lea.hbm %s2280_s5, 32 }
 0x270   : > { %p1953_p1 = scmp.ne.s32.totalorder %s2280_s5, %s1952_s25  ;;  %p1958_p4 = scmp.lt.u32.totalorder %s1952_s25, %s2280_s5 }
 0x272   : > { %p1954_p2 = pnand %p1953_p1, %p1715_p7 }
 0x274   : > { %p1955_p3 = pneg %p1954_p2 }
 0x276   : > { %p1960_p5 = pnand %p1958_p4, %p1955_p3 }
 0x278   : > { %1963 = shalt.err (!%p1960_p5)
}
 0x279   : > { %1712 = dma.vmem_to_hbm [thread:$0]  (%p1715_p7), %s1468_s21, 32, %s2280_s5, [#allocation4]  }
 0x27a   : > { %1969 = dma.done.wait (%p1715_p7), [#allocation4], 32  }
 0x27b   : > { %1971 = vsyncadd (%p1715_p7), [#allocation4], 4294967264 }
 0x27c PF: > { %s16_s18 = sadd.s32 1, %s1974_s18  }
 0x27d   : > { %p13_p6 = scmp.ge.s32.totalorder %s16_s18, 6  }
 0x27f   :  { %15 = sbr.rel (!%p13_p6) target bundleno = 1 (0x1), region = 78 }
 0x286   :  { %1480 = vsyncpa [#allocation4], 1 }
 0x287   :  { %1482 = vsyncpa [#allocation4 + $0x1], 1 }

// kernel: convnet_90_forward.2
= control target key start
LH: loop header
LB: loop body
LE: loop exit
PB: predicated region body
PF: predicated region fallthrough
CT: control target
= control target key end

     0   :  { %s6460_s13 = smov 0   ;;  %s8052_s0 = inlined_call_operand.vmem [shape: bf16[2,7744,49], index: 0, kind: input, shape index: {}]   ;;  %s8053_s1 = inlined_call_operand.vmem [shape: bf16[49,24], index: 1, kind: input, shape index: {}]   ;;  %s8054_s2 = inlined_call_operand.vmem [shape: f32[1,24], index: 2, kind: input, shape index: {}]   ;;  %s8055_s3 = inlined_call_operand.vmem [shape: f32[1,24], index: 3, kind: input, shape index: {}]   ;;  %s8056_s4 = inlined_call_operand.vmem [shape: bf16[5,120,48], index: 4, kind: input, shape index: {}]   ;;  %s8057_s5 = inlined_call_operand.vmem [shape: f32[1,48], index: 5, kind: input, shape index: {}]   ;;  %s8058_s6 = inlined_call_operand.vmem [shape: f32[1,48], index: 6, kind: input, shape index: {}]   ;;  %s8059_s7 = inlined_call_operand.vmem [shape: bf16[5,240,64], index: 7, kind: input, shape index: {}]   ;;  %s8060_s8 = inlined_call_operand.vmem [shape: f32[1,64], index: 8, kind: input, shape index: {}]   ;;  %s8061_s9 = inlined_call_operand.vmem [shape: f32[1,64], index: 9, kind: input, shape index: {}]   ;;  %s8062_s10 = inlined_call_operand.vmem [shape: f32[2,64,64], index: 10, kind: output, shape index: {}]  }
   0x1 LB: > { %s4510_s14 = sadd.s32 4294967295, %s6377_s13   ;;  %p4514_p0 = scmp.ge.s32.totalorder %s6377_s13, 1  ;;  %s6377_s13 = sphi %s6460_s13, %s20_s13  }
   0x2   : > { %p312_p1 = scmp.lt.s32.totalorder %s6377_s13, 3 }
   0x4   : > { %p313_p2 = pnand %p4514_p0, %p312_p1 }
   0x5   : > { %p350_p3 = scmp.lt.s32.totalorder (!%p313_p2), %s4510_s14, 1  ;;  %v6471_v0 = vld [vmem:[%s8054_s2] ss:$0 sm:$0xff] (!%p313_p2)  ;;  %v6506_v7 = vld [vmem:[%s8053_s1 + $0x4] sm:$0xf] (!%p313_p2)  ;;  %s6543_s30 = smov (!%p313_p2), 0  }
   0x6   : > { %316 = sbr.rel (%p313_p2) target bundleno = 1446 (0x5a6), region = 60  ;;  %v6476_v1 = vld [vmem:[%s8055_s3] ss:$0 sm:$0xff] (!%p313_p2)  ;;  %v6511_v8 = vld [vmem:[%s8053_s1 + $0x8] sm:$0xf] (!%p313_p2) }
   0x7   : > { %v6481_v2 = vld [vmem:[%s8057_s5] ss:$0 sm:$0xff] (!%p313_p2)  ;;  %v6516_v9 = vld [vmem:[%s8053_s1 + $0xc] sm:$0xf] (!%p313_p2)  ;;  %v6521_v10 = vld [vmem:[%s8053_s1 + $0x10] sm:$0xf] (!%p313_p2) }
   0x8   : > { %v6486_v3 = vld [vmem:[%s8058_s6] ss:$0 sm:$0xff] (!%p313_p2)  ;;  %v6526_v11 = vld [vmem:[%s8053_s1 + $0x14] sm:$0xf] (!%p313_p2)  ;;  %v6536_v12 = vld [vmem:[%s8053_s1 + $0x18] sm:$0x1] (!%p313_p2) }
   0x9   : > { %v6491_v4 = vld [vmem:[%s8060_s8] ss:$0 sm:$0xff] (!%p313_p2) }
   0xa   : > { %v6496_v5 = vld [vmem:[%s8061_s9] ss:$0 sm:$0xff] (!%p313_p2) }
   0xb   : > { %v6501_v6 = vld [vmem:[%s8053_s1] sm:$0xf] (!%p313_p2) }
   0xd   : > { %s8064_s14 = smov (!%p350_p3, %s4510_s14), 1 }
   0xe   : > { %s5786_s17 = smul.u32 3872, %s8064_s14  ;;  %s5192_s18 = sshll.u32 %s8064_s14, 6 }
   0xf   : > { %s6531_s25 = scalar_lea.vmem %s8062_s10, %s5192_s18 }
  0x10   : > { %s6541_s29 = scalar_lea.vmem %s8052_s0, %s5786_s17 }
  0x11 LB: >> { %v4530_v13 = vcombine.low %v6501_v6, %v6506_v7  ;;  %v6391_v14 = vmov 0.0   ;;  %v4531_v15 = vcombine.low %v6511_v8, %v6516_v9  ;;  %s380_s11 = smul.u32 176, %s6381_s30  ;;  %vm517_vm0 = vcmask 1040384   ;;  %s6381_s30 = sphi %s6543_s30, %s379_s30  }
  0x12   : >> { %5318 = vmatprep.subr.bf16.mxu0 %v6391_v14  ;;  %5650 = vmatprep.subr.bf16.mxu1 %v6391_v14  ;;  %vm6392_vm1 = vmmov 0   ;;  %v4532_v16 = vcombine.low %v6521_v10, %v6526_v11  ;;  %v4533_v17 = vcombine.low %v6536_v12, %v6536_v12  ;;  %v6393_v18 = vmov 0   ;;  %s818_s17 = smul.u32 44, %s6381_s30  ;;  %s379_s30 = sadd.s32 1, %s6381_s30  }
  0x13   : >> { %5319 = vmatpush3.bf16.msra.mxu0 %v4530_v13  ;;  %5654 = vmatpush3.bf16.msra.mxu1 %v4530_v13  ;;  %s381_s12 = sshra.s32 %s380_s11, 3  ;;  %v519_v19 = vsel %vm517_vm0, 65535, %v6393_v18  ;;  %vm483_vm2 = vcmask 400384   ;;  %vm777_vm5 = vcmask 195584   ;;  %p376_p4 = scmp.ge.s32.totalorder %s379_s30, 44  }
  0x14   : >> { %5320 = vmatprep.subr.bf16.mxu0 %v6391_v14  ;;  %5651 = vmatprep.subr.bf16.mxu1 %v6391_v14  ;;  %s4518_s15 = sshll.u32 %s381_s12, 2  ;;  %v521_v20 = vand.u32 %v4533_v17, %v519_v19  ;;  %s6632_s18 = scalar_lea.vmem [#allocation2], %s818_s17 }
  0x15   : >> { %5326 = vmatprep.mubr.msk.bf16.mxu0 %vm6392_vm1, %v6391_v14  ;;  %5350 = vmatprep.mubr.msk.bf16.mxu1 %vm6392_vm1, %v6391_v14  ;;  %s6560_s16 = scalar_lea.vmem %s6541_s29, %s4518_s15  ;;  %s6670_s19 = smov (%p376_p4), 0  }
  0x16   : >> { %v5833_v21 = vld [vmem:[%s6560_s16] sm:$0xff]   ;;  %v5834_v22 = vld [vmem:[%s6560_s16 + $0x30] sm:$0xff]   ;;  %v5835_v23 = vld [vmem:[%s6560_s16 + $0x8] sm:$0xff]  }
  0x17   : >> { %5321 = vmatpush3.bf16.msra.mxu0 %v4531_v15  ;;  %5655 = vmatpush3.bf16.msra.mxu1 %v4531_v15  ;;  %v5836_v24 = vld [vmem:[%s6560_s16 + $0x38] sm:$0xff]   ;;  %v5837_v25 = vld [vmem:[%s6560_s16 + $0x10] sm:$0xff]   ;;  %v5838_v26 = vld [vmem:[%s6560_s16 + $0x40] sm:$0xff]  }
  0x18   : >> { %5322 = vmatprep.subr.bf16.mxu0 %v6391_v14  ;;  %5652 = vmatprep.subr.bf16.mxu1 %v6391_v14  ;;  %v5839_v27 = vld [vmem:[%s6560_s16 + $0x18] sm:$0xff]   ;;  %v5840_v28 = vld [vmem:[%s6560_s16 + $0x48] sm:$0xff]   ;;  %v5841_v29 = vld [vmem:[%s6560_s16 + $0x20] sm:$0xff]  }
  0x19   : >> { %v5842_v30 = vld [vmem:[%s6560_s16 + $0x50] sm:$0xff]   ;;  %v5843_v31 = vld [vmem:[%s6560_s16 + $0x28] sm:$0xff]  }
  0x1b   : >> { %5323 = vmatpush3.bf16.msra.mxu0 %v4532_v16  ;;  %5656 = vmatpush3.bf16.msra.mxu1 %v4532_v16 }
  0x1c   : >> { %5324 = vmatprep.subr.bf16.mxu0 %v6391_v14  ;;  %5653 = vmatprep.subr.bf16.mxu1 %v6391_v14 }
  0x1f   : >> { %5325 = vmatpush3.bf16.msra.mxu0 %v521_v20  ;;  %5657 = vmatpush3.bf16.msra.mxu1 %v521_v20 }
  0x22   : >> { %5327 = vmatmul.mubr.msk.bf16.vlgmr.msra.gmra.mrb[0].mxu0 %vm483_vm2, %v5833_v21  ;;  %5351 = vmatmul.mubr.msk.bf16.vlgmr.msra.gmra.mrb[0].mxu1 %vm483_vm2, %v5834_v22 }
  0x23   : >> { %5330 = vmatprep.mubr.msk.bf16.mxu0 %vm6392_vm1, %v6391_v14  ;;  %5354 = vmatprep.mubr.msk.bf16.mxu1 %vm6392_vm1, %v6391_v14 }
  0x2a   : >> { %5331 = vmatmul.mubr.msk.bf16.gmra.mrb[4].mxu0 %vm483_vm2, %v5835_v23  ;;  %5355 = vmatmul.mubr.msk.bf16.gmra.mrb[4].mxu1 %vm483_vm2, %v5836_v24 }
  0x2b   : >> { %5334 = vmatprep.mubr.msk.bf16.mxu0 %vm6392_vm1, %v6391_v14  ;;  %5358 = vmatprep.mubr.msk.bf16.mxu1 %vm6392_vm1, %v6391_v14 }
  0x32   : >> { %5335 = vmatmul.mubr.msk.bf16.gmra.mrb[8].mxu0 %vm483_vm2, %v5837_v25  ;;  %5359 = vmatmul.mubr.msk.bf16.gmra.mrb[8].mxu1 %vm483_vm2, %v5838_v26 }
  0x33   : >> { %5338 = vmatprep.mubr.msk.bf16.mxu0 %vm6392_vm1, %v6391_v14  ;;  %5362 = vmatprep.mubr.msk.bf16.mxu1 %vm6392_vm1, %v6391_v14 }
  0x3a   : >> { %5339 = vmatmul.mubr.msk.bf16.gmra.mrb[12].mxu0 %vm483_vm2, %v5839_v27  ;;  %5363 = vmatmul.mubr.msk.bf16.gmra.mrb[12].mxu1 %vm483_vm2, %v5840_v28 }
  0x3b   : >> { %5342 = vmatprep.mubr.msk.bf16.mxu0 %vm6392_vm1, %v6391_v14  ;;  %5366 = vmatprep.mubr.msk.bf16.mxu1 %vm6392_vm1, %v6391_v14 }
  0x42   : >> { %5343 = vmatmul.mubr.msk.bf16.gmra.mrb[16].mxu0 %vm483_vm2, %v5841_v29  ;;  %5367 = vmatmul.mubr.msk.bf16.gmra.mrb[16].mxu1 %vm483_vm2, %v5842_v30 }
  0x43   : >> { %5346 = vmatprep.mubr.msk.bf16.mxu0 %vm6392_vm1, %v6391_v14 }
  0x4a   : >> { %5347 = vmatmul.mubr.msk.bf16.gmra.mrb[20].mxu0 %vm483_vm2, %v5843_v31 }
  0xf5   : >> { %v6593_v32 = vpop.f32.mrb[0].mxu0  ;;  %v605_v33 = vpop.f32.mrb[0].mxu1 }
  0xf6   : >> { %v5328_v34 = vpop.f32.mrb[1].mxu0  ;;  %v662_v35 = vmul.f32 %v6471_v0, %v605_v33  ;;  %v5352_v36 = vpop.f32.mrb[1].mxu1 }
  0xf7   : >> { %v560_v37 = vpop.f32.mrb[2].mxu0  ;;  %v608_v38 = vpop.f32.mrb[2].mxu1 }
  0xf8   : >> { %v651_v39 = vmul.f32 %v6471_v0, %v560_v37  ;;  %v690_v40 = vadd.f32 %v6476_v1, %v662_v35  ;;  %v5329_v41 = vpop.f32.mrb[3].mxu0  ;;  %v663_v42 = vmul.f32 %v6471_v0, %v608_v38  ;;  %v5353_v43 = vpop.f32.mrb[3].mxu1 }
  0xfa   : >> { %v679_v44 = vadd.f32 %v6476_v1, %v651_v39  ;;  %vm712_vm3 = vcmp.gt.f32.partialorder %v690_v40, 0.0  ;;  %v734_v45 = vmul.f32 0.01, %v690_v40  ;;  %v691_v46 = vadd.f32 %v6476_v1, %v663_v42 }
  0xfc   : >> { %vm701_vm4 = vcmp.gt.f32.partialorder %v679_v44, 0.0  ;;  %v723_v47 = vmul.f32 0.01, %v679_v44  ;;  %v756_v48 = vsel %vm712_vm3, %v690_v40, %v734_v45  ;;  %v735_v57 = vmul.f32 0.01, %v691_v46 }
  0xfd   : >> { %v565_v49 = vpop.f32.mrb[4].mxu0  ;;  %v613_v50 = vpop.f32.mrb[4].mxu1  ;;  %vm713_vm6 = vcmp.gt.f32.partialorder %v691_v46, 0.0 }
  0xfe   : >> { %v745_v51 = vsel %vm701_vm4, %v679_v44, %v723_v47  ;;  %v652_v52 = vmul.f32 %v6471_v0, %v565_v49  ;;  %v5332_v53 = vpop.f32.mrb[5].mxu0  ;;  %v664_v54 = vmul.f32 %v6471_v0, %v613_v50  ;;  %v5356_v55 = vpop.f32.mrb[5].mxu1  ;;  %v757_v19 = vsel %vm713_vm6, %v691_v46, %v735_v57 }
  0xff   : >> { %v767_v56 = vmax.f32 %v745_v51, %v756_v48  ;;  %v568_v58 = vpop.f32.mrb[6].mxu0  ;;  %v616_v59 = vpop.f32.mrb[6].mxu1 }
 0x100   : >> { %v680_v60 = vadd.f32 %v6476_v1, %v652_v52  ;;  %v653_v61 = vmul.f32 %v6471_v0, %v568_v58  ;;  %v692_v62 = vadd.f32 %v6476_v1, %v664_v54  ;;  %v5333_v63 = vpop.f32.mrb[7].mxu0  ;;  %v665_v13 = vmul.f32 %v6471_v0, %v616_v59  ;;  %v5357_v14 = vpop.f32.mrb[7].mxu1 }
 0x101   : >> { %779 = vst.msk [vmem:[#allocation4 + $0x8] sm:$0xff] %vm777_vm5, %v767_v56 }
 0x102   : >> { %vm702_vm7 = vcmp.gt.f32.partialorder %v680_v60, 0.0  ;;  %v724_v15 = vmul.f32 0.01, %v680_v60  ;;  %v681_v16 = vadd.f32 %v6476_v1, %v653_v61  ;;  %vm714_vm8 = vcmp.gt.f32.partialorder %v692_v62, 0.0 }
 0x103   : >> { %v736_v17 = vmul.f32 0.01, %v692_v62  ;;  %v693_v18 = vadd.f32 %v6476_v1, %v665_v13 }
 0x104   : >> { %v746_v20 = vsel %vm702_vm7, %v680_v60, %v724_v15  ;;  %vm703_vm9 = vcmp.gt.f32.partialorder %v681_v16, 0.0  ;;  %v725_v21 = vmul.f32 0.01, %v681_v16 }
 0x105   : >> { %v768_v22 = vmax.f32 %v746_v20, %v757_v19  ;;  %v758_v23 = vsel %vm714_vm8, %v692_v62, %v736_v17  ;;  %v573_v24 = vpop.f32.mrb[8].mxu0  ;;  %v621_v25 = vpop.f32.mrb[8].mxu1  ;;  %v737_v33 = vmul.f32 0.01, %v693_v18  ;;  %vm715_vm10 = vcmp.gt.f32.partialorder %v693_v18, 0.0 }
 0x106   : >> { %v747_v26 = vsel %vm703_vm9, %v681_v16, %v725_v21  ;;  %v654_v27 = vmul.f32 %v6471_v0, %v573_v24  ;;  %v5336_v28 = vpop.f32.mrb[9].mxu0  ;;  %v666_v29 = vmul.f32 %v6471_v0, %v621_v25  ;;  %v5360_v30 = vpop.f32.mrb[9].mxu1 }
 0x107   : >> { %780 = vst.msk [vmem:[#allocation4 + $0x10] sm:$0xff] %vm777_vm5, %v768_v22  ;;  %v769_v31 = vmax.f32 %v747_v26, %v758_v23  ;;  %v576_v34 = vpop.f32.mrb[10].mxu0  ;;  %v624_v35 = vpop.f32.mrb[10].mxu1  ;;  %v759_v46 = vsel %vm715_vm10, %v693_v18, %v737_v33 }
 0x108   : >> { %v682_v36 = vadd.f32 %v6476_v1, %v654_v27  ;;  %v655_v37 = vmul.f32 %v6471_v0, %v576_v34  ;;  %v694_v38 = vadd.f32 %v6476_v1, %v666_v29  ;;  %v5337_v39 = vpop.f32.mrb[11].mxu0  ;;  %v667_v40 = vmul.f32 %v6471_v0, %v624_v35  ;;  %v5361_v41 = vpop.f32.mrb[11].mxu1 }
 0x109   : >> { %781 = vst.msk [vmem:[#allocation4 + $0x18] sm:$0xff] %vm777_vm5, %v769_v31 }
 0x10a   : >> { %vm704_vm11 = vcmp.gt.f32.partialorder %v682_v36, 0.0  ;;  %v726_v42 = vmul.f32 0.01, %v682_v36  ;;  %v683_v43 = vadd.f32 %v6476_v1, %v655_v37  ;;  %vm716_vm12 = vcmp.gt.f32.partialorder %v694_v38, 0.0 }
 0x10b   : >> { %v738_v44 = vmul.f32 0.01, %v694_v38  ;;  %v695_v45 = vadd.f32 %v6476_v1, %v667_v40 }
 0x10c   : >> { %v748_v47 = vsel %vm704_vm11, %v682_v36, %v726_v42  ;;  %vm705_vm13 = vcmp.gt.f32.partialorder %v683_v43, 0.0  ;;  %v727_v48 = vmul.f32 0.01, %v683_v43  ;;  %vm825_vm11 = vcmask 191488  }
 0x10d   : >> { %v770_v49 = vmax.f32 %v748_v47, %v759_v46  ;;  %v760_v50 = vsel %vm716_vm12, %v694_v38, %v738_v44  ;;  %v581_v51 = vpop.f32.mrb[12].mxu0  ;;  %v629_v52 = vpop.f32.mrb[12].mxu1  ;;  %v739_v59 = vmul.f32 0.01, %v695_v45  ;;  %vm717_vm14 = vcmp.gt.f32.partialorder %v695_v45, 0.0 }
 0x10e   : >> { %v749_v53 = vsel %vm705_vm13, %v683_v43, %v727_v48  ;;  %v656_v54 = vmul.f32 %v6471_v0, %v581_v51  ;;  %v5340_v55 = vpop.f32.mrb[13].mxu0  ;;  %v668_v56 = vmul.f32 %v6471_v0, %v629_v52  ;;  %v5364_v57 = vpop.f32.mrb[13].mxu1 }
 0x10f   : >> { %782 = vst.msk [vmem:[#allocation4 + $0x20] sm:$0xff] %vm777_vm5, %v770_v49  ;;  %v771_v58 = vmax.f32 %v749_v53, %v760_v50  ;;  %v584_v60 = vpop.f32.mrb[14].mxu0  ;;  %v632_v61 = vpop.f32.mrb[14].mxu1  ;;  %v761_v24 = vsel %vm717_vm14, %v695_v45, %v739_v59  ;;  %v650_v49 = vmul.f32 %v6471_v0, %v6593_v32 }
 0x110   : >> { %v791_v62 = vld [vmem:[#allocation4 + $0x10] ss:$2 sm:$0xff]  ;;  %v803_v63 = vld [vmem:[#allocation4 + $0x11] ss:$2 sm:$0xff]  ;;  %v684_v13 = vadd.f32 %v6476_v1, %v656_v54  ;;  %v657_v14 = vmul.f32 %v6471_v0, %v584_v60  ;;  %v696_v15 = vadd.f32 %v6476_v1, %v668_v56  ;;  %v5341_v16 = vpop.f32.mrb[15].mxu0  ;;  %v669_v17 = vmul.f32 %v6471_v0, %v632_v61  ;;  %v5365_v18 = vpop.f32.mrb[15].mxu1 }
 0x111   : >> { %v813_v19 = vmax.f32 %v791_v62, %v803_v63  ;;  %783 = vst.msk [vmem:[#allocation4 + $0x28] sm:$0xff] %vm777_vm5, %v771_v58  ;;  %v678_v60 = vadd.f32 %v6476_v1, %v650_v49 }
 0x112   : >> { %vm706_vm15 = vcmp.gt.f32.partialorder %v684_v13, 0.0  ;;  %v728_v20 = vmul.f32 0.01, %v684_v13  ;;  %v685_v21 = vadd.f32 %v6476_v1, %v657_v14  ;;  %vm718_vm0 = vcmp.gt.f32.partialorder %v696_v15, 0.0 }
 0x113   : >> { %821 = vst.msk [vmem:[%s6632_s18 + $0x8] sm:$0xff] %vm777_vm5, %v813_v19  ;;  %v740_v22 = vmul.f32 0.01, %v696_v15  ;;  %v697_v23 = vadd.f32 %v6476_v1, %v669_v17  ;;  %vm700_vm9 = vcmp.gt.f32.partialorder %v678_v60, 0.0 }
 0x114   : >> { %v750_v25 = vsel %vm706_vm15, %v684_v13, %v728_v20  ;;  %vm707_vm1 = vcmp.gt.f32.partialorder %v685_v21, 0.0  ;;  %v729_v26 = vmul.f32 0.01, %v685_v21 }
 0x115   : >> { %v772_v27 = vmax.f32 %v750_v25, %v761_v24  ;;  %v762_v28 = vsel %vm718_vm0, %v696_v15, %v740_v22  ;;  %v589_v29 = vpop.f32.mrb[16].mxu0  ;;  %v637_v30 = vpop.f32.mrb[16].mxu1  ;;  %v741_v38 = vmul.f32 0.01, %v697_v23  ;;  %vm719_vm2 = vcmp.gt.f32.partialorder %v697_v23, 0.0 }
 0x116   : >> { %v751_v31 = vsel %vm707_vm1, %v685_v21, %v729_v26  ;;  %v658_v33 = vmul.f32 %v6471_v0, %v589_v29  ;;  %v5344_v34 = vpop.f32.mrb[17].mxu0  ;;  %v670_v35 = vmul.f32 %v6471_v0, %v637_v30  ;;  %v5368_v36 = vpop.f32.mrb[17].mxu1  ;;  %v722_v22 = vmul.f32 0.01, %v678_v60 }
 0x117   : >> { %784 = vst.msk [vmem:[#allocation4 + $0x30] sm:$0xff] %vm777_vm5, %v772_v27  ;;  %v773_v37 = vmax.f32 %v751_v31, %v762_v28  ;;  %v592_v39 = vpop.f32.mrb[18].mxu0  ;;  %v640_v40 = vpop.f32.mrb[18].mxu1  ;;  %v763_v55 = vsel %vm719_vm2, %v697_v23, %v741_v38 }
 0x118   : >> { %v793_v41 = vld [vmem:[#allocation4 + $0x20] ss:$2 sm:$0xff]  ;;  %v805_v42 = vld [vmem:[#allocation4 + $0x21] ss:$2 sm:$0xff]  ;;  %v686_v43 = vadd.f32 %v6476_v1, %v658_v33  ;;  %v659_v44 = vmul.f32 %v6471_v0, %v592_v39  ;;  %v698_v45 = vadd.f32 %v6476_v1, %v670_v35  ;;  %v5345_v46 = vpop.f32.mrb[19].mxu0  ;;  %v671_v47 = vmul.f32 %v6471_v0, %v640_v40  ;;  %v5369_v48 = vpop.f32.mrb[19].mxu1 }
 0x119   : >> { %v814_v50 = vmax.f32 %v793_v41, %v805_v42  ;;  %785 = vst.msk [vmem:[#allocation4 + $0x38] sm:$0xff] %vm777_vm5, %v773_v37  ;;  %v744_v29 = vsel %vm700_vm9, %v678_v60, %v722_v22 }
 0x11a   : >> { %vm708_vm3 = vcmp.gt.f32.partialorder %v686_v43, 0.0  ;;  %v730_v51 = vmul.f32 0.01, %v686_v43  ;;  %v687_v52 = vadd.f32 %v6476_v1, %v659_v44  ;;  %vm720_vm4 = vcmp.gt.f32.partialorder %v698_v45, 0.0 }
 0x11b   : >> { %822 = vst.msk [vmem:[%s6632_s18 + $0x10] sm:$0xff] %vm777_vm5, %v814_v50  ;;  %v742_v53 = vmul.f32 0.01, %v698_v45  ;;  %v699_v54 = vadd.f32 %v6476_v1, %v671_v47 }
 0x11c   : >> { %v752_v56 = vsel %vm708_vm3, %v686_v43, %v730_v51  ;;  %vm709_vm6 = vcmp.gt.f32.partialorder %v687_v52, 0.0  ;;  %v731_v57 = vmul.f32 0.01, %v687_v52 }
 0x11d   : >> { %v774_v58 = vmax.f32 %v752_v56, %v763_v55  ;;  %v764_v32 = vsel %vm720_vm4, %v698_v45, %v742_v53  ;;  %v597_v59 = vpop.f32.mrb[20].mxu0  ;;  %v743_v14 = vmul.f32 0.01, %v699_v54  ;;  %vm721_vm7 = vcmp.gt.f32.partialorder %v699_v54, 0.0 }
 0x11e   : >> { %v753_v61 = vsel %vm709_vm6, %v687_v52, %v731_v57  ;;  %v660_v62 = vmul.f32 %v6471_v0, %v597_v59  ;;  %v5348_v63 = vpop.f32.mrb[21].mxu0 }
 0x11f   : >> { %786 = vst.msk [vmem:[#allocation4 + $0x40] sm:$0xff] %vm777_vm5, %v774_v58  ;;  %v775_v13 = vmax.f32 %v753_v61, %v764_v32  ;;  %v600_v15 = vpop.f32.mrb[22].mxu0  ;;  %v765_v25 = vsel %vm721_vm7, %v699_v54, %v743_v14 }
 0x120   : >> { %v795_v16 = vld [vmem:[#allocation4 + $0x30] ss:$2 sm:$0xff]  ;;  %v807_v17 = vld [vmem:[#allocation4 + $0x31] ss:$2 sm:$0xff]  ;;  %v688_v18 = vadd.f32 %v6476_v1, %v660_v62  ;;  %v661_v19 = vmul.f32 %v6471_v0, %v600_v15  ;;  %v5349_v20 = vpop.f32.mrb[23].mxu0 }
 0x121   : >> { %v815_v21 = vmax.f32 %v795_v16, %v807_v17  ;;  %787 = vst.msk [vmem:[#allocation4 + $0x48] sm:$0xff] %vm777_vm5, %v775_v13 }
 0x122   : >> { %vm710_vm8 = vcmp.gt.f32.partialorder %v688_v18, 0.0  ;;  %v732_v23 = vmul.f32 0.01, %v688_v18  ;;  %v689_v24 = vadd.f32 %v6476_v1, %v661_v19 }
 0x123   : >> { %823 = vst.msk [vmem:[%s6632_s18 + $0x18] sm:$0xff] %vm777_vm5, %v815_v21 }
 0x124   : >> { %v754_v26 = vsel %vm710_vm8, %v688_v18, %v732_v23  ;;  %vm711_vm10 = vcmp.gt.f32.partialorder %v689_v24, 0.0  ;;  %v733_v27 = vmul.f32 0.01, %v689_v24 }
 0x125   : >> { %v776_v28 = vmax.f32 %v754_v26, %v765_v25 }
 0x126   : >> { %v755_v30 = vsel %vm711_vm10, %v689_v24, %v733_v27 }
 0x127   : >> { %788 = vst.msk [vmem:[#allocation4 + $0x50] sm:$0xff] %vm777_vm5, %v776_v28  ;;  %v766_v31 = vmax.f32 %v744_v29, %v755_v30 }
 0x128   : >> { %v797_v33 = vld [vmem:[#allocation4 + $0x40] ss:$2 sm:$0xff]  ;;  %v809_v34 = vld [vmem:[#allocation4 + $0x41] ss:$2 sm:$0xff] }
 0x129   : >> { %v816_v35 = vmax.f32 %v797_v33, %v809_v34  ;;  %778 = vst.msk [vmem:[#allocation4] sm:$0xff] %vm777_vm5, %v766_v31 }
 0x12b   : >> { %824 = vst.msk [vmem:[%s6632_s18 + $0x20] sm:$0xff] %vm777_vm5, %v816_v35 }
 0x12d   : > { %378 = sbr.rel (!%p376_p4) target bundleno = 17 (0x11), region = 200 }
 0x12e   : >> { %v799_v36 = vld [vmem:[#allocation4 + $0x50] ss:$2 sm:$0xf]  ;;  %v811_v37 = vld [vmem:[#allocation4 + $0x51] ss:$2 sm:$0xf] }
 0x12f   : >> { %v817_v38 = vmax.f32 %v799_v36, %v811_v37 }
 0x130   : >> { %v789_v39 = vld [vmem:[#allocation4] ss:$2 sm:$0xff]  ;;  %v801_v40 = vld [vmem:[#allocation4 + $0x1] ss:$2 sm:$0xff] }
 0x131   : >> { %826 = vst.msk [vmem:[%s6632_s18 + $0x28] sm:$0xf] %vm825_vm11, %v817_v38  ;;  %v812_v41 = vmax.f32 %v789_v39, %v801_v40 }
 0x133   : >> { %820 = vst.msk [vmem:[%s6632_s18] sm:$0xff] %vm777_vm5, %v812_v41 }
 0x134 LB: >> { %v6394_v42 = vmov 0.0   ;;  %v6124_v43 = vld [vmem:[%s8056_s4 + $0x3c] sm:$0xff]   ;;  %s834_s22 = smul.u32 88, %s6385_s19  ;;  %v6125_v0 = vld [vmem:[%s8056_s4 + $0x44] sm:$0xff]   ;;  %v6126_v46 = vld [vmem:[%s8056_s4 + $0x4c] sm:$0xff]   ;;  %s6395_s28 = smov 48   ;;  %s6385_s19 = sphi %s6670_s19, %s832_s19  }
 0x135   : >> { %5370 = vmatprep.subr.bf16.mxu0 %v6394_v42  ;;  %5510 = vmatprep.subr.bf16.mxu1 %v6394_v42  ;;  %s6396_s29 = smov 24   ;;  %v6127_v53 = vld [vmem:[%s8056_s4 + $0x54] sm:$0xff]   ;;  %vm6397_vm12 = vmmov 0   ;;  %s6398_s12 = smov 72   ;;  %vm1201_vm13 = vcmask 1043456   ;;  %vm955_vm14 = vcmask 392192  }
 0x136   : >> { %5371 = vmatpush3.bf16.msra.mxu0 %v6124_v43  ;;  %5511 = vmatpush3.bf16.msra.mxu1 %v6124_v43  ;;  %s6686_s26 = scalar_lea.vmem [#allocation2], %s834_s22  ;;  %s6399_s15 = smov 96   ;;  %vm961_vm15 = vcmask 588800   ;;  %vm967_vm0 = vcmask 785408   ;;  %vm1191_vm1 = vcmask 982016  }
 0x137   : >> { %5372 = vmatprep.subr.bf16.mxu0 %v6394_v42  ;;  %5512 = vmatprep.subr.bf16.mxu1 %v6394_v42 }
 0x138   : >> { %5386 = vmatprep.mubr.msk.bf16.mxu0 %vm6397_vm12, %v6394_v42  ;;  %5526 = vmatprep.mubr.msk.bf16.mxu1 %vm6397_vm12, %v6394_v42 }
 0x13a   : >> { %v4583_v1 = vld [vmem:[%s6686_s26 + $0x2e] sm:$0xff]  ;;  %v4584_v6 = vld [vmem:[%s6686_s26 + $0x36] sm:$0xff]  ;;  %v4656_v11 = vld [vmem:[%s6686_s26 + $0x62] sm:$0xff]  ;;  %5373 = vmatpush3.bf16.msra.mxu0 %v6125_v0  ;;  %5513 = vmatpush3.bf16.msra.mxu1 %v6125_v0 }
 0x13b   : >> { %v4576_v7 = vld [vmem:[%s6686_s26 + $0x2d] sm:$0xff]  ;;  %v5854_v8 = vpack.i.bf16 %v4584_v6, %v4583_v1  ;;  %v4577_v9 = vld [vmem:[%s6686_s26 + $0x35] sm:$0xff]  ;;  %v4649_v45 = vld [vmem:[%s6686_s26 + $0x61] sm:$0xff]  ;;  %5374 = vmatprep.subr.bf16.mxu0 %v6394_v42  ;;  %5514 = vmatprep.subr.bf16.mxu1 %v6394_v42 }
 0x13c   : >> { %v4655_v10 = vld [vmem:[%s6686_s26 + $0x5a] sm:$0xff]  ;;  %v5844_v12 = vpack.i.bf16 %v4577_v9, %v4576_v7  ;;  %v4663_v50 = vld [vmem:[%s6686_s26 + $0x63] sm:$0xff]  ;;  %v4590_v51 = vld [vmem:[%s6686_s26 + $0x2f] sm:$0xff] }
 0x13d   : >> { %v4648_v44 = vld [vmem:[%s6686_s26 + $0x59] sm:$0xff]  ;;  %5855 = vrot.lane.b32.xlu1 %v5854_v8, %s6395_s28  ;;  %v5859_v47 = vpack.i.bf16 %v4656_v11, %v4655_v10  ;;  %v4670_v57 = vld [vmem:[%s6686_s26 + $0x64] sm:$0xff]  ;;  %v4597_v58 = vld [vmem:[%s6686_s26 + $0x30] sm:$0xff] }
 0x13e   : >> { %5845 = vrot.lane.b32.xlu0 %v5844_v12, %s6396_s29  ;;  %v5849_v48 = vpack.i.bf16 %v4649_v45, %v4648_v44  ;;  %v4662_v49 = vld [vmem:[%s6686_s26 + $0x5b] sm:$0xff]  ;;  %5375 = vmatpush3.bf16.msra.mxu0 %v6126_v46  ;;  %v4650_v61 = vld [vmem:[%s6686_s26 + $0x69] sm:$0xff]  ;;  %v4651_v62 = vld [vmem:[%s6686_s26 + $0x71] sm:$0xff] }
 0x13f   : >> { %v4591_v52 = vld [vmem:[%s6686_s26 + $0x37] sm:$0xff]  ;;  %5515 = vmatpush3.bf16.msra.mxu1 %v6126_v46  ;;  %v5869_v54 = vpack.i.bf16 %v4663_v50, %v4662_v49  ;;  %5376 = vmatprep.subr.bf16.mxu0 %v6394_v42  ;;  %v4579_v13 = vld [vmem:[%s6686_s26 + $0x45] sm:$0xff]  ;;  %v5889_v14 = vpack.i.bf16 %v4651_v62, %v4650_v61  ;;  %v4587_v35 = vld [vmem:[%s6686_s26 + $0x4e] sm:$0xff] }
 0x140   : >> { %v5864_v55 = vpack.i.bf16 %v4591_v52, %v4590_v51  ;;  %v4669_v56 = vld [vmem:[%s6686_s26 + $0x5c] sm:$0xff]  ;;  %5516 = vmatprep.subr.bf16.mxu1 %v6394_v42  ;;  %v4657_v16 = vld [vmem:[%s6686_s26 + $0x6a] sm:$0xff]  ;;  %v4658_v17 = vld [vmem:[%s6686_s26 + $0x72] sm:$0xff] }
 0x141   : >> { %5860 = vrot.lane.b32.xlu1 %v5859_v47, %s6395_s28  ;;  %v4598_v32 = vld [vmem:[%s6686_s26 + $0x38] sm:$0xff]  ;;  %v5879_v59 = vpack.i.bf16 %v4670_v57, %v4669_v56  ;;  %v4586_v19 = vld [vmem:[%s6686_s26 + $0x46] sm:$0xff]  ;;  %v5899_v20 = vpack.i.bf16 %v4658_v17, %v4657_v16  ;;  %v4601_v41 = vld [vmem:[%s6686_s26 + $0x50] sm:$0xff] }
 0x142   : >> { %5850 = vrot.lane.b32.xlu0 %v5849_v48, %s6396_s29  ;;  %5377 = vmatpush3.bf16.msra.mxu0 %v6127_v53  ;;  %v5874_v60 = vpack.i.bf16 %v4598_v32, %v4597_v58  ;;  %v4578_v63 = vld [vmem:[%s6686_s26 + $0x3d] sm:$0xff]  ;;  %v4664_v22 = vld [vmem:[%s6686_s26 + $0x6b] sm:$0xff]  ;;  %v4665_v23 = vld [vmem:[%s6686_s26 + $0x73] sm:$0xff] }
 0x143   : >> { %5517 = vmatpush3.bf16.msra.mxu1 %v6127_v53  ;;  %5378 = vmatprep.subr.bf16.mxu0 %v6394_v42  ;;  %v5884_v15 = vpack.i.bf16 %v4579_v13, %v4578_v63  ;;  %v4585_v18 = vld [vmem:[%s6686_s26 + $0x3e] sm:$0xff]  ;;  %v4593_v25 = vld [vmem:[%s6686_s26 + $0x47] sm:$0xff]  ;;  %v5909_v26 = vpack.i.bf16 %v4665_v23, %v4664_v22  ;;  %v4672_v29 = vld [vmem:[%s6686_s26 + $0x74] sm:$0xff] }
 0x144   : >> { %5518 = vmatprep.subr.bf16.mxu1 %v6394_v42  ;;  %v5894_v21 = vpack.i.bf16 %v4586_v19, %v4585_v18  ;;  %v4592_v24 = vld [vmem:[%s6686_s26 + $0x3f] sm:$0xff]  ;;  %v4671_v28 = vld [vmem:[%s6686_s26 + $0x6c] sm:$0xff]  ;;  %v6131_v50 = vld [vmem:[%s8056_s4 + $0x74] ss:$0 sps:$4 sm:$0xff]  }
 0x145   : >> { %5870 = vrot.lane.b32.xlu1 %v5869_v54, %s6398_s12  ;;  %v5904_v27 = vpack.i.bf16 %v4593_v25, %v4592_v24  ;;  %v4599_v30 = vld [vmem:[%s6686_s26 + $0x40] sm:$0xff]  ;;  %v4600_v31 = vld [vmem:[%s6686_s26 + $0x48] sm:$0xff]  ;;  %v5919_v33 = vpack.i.bf16 %v4672_v29, %v4671_v28  ;;  %v4554_v54 = vld [vmem:[%s6686_s26 + $0x12] sm:$0xff]  ;;  %v1203_v57 = vsel %vm1201_vm13, %v6131_v50, 0 }
 0x146   : >> { %5865 = vrot.lane.b32.xlu0 %v5864_v55, %s6398_s12  ;;  %v5914_v34 = vpack.i.bf16 %v4600_v31, %v4599_v30  ;;  %v4659_v36 = vld [vmem:[%s6686_s26 + $0x7a] sm:$0xff]  ;;  %v4580_v37 = vld [vmem:[%s6686_s26 + $0x4d] sm:$0xff]  ;;  %v4552_v9 = vld [vmem:[%s6686_s26 + $0x2] sm:$0xff] }
 0x147   : >> { %v4652_v38 = vld [vmem:[%s6686_s26 + $0x79] sm:$0xff]  ;;  %v5929_v39 = vpack.i.bf16 %v4659_v36, %v4587_v35  ;;  %v4594_v0 = vld [vmem:[%s6686_s26 + $0x4f] sm:$0xff]  ;;  %v6129_v11 = vld [vmem:[%s8056_s4 + $0x64] sm:$0xff]  }
 0x148   : >> { %v5924_v40 = vpack.i.bf16 %v4652_v38, %v4580_v37  ;;  %v4673_v43 = vld [vmem:[%s6686_s26 + $0x7c] sm:$0xff]  ;;  %v4553_v10 = vld [vmem:[%s6686_s26 + $0xa] sm:$0xff]  ;;  %v4564_v62 = vld [vmem:[%s6686_s26 + $0x14] sm:$0xff] }
 0x149   : >> { %5880 = vrot.lane.b32.xlu1 %v5879_v59, %s6399_s15  ;;  %v4666_v1 = vld [vmem:[%s6686_s26 + $0x7b] sm:$0xff]  ;;  %v5939_v7 = vpack.i.bf16 %v4673_v43, %v4601_v41  ;;  %v4548_v44 = vld [vmem:[%s6686_s26 + $0x9] sm:$0xff]  ;;  %v5949_v45 = vpack.i.bf16 %v4553_v10, %v4552_v9  ;;  %v4549_v58 = vld [vmem:[%s6686_s26 + $0x11] sm:$0xff] }
 0x14a   : >> { %5875 = vrot.lane.b32.xlu0 %v5874_v60, %s6399_s15  ;;  %v6128_v6 = vld [vmem:[%s8056_s4 + $0x5c] sm:$0xff]   ;;  %v5934_v8 = vpack.i.bf16 %v4666_v1, %v4594_v0  ;;  %v4562_v46 = vld [vmem:[%s6686_s26 + $0x4] sm:$0xff]  ;;  %v6130_v47 = vld [vmem:[%s8056_s4 + $0x6c] sm:$0xff]  }
 0x14b   : >> { %5379 = vmatpush3.bf16.msra.mxu0 %v6128_v6  ;;  %5519 = vmatpush3.bf16.msra.mxu1 %v6128_v6  ;;  %v4547_v12 = vld [vmem:[%s6686_s26 + $0x1] sm:$0xff]  ;;  %v4563_v49 = vld [vmem:[%s6686_s26 + $0xc] sm:$0xff]  ;;  %v4550_v32 = vld [vmem:[%s6686_s26 + $0x19] sm:$0xff] }
 0x14c   : >> { %5380 = vmatprep.subr.bf16.mxu0 %v6394_v42  ;;  %5520 = vmatprep.subr.bf16.mxu1 %v6394_v42  ;;  %v5944_v48 = vpack.i.bf16 %v4548_v44, %v4547_v12  ;;  %v4557_v51 = vld [vmem:[%s6686_s26 + $0x3] sm:$0xff]  ;;  %v4558_v52 = vld [vmem:[%s6686_s26 + $0xb] sm:$0xff]  ;;  %v5959_v53 = vpack.i.bf16 %v4563_v49, %v4562_v46  ;;  %v4555_v56 = vld [vmem:[%s6686_s26 + $0x1a] sm:$0xff]  ;;  %v5964_v61 = vpack.i.bf16 %v4550_v32, %v4549_v58 }
 0x14d   : >> { %5890 = vrot.lane.b32.xlu1 %v5889_v14, %s6396_s29  ;;  %v5954_v55 = vpack.i.bf16 %v4558_v52, %v4557_v51  ;;  %v5969_v59 = vpack.i.bf16 %v4555_v56, %v4554_v54  ;;  %v4559_v60 = vld [vmem:[%s6686_s26 + $0x13] sm:$0xff]  ;;  %v4565_v63 = vld [vmem:[%s6686_s26 + $0x1c] sm:$0xff]  ;;  %v4716_v18 = vld [vmem:[%s6686_s26 + $0x86] sm:$0xff] }
 0x14e   : >> { %5885 = vrot.lane.b32.xlu0 %v5884_v15, %s6396_s29  ;;  %v4560_v13 = vld [vmem:[%s6686_s26 + $0x1b] sm:$0xff]  ;;  %v5979_v14 = vpack.i.bf16 %v4565_v63, %v4564_v62  ;;  %v4709_v19 = vld [vmem:[%s6686_s26 + $0x85] sm:$0xff]  ;;  %v4710_v28 = vld [vmem:[%s6686_s26 + $0x8d] sm:$0xff] }
 0x14f   : >> { %5381 = vmatpush3.bf16.msra.mxu0 %v6129_v11  ;;  %5521 = vmatpush3.bf16.msra.mxu1 %v6129_v11  ;;  %v5974_v15 = vpack.i.bf16 %v4560_v13, %v4559_v60  ;;  %v4551_v16 = vld [vmem:[%s6686_s26 + $0x21] sm:$0xff]  ;;  %v4717_v29 = vld [vmem:[%s6686_s26 + $0x8e] sm:$0xff]  ;;  %v4718_v30 = vld [vmem:[%s6686_s26 + $0x96] sm:$0xff] }
 0x150   : >> { %5382 = vmatprep.subr.bf16.mxu0 %v6394_v42  ;;  %5522 = vmatprep.subr.bf16.mxu1 %v6394_v42  ;;  %v4556_v17 = vld [vmem:[%s6686_s26 + $0x22] sm:$0xff]  ;;  %v5984_v22 = vpack.i.bf16 %v4709_v19, %v4551_v16  ;;  %v4711_v31 = vld [vmem:[%s6686_s26 + $0x95] sm:$0xff]  ;;  %v4780_v58 = vld [vmem:[%s6686_s26 + $0xca] sm:$0xff] }
 0x151   : >> { %5900 = vrot.lane.b32.xlu1 %v5899_v20, %s6395_s28  ;;  %v5989_v20 = vpack.i.bf16 %v4716_v18, %v4556_v17  ;;  %v4730_v23 = vld [vmem:[%s6686_s26 + $0x88] sm:$0xff]  ;;  %v4725_v35 = vld [vmem:[%s6686_s26 + $0x97] sm:$0xff]  ;;  %v6004_v37 = vpack.i.bf16 %v4711_v31, %v4710_v28  ;;  %v4733_v6 = vld [vmem:[%s6686_s26 + $0xa0] sm:$0xff] }
 0x152   : >> { %5895 = vrot.lane.b32.xlu0 %v5894_v21, %s6395_s28  ;;  %v4566_v21 = vld [vmem:[%s6686_s26 + $0x24] sm:$0xff]  ;;  %v4731_v36 = vld [vmem:[%s6686_s26 + $0x90] sm:$0xff]  ;;  %v4732_v38 = vld [vmem:[%s6686_s26 + $0x98] sm:$0xff] }
 0x153   : >> { %5383 = vmatpush3.bf16.msra.mxu0 %v6130_v47  ;;  %5523 = vmatpush3.bf16.msra.mxu1 %v6130_v47  ;;  %v4561_v24 = vld [vmem:[%s6686_s26 + $0x23] sm:$0xff]  ;;  %v4778_v46 = vld [vmem:[%s6686_s26 + $0xba] sm:$0xff]  ;;  %v4770_v47 = vld [vmem:[%s6686_s26 + $0xb1] sm:$0xff] }
 0x154   : >> { %5384 = vmatprep.subr.bf16.mxu0 %v6394_v42  ;;  %5524 = vmatprep.subr.bf16.mxu1 %v6394_v42  ;;  %v4723_v25 = vld [vmem:[%s6686_s26 + $0x87] sm:$0xff]  ;;  %v4712_v41 = vld [vmem:[%s6686_s26 + $0x9d] sm:$0xff]  ;;  %v4791_v51 = vld [vmem:[%s6686_s26 + $0xb4] sm:$0xff] }
 0x155   : >> { %5910 = vrot.lane.b32.xlu1 %v5909_v26, %s6398_s12  ;;  %v5999_v26 = vpack.i.bf16 %v4730_v23, %v4566_v21  ;;  %v4720_v43 = vld [vmem:[%s6686_s26 + $0xa6] sm:$0xff]  ;;  %v4792_v52 = vld [vmem:[%s6686_s26 + $0xbc] sm:$0xff]  ;;  %v4781_v17 = vld [vmem:[%s6686_s26 + $0xd2] sm:$0xff] }
 0x156   : >> { %5905 = vrot.lane.b32.xlu0 %v5904_v27, %s6398_s12  ;;  %v5994_v27 = vpack.i.bf16 %v4723_v25, %v4561_v24  ;;  %v4713_v1 = vld [vmem:[%s6686_s26 + $0xa5] sm:$0xff]  ;;  %v4785_v54 = vld [vmem:[%s6686_s26 + $0xbb] sm:$0xff]  ;;  %v4774_v19 = vld [vmem:[%s6686_s26 + $0xd1] sm:$0xff] }
 0x157   : >> { %5385 = vmatpush3.bf16.msra.mxu0 %v1203_v57  ;;  %5525 = vmatpush3.bf16.msra.mxu1 %v1203_v57  ;;  %v4727_v9 = vld [vmem:[%s6686_s26 + $0xa7] sm:$0xff]  ;;  %v6024_v10 = vpack.i.bf16 %v4713_v1, %v4712_v41  ;;  %v4852_v18 = vld [vmem:[%s6686_s26 + $0xde] sm:$0xff]  ;;  %v4795_v23 = vld [vmem:[%s6686_s26 + $0xd4] sm:$0xff] }
 0x158   : >> { %5398 = vmatprep.subr.bf16.mxu0 %v6394_v42  ;;  %5538 = vmatprep.subr.bf16.mxu1 %v6394_v42  ;;  %v4734_v11 = vld [vmem:[%s6686_s26 + $0xa8] sm:$0xff]  ;;  %v6089_v21 = vpack.i.bf16 %v4852_v18, %v4781_v17  ;;  %v4866_v24 = vld [vmem:[%s6686_s26 + $0xe0] sm:$0xff]  ;;  %v4788_v25 = vld [vmem:[%s6686_s26 + $0xd3] sm:$0xff] }
 0x159   : >> { %5920 = vrot.lane.b32.xlu1 %v5919_v33, %s6399_s15  ;;  %v6009_v33 = vpack.i.bf16 %v4718_v30, %v4717_v29  ;;  %v6039_v12 = vpack.i.bf16 %v4734_v11, %v4733_v6  ;;  %v4779_v57 = vld [vmem:[%s6686_s26 + $0xc2] sm:$0xff]  ;;  %v4794_v63 = vld [vmem:[%s6686_s26 + $0xcc] sm:$0xff]  ;;  %v4848_v41 = vld [vmem:[%s6686_s26 + $0xf5] sm:$0xff] }
 0x15a   : >> { %5915 = vrot.lane.b32.xlu0 %v5914_v34, %s6399_s15  ;;  %v4724_v34 = vld [vmem:[%s6686_s26 + $0x8f] sm:$0xff]  ;;  %v4772_v32 = vld [vmem:[%s6686_s26 + $0xc1] sm:$0xff]  ;;  %v6069_v60 = vpack.i.bf16 %v4780_v58, %v4779_v57 }
 0x15b   : >> { %v6014_v0 = vpack.i.bf16 %v4725_v35, %v4724_v34  ;;  %v4793_v62 = vld [vmem:[%s6686_s26 + $0xc4] sm:$0xff]  ;;  %v4854_v30 = vld [vmem:[%s6686_s26 + $0xee] sm:$0xff] }
 0x15c   : >> { %v4786_v13 = vld [vmem:[%s6686_s26 + $0xc3] sm:$0xff] }
 0x15d   : >> { %5930 = vrot.lane.b32.xlu1 %v5929_v39, %s6395_s28  ;;  %v4719_v39 = vld [vmem:[%s6686_s26 + $0x9e] sm:$0xff]  ;;  %v4853_v29 = vld [vmem:[%s6686_s26 + $0xe6] sm:$0xff] }
 0x15e   : >> { %5925 = vrot.lane.b32.xlu0 %v5924_v40, %s6396_s29  ;;  %v6019_v40 = vpack.i.bf16 %v4732_v38, %v4731_v36  ;;  %v4846_v31 = vld [vmem:[%s6686_s26 + $0xe5] sm:$0xff]  ;;  %v6109_v34 = vpack.i.bf16 %v4854_v30, %v4853_v29  ;;  %v4855_v38 = vld [vmem:[%s6686_s26 + $0xf6] sm:$0xff] }
 0x15f   : >> { %v4867_v36 = vld [vmem:[%s6686_s26 + $0xe8] sm:$0xff]  ;;  %v4849_v11 = vld [vmem:[%s6686_s26 + $0xfd] sm:$0xff] }
 0x161   : >> { %5940 = vrot.lane.b32.xlu1 %v5939_v7, %s6399_s15  ;;  %v6029_v7 = vpack.i.bf16 %v4720_v43, %v4719_v39  ;;  %v4868_v39 = vld [vmem:[%s6686_s26 + $0xf0] sm:$0xff] }
 0x162   : >> { %5935 = vrot.lane.b32.xlu0 %v5934_v8, %s6398_s12  ;;  %v4726_v8 = vld [vmem:[%s6686_s26 + $0x9f] sm:$0xff]  ;;  %v4861_v43 = vld [vmem:[%s6686_s26 + $0xef] sm:$0xff] }
 0x163   : >> { %v6034_v44 = vpack.i.bf16 %v4727_v9, %v4726_v8  ;;  %v4856_v9 = vld [vmem:[%s6686_s26 + $0xfe] sm:$0xff] }
 0x165   : >> { %5950 = vrot.lane.b32.xlu1 %v5949_v45, %s6395_s28  ;;  %v4777_v45 = vld [vmem:[%s6686_s26 + $0xb2] sm:$0xff] }
 0x166   : >> { %5945 = vrot.lane.b32.xlu0 %v5944_v48, %s6396_s29  ;;  %v4771_v48 = vld [vmem:[%s6686_s26 + $0xb9] sm:$0xff]  ;;  %v6049_v49 = vpack.i.bf16 %v4778_v46, %v4777_v45  ;;  %v4569_v46 = vld [vmem:[%s6686_s26 + $0x2c] sm:$0xff] }
 0x167   : >> { %v6044_v50 = vpack.i.bf16 %v4771_v48, %v4770_v47  ;;  %v4570_v47 = vld [vmem:[%s6686_s26 + $0x34] sm:$0xff] }
 0x169   : >> { %5960 = vrot.lane.b32.xlu1 %v5959_v53, %s6399_s15  ;;  %v4784_v53 = vld [vmem:[%s6686_s26 + $0xb3] sm:$0xff] }
 0x16a   : >> { %5955 = vrot.lane.b32.xlu0 %v5954_v55, %s6398_s12  ;;  %v6059_v55 = vpack.i.bf16 %v4792_v52, %v4791_v51  ;;  %v6054_v56 = vpack.i.bf16 %v4785_v54, %v4784_v53  ;;  %v4642_v51 = vld [vmem:[%s6686_s26 + $0x60] sm:$0xff] }
 0x16b   : >> { %v4870_v52 = vld [vmem:[%s6686_s26 + $0x100] sm:$0xff] }
 0x16d   : >> { %5970 = vrot.lane.b32.xlu1 %v5969_v59, %s6395_s28  ;;  %v4773_v59 = vld [vmem:[%s6686_s26 + $0xc9] sm:$0xff] }
 0x16e   : >> { %5965 = vrot.lane.b32.xlu0 %v5964_v61, %s6396_s29  ;;  %v6064_v61 = vpack.i.bf16 %v4773_v59, %v4772_v32 }
 0x171   : >> { %5980 = vrot.lane.b32.xlu1 %v5979_v14, %s6399_s15  ;;  %v4787_v14 = vld [vmem:[%s6686_s26 + $0xcb] sm:$0xff] }
 0x172   : >> { %5975 = vrot.lane.b32.xlu0 %v5974_v15, %s6398_s12  ;;  %v6079_v15 = vpack.i.bf16 %v4794_v63, %v4793_v62  ;;  %v6074_v16 = vpack.i.bf16 %v4787_v14, %v4786_v13 }
 0x175   : >> { %5990 = vrot.lane.b32.xlu1 %v5989_v20, %s6395_s28  ;;  %v4845_v20 = vld [vmem:[%s6686_s26 + $0xdd] sm:$0xff] }
 0x176   : >> { %5985 = vrot.lane.b32.xlu0 %v5984_v22, %s6396_s29  ;;  %v6084_v22 = vpack.i.bf16 %v4845_v20, %v4774_v19 }
 0x179   : >> { %6000 = vrot.lane.b32.xlu1 %v5999_v26, %s6399_s15  ;;  %v4859_v26 = vld [vmem:[%s6686_s26 + $0xdf] sm:$0xff] }
 0x17a   : >> { %5995 = vrot.lane.b32.xlu0 %v5994_v27, %s6398_s12  ;;  %v6099_v27 = vpack.i.bf16 %v4866_v24, %v4795_v23  ;;  %v6094_v28 = vpack.i.bf16 %v4859_v26, %v4788_v25 }
 0x17d   : >> { %6010 = vrot.lane.b32.xlu1 %v6009_v33, %s6395_s28  ;;  %v4847_v33 = vld [vmem:[%s6686_s26 + $0xed] sm:$0xff] }
 0x17e   : >> { %6005 = vrot.lane.b32.xlu0 %v6004_v37, %s6396_s29  ;;  %v6104_v35 = vpack.i.bf16 %v4847_v33, %v4846_v31  ;;  %v4860_v37 = vld [vmem:[%s6686_s26 + $0xe7] sm:$0xff] }
 0x17f   : >> { %v6132_v33 = vld [vmem:[%s8056_s4] sm:$0xff]  }
 0x181   : >> { %6020 = vrot.lane.b32.xlu1 %v6019_v40, %s6399_s15  ;;  %v4869_v40 = vld [vmem:[%s6686_s26 + $0xf8] sm:$0xff] }
 0x182   : >> { %6015 = vrot.lane.b32.xlu0 %v6014_v0, %s6398_s12  ;;  %v4862_v0 = vld [vmem:[%s6686_s26 + $0xf7] sm:$0xff]  ;;  %v6119_v1 = vpack.i.bf16 %v4869_v40, %v4868_v39  ;;  %v6133_v40 = vld [vmem:[%s8056_s4 + $0x8] sm:$0xff]  }
 0x183   : >> { %v6114_v6 = vpack.i.bf16 %v4862_v0, %v4861_v43 }
 0x185   : >> { %6030 = vrot.lane.b32.xlu1 %v6029_v7, %s6395_s28 }
 0x186   : >> { %6025 = vrot.lane.b32.xlu0 %v6024_v10, %s6396_s29 }
 0x189   : >> { %6040 = vrot.lane.b32.xlu1 %v6039_v12, %s6399_s15 }
 0x18a   : >> { %6035 = vrot.lane.b32.xlu0 %v6034_v44, %s6398_s12 }
 0x18d   : >> { %6050 = vrot.lane.b32.xlu1 %v6049_v49, %s6395_s28 }
 0x18e   : >> { %6045 = vrot.lane.b32.xlu0 %v6044_v50, %s6396_s29  ;;  %v4641_v50 = vld [vmem:[%s6686_s26 + $0x58] sm:$0xff] }
 0x191   : >> { %6060 = vrot.lane.b32.xlu1 %v6059_v55, %s6399_s15 }
 0x192   : >> { %6055 = vrot.lane.b32.xlu0 %v6054_v56, %s6398_s12  ;;  %v4863_v56 = vld [vmem:[%s6686_s26 + $0xff] sm:$0xff] }
 0x195   : >> { %6070 = vrot.lane.b32.xlu1 %v6069_v60, %s6395_s28 }
 0x196   : >> { %6065 = vrot.lane.b32.xlu0 %v6064_v61, %s6396_s29 }
 0x199   : >> { %6080 = vrot.lane.b32.xlu1 %v6079_v15, %s6399_s15 }
 0x19a   : >> { %6075 = vrot.lane.b32.xlu0 %v6074_v16, %s6398_s12 }
 0x19d   : >> { %6090 = vrot.lane.b32.xlu1 %v6089_v21, %s6395_s28 }
 0x19e   : >> { %6085 = vrot.lane.b32.xlu0 %v6084_v22, %s6396_s29 }
 0x1a1   : >> { %6100 = vrot.lane.b32.xlu1 %v6099_v27, %s6399_s15 }
 0x1a2   : >> { %6095 = vrot.lane.b32.xlu0 %v6094_v28, %s6398_s12 }
 0x1a5   : >> { %6110 = vrot.lane.b32.xlu1 %v6109_v34, %s6395_s28 }
 0x1a6   : >> { %6105 = vrot.lane.b32.xlu0 %v6104_v35, %s6396_s29 }
 0x1a9   : >> { %2567 = vrot.lane.b32.xlu1 %v4867_v36, %s6399_s15 }
 0x1aa   : >> { %2547 = vrot.lane.b32.xlu0 %v4860_v37, %s6398_s12 }
 0x1ad   : >> { %2531 = vrot.lane.b32.xlu1 %v4855_v38, %s6395_s28 }
 0x1ae   : >> { %2511 = vrot.lane.b32.xlu0 %v4848_v41, %s6396_s29 }
 0x1af   : >> { %v5856_v7 = vpop.permute.xlu1 %5855 }
 0x1b0   : >> { %v5846_v8 = vpop.permute.xlu0 %5845  ;;  %v5858_v53 = vunpack.i.h.bf16 %v5856_v7  ;;  %v5857_v54 = vunpack.i.l.bf16 %v5856_v7 }
 0x1b1   : >> { %6120 = vrot.lane.b32.xlu1 %v6119_v1, %s6399_s15  ;;  %v5848_v12 = vunpack.i.h.bf16 %v5846_v8  ;;  %v5847_v44 = vunpack.i.l.bf16 %v5846_v8  ;;  %v4644_v1 = vld [vmem:[%s6686_s26 + $0x70] sm:$0xff] }
 0x1b2   : >> { %6115 = vrot.lane.b32.xlu0 %v6114_v6, %s6398_s12  ;;  %v6134_v8 = vld [vmem:[%s8056_s4 + $0x10] sm:$0xff]  }
 0x1b3   : >> { %v5861_v10 = vpop.permute.xlu1 %5860  ;;  %v1107_v57 = vsel %vm777_vm5, %v4569_v46, %v5847_v44  ;;  %v1108_v58 = vsel %vm777_vm5, %v4570_v47, %v5848_v12  ;;  %v4572_v46 = vld [vmem:[%s6686_s26 + $0x44] sm:$0xff] }
 0x1b4   : >> { %v5851_v45 = vpop.permute.xlu0 %5850  ;;  %v5863_v32 = vunpack.i.h.bf16 %v5861_v10  ;;  %v5862_v59 = vunpack.i.l.bf16 %v5861_v10  ;;  %v1112_v16 = vsel %vm955_vm14, %v1107_v57, %v5857_v54  ;;  %v1113_v17 = vsel %vm955_vm14, %v1108_v58, %v5858_v53  ;;  %v6135_v57 = vld [vmem:[%s8056_s4 + $0x18] sm:$0xff]  }
 0x1b5   : >> { %v5853_v48 = vunpack.i.h.bf16 %v5851_v45  ;;  %v5852_v49 = vunpack.i.l.bf16 %v5851_v45  ;;  %2533 = vrot.lane.b32.xlu1 %v4856_v9, %s6395_s28  ;;  %v4643_v9 = vld [vmem:[%s6686_s26 + $0x68] sm:$0xff] }
 0x1b6   : >> { %2513 = vrot.lane.b32.xlu0 %v4849_v11, %s6396_s29  ;;  %v4571_v11 = vld [vmem:[%s6686_s26 + $0x3c] sm:$0xff] }
 0x1b7   : >> { %v5871_v55 = vpop.permute.xlu1 %5870  ;;  %v1491_v61 = vsel %vm777_vm5, %v4642_v51, %v5853_v48  ;;  %v1490_v62 = vsel %vm777_vm5, %v4641_v50, %v5852_v49 }
 0x1b8   : >> { %v5866_v60 = vpop.permute.xlu0 %5865  ;;  %v5873_v63 = vunpack.i.h.bf16 %v5871_v55  ;;  %v5872_v13 = vunpack.i.l.bf16 %v5871_v55  ;;  %v1496_v19 = vsel %vm955_vm14, %v1491_v61, %v5863_v32  ;;  %v1495_v20 = vsel %vm955_vm14, %v1490_v62, %v5862_v59 }
 0x1b9   : >> { %2573 = vrot.lane.b32.xlu1 %v4870_v52, %s6399_s15  ;;  %v5868_v14 = vunpack.i.h.bf16 %v5866_v60  ;;  %v5867_v15 = vunpack.i.l.bf16 %v5866_v60 }
 0x1ba   : >> { %2553 = vrot.lane.b32.xlu0 %v4863_v56, %s6398_s12  ;;  %v1500_v24 = vsel %vm961_vm15, %v1495_v20, %v5872_v13  ;;  %v1501_v25 = vsel %vm961_vm15, %v1496_v19, %v5873_v63 }
 0x1bb   : >> { %v5881_v18 = vpop.permute.xlu1 %5880  ;;  %v1117_v28 = vsel %vm961_vm15, %v1112_v16, %v5867_v15  ;;  %v1118_v29 = vsel %vm961_vm15, %v1113_v17, %v5868_v14 }
 0x1bc   : >> { %v5883_v21 = vunpack.i.h.bf16 %v5881_v18  ;;  %v5882_v22 = vunpack.i.l.bf16 %v5881_v18  ;;  %v5876_v23 = vpop.permute.xlu0 %5875 }
 0x1bd   : >> { %v5878_v26 = vunpack.i.h.bf16 %v5876_v23  ;;  %v5877_v27 = vunpack.i.l.bf16 %v5876_v23  ;;  %v6136_v23 = vld [vmem:[%s8056_s4 + $0x20] sm:$0xff]  }
 0x1be   : >> { %v1505_v30 = vsel %vm967_vm0, %v1500_v24, %v5882_v22  ;;  %v1506_v31 = vsel %vm967_vm0, %v1501_v25, %v5883_v21 }
 0x1bf   : >> { %v6930_v34 = vpack.c.bf16 %v1506_v31, %v1505_v30  ;;  %v1122_v35 = vsel %vm967_vm0, %v1117_v28, %v5877_v27  ;;  %v1123_v36 = vsel %vm967_vm0, %v1118_v29, %v5878_v26  ;;  %v5891_v37 = vpop.permute.xlu1 %5890  ;;  %v4645_v29 = vld [vmem:[%s6686_s26 + $0x78] sm:$0xff]  ;;  %v4573_v31 = vld [vmem:[%s6686_s26 + $0x4c] sm:$0xff] }
 0x1c0   : >> { %v6934_v38 = vpack.c.bf16 %v1123_v36, %v1122_v35  ;;  %v5886_v39 = vpop.permute.xlu0 %5885  ;;  %v5893_v0 = vunpack.i.h.bf16 %v5891_v37  ;;  %v5892_v6 = vunpack.i.l.bf16 %v5891_v37 }
 0x1c1   : >> { %5527 = vmatmul.mubr.msk.bf16.vlgmr.msra.gmra.mrb[0].mxu1 %vm1191_vm1, %v6930_v34  ;;  %v5887_v7 = vunpack.i.l.bf16 %v5886_v39  ;;  %v5888_v10 = vunpack.i.h.bf16 %v5886_v39  ;;  %v6137_v39 = vld [vmem:[%s8056_s4 + $0x28] sm:$0xff]  }
 0x1c2   : >> { %5387 = vmatmul.mubr.msk.bf16.vlgmr.msra.gmra.mrb[0].mxu0 %vm1191_vm1, %v6934_v38  ;;  %5539 = vmatpush3.bf16.msra.mxu1 %v6132_v33  ;;  %v1493_v50 = vsel %vm777_vm5, %v4644_v1, %v5893_v0  ;;  %v1492_v53 = vsel %vm777_vm5, %v4643_v9, %v5892_v6 }
 0x1c3   : >> { %5399 = vmatpush3.bf16.msra.mxu0 %v6132_v33  ;;  %v5901_v41 = vpop.permute.xlu1 %5900  ;;  %5540 = vmatprep.subr.bf16.mxu1 %v6394_v42  ;;  %v1109_v54 = vsel %vm777_vm5, %v4571_v11, %v5887_v7  ;;  %v1110_v58 = vsel %vm777_vm5, %v4572_v46, %v5888_v10  ;;  %v6138_v11 = vld [vmem:[%s8056_s4 + $0x30] sm:$0xff]   ;;  %v6139_v46 = vld [vmem:[%s8056_s4 + $0x38] ss:$0 sps:$4 sm:$0xff]  }
 0x1c4   : >> { %v5896_v43 = vpop.permute.xlu0 %5895  ;;  %5400 = vmatprep.subr.bf16.mxu0 %v6394_v42  ;;  %5390 = vmatprep.mubr.msk.bf16.mxu0 %vm6397_vm12, %v6394_v42  ;;  %v5903_v12 = vunpack.i.h.bf16 %v5901_v41  ;;  %v5902_v44 = vunpack.i.l.bf16 %v5901_v41 }
 0x1c5   : >> { %5530 = vmatprep.mubr.msk.bf16.mxu1 %vm6397_vm12, %v6394_v42  ;;  %v5898_v47 = vunpack.i.h.bf16 %v5896_v43  ;;  %v5897_v48 = vunpack.i.l.bf16 %v5896_v43 }
 0x1c6   : >> { %5541 = vmatpush3.bf16.msra.mxu1 %v6133_v40  ;;  %v1497_v32 = vsel %vm955_vm14, %v1492_v53, %v5902_v44  ;;  %v1498_v59 = vsel %vm955_vm14, %v1493_v50, %v5903_v12  ;;  %v836_v50 = vld [vmem:[%s6686_s26] sm:$0xff] }
 0x1c7   : >> { %5401 = vmatpush3.bf16.msra.mxu0 %v6133_v40  ;;  %v5911_v45 = vpop.permute.xlu1 %5910  ;;  %5542 = vmatprep.subr.bf16.mxu1 %v6394_v42  ;;  %v1114_v61 = vsel %vm955_vm14, %v1109_v54, %v5897_v48  ;;  %v1115_v62 = vsel %vm955_vm14, %v1110_v58, %v5898_v47 }
 0x1c8   : >> { %v5906_v49 = vpop.permute.xlu0 %5905  ;;  %5402 = vmatprep.subr.bf16.mxu0 %v6394_v42  ;;  %v5913_v51 = vunpack.i.h.bf16 %v5911_v45  ;;  %v5912_v52 = vunpack.i.l.bf16 %v5911_v45 }
 0x1c9   : >> { %v5908_v55 = vunpack.i.h.bf16 %v5906_v49  ;;  %v5907_v56 = vunpack.i.l.bf16 %v5906_v49 }
 0x1ca   : >> { %5543 = vmatpush3.bf16.msra.mxu1 %v6134_v8  ;;  %v1502_v15 = vsel %vm961_vm15, %v1497_v32, %v5912_v52  ;;  %v1503_v16 = vsel %vm961_vm15, %v1498_v59, %v5913_v51  ;;  %v837_v51 = vld [vmem:[%s6686_s26 + $0x8] sm:$0xff] }
 0x1cb   : >> { %5403 = vmatpush3.bf16.msra.mxu0 %v6134_v8  ;;  %v5921_v60 = vpop.permute.xlu1 %5920  ;;  %5544 = vmatprep.subr.bf16.mxu1 %v6394_v42  ;;  %v1119_v19 = vsel %vm961_vm15, %v1114_v61, %v5907_v56  ;;  %v1120_v20 = vsel %vm961_vm15, %v1115_v62, %v5908_v55 }
 0x1cc   : >> { %v5923_v63 = vunpack.i.h.bf16 %v5921_v60  ;;  %v5922_v13 = vunpack.i.l.bf16 %v5921_v60  ;;  %v5916_v14 = vpop.permute.xlu0 %5915  ;;  %5404 = vmatprep.subr.bf16.mxu0 %v6394_v42  ;;  %v1316_v60 = vsel %vm1201_vm13, %v6139_v46, 0  ;;  %v6142_v46 = vld [vmem:[%s8056_s4 + $0x88] sm:$0xff]  }
 0x1cd   : >> { %v5918_v17 = vunpack.i.h.bf16 %v5916_v14  ;;  %v5917_v18 = vunpack.i.l.bf16 %v5916_v14 }
 0x1ce   : >> { %v1507_v21 = vsel %vm967_vm0, %v1502_v15, %v5922_v13  ;;  %v1508_v22 = vsel %vm967_vm0, %v1503_v16, %v5923_v63  ;;  %5545 = vmatpush3.bf16.msra.mxu1 %v6135_v57 }
 0x1cf   : >> { %v6980_v24 = vpack.c.bf16 %v1508_v22, %v1507_v21  ;;  %v1124_v25 = vsel %vm967_vm0, %v1119_v19, %v5917_v18  ;;  %v1125_v26 = vsel %vm967_vm0, %v1120_v20, %v5918_v17  ;;  %5405 = vmatpush3.bf16.msra.mxu0 %v6135_v57  ;;  %v5931_v27 = vpop.permute.xlu1 %5930  ;;  %5546 = vmatprep.subr.bf16.mxu1 %v6394_v42 }
 0x1d0   : >> { %v6985_v28 = vpack.c.bf16 %v1125_v26, %v1124_v25  ;;  %v5926_v30 = vpop.permute.xlu0 %5925  ;;  %5406 = vmatprep.subr.bf16.mxu0 %v6394_v42  ;;  %v5933_v36 = vunpack.i.h.bf16 %v5931_v27  ;;  %v5932_v37 = vunpack.i.l.bf16 %v5931_v27  ;;  %v839_v25 = vld [vmem:[%s6686_s26 + $0x18] sm:$0xff] }
 0x1d1   : >> { %v5928_v33 = vunpack.i.h.bf16 %v5926_v30  ;;  %v5927_v35 = vunpack.i.l.bf16 %v5926_v30  ;;  %5531 = vmatmul.mubr.msk.bf16.gmra.mrb[4].mxu1 %vm1191_vm1, %v6980_v24 }
 0x1d2   : >> { %5391 = vmatmul.mubr.msk.bf16.gmra.mrb[4].mxu0 %vm1191_vm1, %v6985_v28  ;;  %5547 = vmatpush3.bf16.msra.mxu1 %v6136_v23 }
 0x1d3   : >> { %v1494_v40 = vsel %vm777_vm5, %v4645_v29, %v5928_v33  ;;  %v1111_v41 = vsel %vm777_vm5, %v4573_v31, %v5927_v35  ;;  %5407 = vmatpush3.bf16.msra.mxu0 %v6136_v23  ;;  %v5941_v43 = vpop.permute.xlu1 %5940  ;;  %5548 = vmatprep.subr.bf16.mxu1 %v6394_v42  ;;  %v838_v23 = vld [vmem:[%s6686_s26 + $0x10] sm:$0xff]  ;;  %v6140_v29 = vld [vmem:[%s8056_s4 + $0x78] sm:$0xff]  }
 0x1d4   : >> { %v5936_v0 = vpop.permute.xlu0 %5935  ;;  %v5943_v1 = vunpack.i.h.bf16 %v5941_v43  ;;  %v5942_v6 = vunpack.i.l.bf16 %v5941_v43  ;;  %5408 = vmatprep.subr.bf16.mxu0 %v6394_v42  ;;  %5394 = vmatprep.mubr.msk.bf16.mxu0 %vm6397_vm12, %v6394_v42  ;;  %v1116_v9 = vsel %vm955_vm14, %v1111_v41, %v5932_v37  ;;  %v1499_v10 = vsel %vm955_vm14, %v1494_v40, %v5933_v36 }
 0x1d5   : >> { %v5938_v7 = vunpack.i.h.bf16 %v5936_v0  ;;  %v5937_v8 = vunpack.i.l.bf16 %v5936_v0  ;;  %5534 = vmatprep.mubr.msk.bf16.mxu1 %vm6397_vm12, %v6394_v42 }
 0x1d6   : >> { %5549 = vmatpush3.bf16.msra.mxu1 %v6137_v39 }
 0x1d7   : >> { %v1121_v12 = vsel %vm961_vm15, %v1116_v9, %v5937_v8  ;;  %v1504_v44 = vsel %vm961_vm15, %v1499_v10, %v5938_v7  ;;  %5409 = vmatpush3.bf16.msra.mxu0 %v6137_v39  ;;  %v5951_v45 = vpop.permute.xlu1 %5950  ;;  %5550 = vmatprep.subr.bf16.mxu1 %v6394_v42 }
 0x1d8   : >> { %v1126_v47 = vsel %vm967_vm0, %v1121_v12, %v5942_v6  ;;  %v1509_v48 = vsel %vm967_vm0, %v1504_v44, %v5943_v1  ;;  %v5946_v49 = vpop.permute.xlu0 %5945  ;;  %5410 = vmatprep.subr.bf16.mxu0 %v6394_v42  ;;  %v5953_v56 = vunpack.i.h.bf16 %v5951_v45  ;;  %v5952_v57 = vunpack.i.l.bf16 %v5951_v45  ;;  %v6141_v1 = vld [vmem:[%s8056_s4 + $0x80] sm:$0xff]  }
 0x1d9   : >> { %v7021_v52 = vpack.c.bf16 %v1126_v47, %v1126_v47  ;;  %v7023_v53 = vpack.c.bf16 %v1509_v48, %v1509_v48  ;;  %v5948_v54 = vunpack.i.h.bf16 %v5946_v49  ;;  %v5947_v55 = vunpack.i.l.bf16 %v5946_v49  ;;  %v840_v44 = vld [vmem:[%s6686_s26 + $0x20] sm:$0xff] }
 0x1da   : >> { %5551 = vmatpush3.bf16.msra.mxu1 %v6138_v11 }
 0x1db   : >> { %v950_v58 = vsel %vm777_vm5, %v836_v50, %v5947_v55  ;;  %v951_v32 = vsel %vm777_vm5, %v837_v51, %v5948_v54  ;;  %5395 = vmatmul.mubr.msk.bf16.gmra.mrb[8].mxu0 %vm1191_vm1, %v7021_v52  ;;  %5535 = vmatmul.mubr.msk.bf16.gmra.mrb[8].mxu1 %vm1191_vm1, %v7023_v53  ;;  %v5961_v59 = vpop.permute.xlu1 %5960 }
 0x1dc   : >> { %5411 = vmatpush3.bf16.msra.mxu0 %v6138_v11  ;;  %v5956_v61 = vpop.permute.xlu0 %5955  ;;  %v5963_v62 = vunpack.i.h.bf16 %v5961_v59  ;;  %v5962_v63 = vunpack.i.l.bf16 %v5961_v59  ;;  %5552 = vmatprep.subr.bf16.mxu1 %v6394_v42  ;;  %v956_v15 = vsel %vm955_vm14, %v950_v58, %v5952_v57  ;;  %v957_v16 = vsel %vm955_vm14, %v951_v32, %v5953_v56  ;;  %v6143_v56 = vld [vmem:[%s8056_s4 + $0x90] sm:$0xff]  }
 0x1dd   : >> { %v5958_v13 = vunpack.i.h.bf16 %v5956_v61  ;;  %v5957_v14 = vunpack.i.l.bf16 %v5956_v61  ;;  %5412 = vmatprep.subr.bf16.mxu0 %v6394_v42  ;;  %5414 = vmatprep.mubr.msk.bf16.mxu0 %vm6397_vm12, %v6394_v42 }
 0x1de   : >> { %5553 = vmatpush3.bf16.msra.mxu1 %v1316_v60  ;;  %5554 = vmatprep.mubr.msk.bf16.mxu1 %vm6397_vm12, %v6394_v42 }
 0x1df   : >> { %v962_v17 = vsel %vm961_vm15, %v956_v15, %v5957_v14  ;;  %v963_v18 = vsel %vm961_vm15, %v957_v16, %v5958_v13  ;;  %v5971_v19 = vpop.permute.xlu1 %5970  ;;  %5566 = vmatprep.subr.bf16.mxu1 %v6394_v42  ;;  %v4702_v15 = vld [vmem:[%s6686_s26 + $0x84] sm:$0xff] }
 0x1e0   : >> { %v968_v20 = vsel %vm967_vm0, %v962_v17, %v5962_v63  ;;  %v969_v21 = vsel %vm967_vm0, %v963_v18, %v5963_v62  ;;  %5413 = vmatpush3.bf16.msra.mxu0 %v1316_v60  ;;  %v5966_v22 = vpop.permute.xlu0 %5965  ;;  %v5973_v26 = vunpack.i.h.bf16 %v5971_v19  ;;  %v5972_v27 = vunpack.i.l.bf16 %v5971_v19  ;;  %v6144_v60 = vld [vmem:[%s8056_s4 + $0x98] sm:$0xff]   ;;  %v4703_v63 = vld [vmem:[%s6686_s26 + $0x8c] sm:$0xff]  ;;  %v6145_v18 = vld [vmem:[%s8056_s4 + $0xa0] sm:$0xff]  }
 0x1e1   : >> { %v973_v30 = vpack.c.bf16 %v969_v21, %v968_v20  ;;  %v5968_v31 = vunpack.i.h.bf16 %v5966_v22  ;;  %v5967_v33 = vunpack.i.l.bf16 %v5966_v22  ;;  %5426 = vmatprep.subr.bf16.mxu0 %v6394_v42 }
 0x1e3   : >> { %v952_v35 = vsel %vm777_vm5, %v838_v23, %v5967_v33  ;;  %v953_v36 = vsel %vm777_vm5, %v839_v25, %v5968_v31  ;;  %5415 = vmatmul.mubr.msk.bf16.vlgmr.msra.gmra.mrb[0].mxu0 %vm1191_vm1, %v973_v30  ;;  %5555 = vmatmul.mubr.msk.bf16.vlgmr.msra.gmra.mrb[0].mxu1 %vm1191_vm1, %v6934_v38  ;;  %v5981_v37 = vpop.permute.xlu1 %5980  ;;  %v6146_v25 = vld [vmem:[%s8056_s4 + $0xa8] sm:$0xff]   ;;  %v6147_v30 = vld [vmem:[%s8056_s4 + $0xb0] ss:$0 sps:$4 sm:$0xff]  }
 0x1e4   : >> { %v958_v39 = vsel %vm955_vm14, %v952_v35, %v5972_v27  ;;  %v959_v40 = vsel %vm955_vm14, %v953_v36, %v5973_v26  ;;  %5427 = vmatpush3.bf16.msra.mxu0 %v6140_v29  ;;  %5567 = vmatpush3.bf16.msra.mxu1 %v6140_v29  ;;  %v5976_v41 = vpop.permute.xlu0 %5975  ;;  %v5983_v43 = vunpack.i.h.bf16 %v5981_v37  ;;  %v5982_v0 = vunpack.i.l.bf16 %v5981_v37  ;;  %v4705_v35 = vld [vmem:[%s6686_s26 + $0x9c] sm:$0xff] }
 0x1e5   : >> { %v5978_v6 = vunpack.i.h.bf16 %v5976_v41  ;;  %v5977_v7 = vunpack.i.l.bf16 %v5976_v41  ;;  %5428 = vmatprep.subr.bf16.mxu0 %v6394_v42  ;;  %5568 = vmatprep.subr.bf16.mxu1 %v6394_v42 }
 0x1e6   : >> { %5558 = vmatprep.mubr.msk.bf16.mxu1 %vm6397_vm12, %v6394_v42  ;;  %5418 = vmatprep.mubr.msk.bf16.mxu0 %vm6397_vm12, %v6394_v42 }
 0x1e7   : >> { %v964_v38 = vsel %vm961_vm15, %v958_v39, %v5977_v7  ;;  %v965_v8 = vsel %vm961_vm15, %v959_v40, %v5978_v6  ;;  %v7069_v9 = vpop.permute.xlu1 %5990  ;;  %v4704_v40 = vld [vmem:[%s6686_s26 + $0x94] sm:$0xff]  ;;  %v1584_v6 = vsel %vm1201_vm13, %v6147_v30, 0  ;;  %v6153_v30 = vld [vmem:[%s8056_s4 + $0xdc] sm:$0xff]  }
 0x1e8   : >> { %v970_v10 = vsel %vm967_vm0, %v964_v38, %v5982_v0  ;;  %v971_v11 = vsel %vm967_vm0, %v965_v8, %v5983_v43  ;;  %5429 = vmatpush3.bf16.msra.mxu0 %v6141_v1  ;;  %5569 = vmatpush3.bf16.msra.mxu1 %v6141_v1  ;;  %v5986_v12 = vpop.permute.xlu0 %5985  ;;  %v5992_v45 = vunpack.i.l.bf16 %v7069_v9 }
 0x1e9   : >> { %v974_v47 = vpack.c.bf16 %v971_v11, %v970_v10  ;;  %v5987_v48 = vunpack.i.l.bf16 %v5986_v12  ;;  %5430 = vmatprep.subr.bf16.mxu0 %v6394_v42  ;;  %5570 = vmatprep.subr.bf16.mxu1 %v6394_v42  ;;  %v5988_v13 = vunpack.i.h.bf16 %v5986_v12 }
 0x1eb   : >> { %v954_v49 = vsel %vm777_vm5, %v840_v44, %v5987_v48  ;;  %5559 = vmatmul.mubr.msk.bf16.gmra.mrb[4].mxu1 %vm1191_vm1, %v6985_v28  ;;  %v7083_v50 = vpop.permute.xlu1 %6000  ;;  %5419 = vmatmul.mubr.msk.bf16.gmra.mrb[4].mxu0 %vm1191_vm1, %v974_v47  ;;  %v1763_v20 = vsel %vm777_vm5, %v4702_v15, %v5988_v13  ;;  %v4706_v44 = vld [vmem:[%s6686_s26 + $0xa4] sm:$0xff] }
 0x1ec   : >> { %v960_v51 = vsel %vm955_vm14, %v954_v49, %v5992_v45  ;;  %5431 = vmatpush3.bf16.msra.mxu0 %v6142_v46  ;;  %5571 = vmatpush3.bf16.msra.mxu1 %v6142_v46  ;;  %v5996_v54 = vpop.permute.xlu0 %5995  ;;  %v6002_v55 = vunpack.i.l.bf16 %v7083_v50  ;;  %v6003_v39 = vunpack.i.h.bf16 %v7083_v50  ;;  %v6148_v46 = vld [vmem:[%s8056_s4 + $0xb4] sm:$0xff]  }
 0x1ed   : >> { %v5997_v57 = vunpack.i.l.bf16 %v5996_v54  ;;  %5432 = vmatprep.subr.bf16.mxu0 %v6394_v42  ;;  %5572 = vmatprep.subr.bf16.mxu1 %v6394_v42  ;;  %v5998_v26 = vunpack.i.h.bf16 %v5996_v54 }
 0x1ee   : >> { %5562 = vmatprep.mubr.msk.bf16.mxu1 %vm6397_vm12, %v6394_v42  ;;  %5422 = vmatprep.mubr.msk.bf16.mxu0 %vm6397_vm12, %v6394_v42 }
 0x1ef   : >> { %v966_v28 = vsel %vm961_vm15, %v960_v51, %v5997_v57  ;;  %v7098_v58 = vpop.permute.xlu1 %6010  ;;  %v6149_v57 = vld [vmem:[%s8056_s4 + $0xbc] sm:$0xff]  }
 0x1f0   : >> { %v972_v32 = vsel %vm967_vm0, %v966_v28, %v6002_v55  ;;  %5433 = vmatpush3.bf16.msra.mxu0 %v6143_v56  ;;  %5573 = vmatpush3.bf16.msra.mxu1 %v6143_v56  ;;  %v6006_v59 = vpop.permute.xlu0 %6005  ;;  %v6012_v16 = vunpack.i.l.bf16 %v7098_v58  ;;  %v6013_v7 = vunpack.i.h.bf16 %v7098_v58 }
 0x1f1   : >> { %v975_v61 = vpack.c.bf16 %v972_v32, %v972_v32  ;;  %v6007_v62 = vunpack.i.l.bf16 %v6006_v59  ;;  %5434 = vmatprep.subr.bf16.mxu0 %v6394_v42  ;;  %5574 = vmatprep.subr.bf16.mxu1 %v6394_v42  ;;  %v6008_v36 = vunpack.i.h.bf16 %v6006_v59 }
 0x1f3   : >> { %5563 = vmatmul.mubr.msk.bf16.gmra.mrb[8].mxu1 %vm1191_vm1, %v7021_v52  ;;  %v7109_v14 = vpop.permute.xlu1 %6020  ;;  %5423 = vmatmul.mubr.msk.bf16.gmra.mrb[8].mxu0 %vm1191_vm1, %v975_v61  ;;  %v1764_v19 = vsel %vm777_vm5, %v4703_v63, %v6007_v62  ;;  %v5993_v52 = vunpack.i.h.bf16 %v7069_v9  ;;  %v1765_v8 = vsel %vm777_vm5, %v4704_v40, %v6008_v36  ;;  %v6150_v62 = vld [vmem:[%s8056_s4 + $0xc4] sm:$0xff]  }
 0x1f4   : >> { %5435 = vmatpush3.bf16.msra.mxu0 %v6144_v60  ;;  %5575 = vmatpush3.bf16.msra.mxu1 %v6144_v60  ;;  %v7114_v17 = vpop.permute.xlu0 %6015  ;;  %v1769_v22 = vsel %vm955_vm14, %v1764_v19, %v6012_v16  ;;  %v6022_v33 = vunpack.i.l.bf16 %v7109_v14  ;;  %v1770_v49 = vsel %vm955_vm14, %v1765_v8, %v6013_v7  ;;  %v6023_v56 = vunpack.i.h.bf16 %v7109_v14  ;;  %v6151_v16 = vld [vmem:[%s8056_s4 + $0xcc] sm:$0xff]  }
 0x1f5   : >> { %5436 = vmatprep.subr.bf16.mxu0 %v6394_v42  ;;  %5576 = vmatprep.subr.bf16.mxu1 %v6394_v42  ;;  %v6017_v21 = vunpack.i.l.bf16 %v7114_v17  ;;  %v1768_v31 = vsel %vm955_vm14, %v1763_v20, %v5993_v52  ;;  %v6018_v47 = vunpack.i.h.bf16 %v7114_v17  ;;  %v6152_v20 = vld [vmem:[%s8056_s4 + $0xd4] sm:$0xff]   ;;  %v6155_v8 = vld [vmem:[%s8056_s4 + $0xec] ss:$0 sps:$4 sm:$0xff]  }
 0x1f6   : >> { %5442 = vmatprep.mubr.msk.bf16.mxu0 %vm6397_vm12, %v6394_v42  ;;  %5582 = vmatprep.mubr.msk.bf16.mxu1 %vm6397_vm12, %v6394_v42  ;;  %v1773_v0 = vsel %vm961_vm15, %v1768_v31, %v5998_v26 }
 0x1f7   : >> { %v6031_v29 = vpop.permute.xlu1 %6030  ;;  %v1774_v37 = vsel %vm961_vm15, %v1769_v22, %v6017_v21  ;;  %v1778_v12 = vsel %vm967_vm0, %v1773_v0, %v6003_v39  ;;  %v1775_v28 = vsel %vm961_vm15, %v1770_v49, %v6018_v47  ;;  %v4763_v21 = vld [vmem:[%s6686_s26 + $0xb0] sm:$0xff]  ;;  %v4764_v22 = vld [vmem:[%s6686_s26 + $0xb8] sm:$0xff]  ;;  %v4765_v0 = vld [vmem:[%s6686_s26 + $0xc0] sm:$0xff]  ;;  %v1857_v47 = vsel %vm1201_vm13, %v6155_v8, 0 }
 0x1f8   : >> { %5437 = vmatpush3.bf16.msra.mxu0 %v6145_v18  ;;  %5577 = vmatpush3.bf16.msra.mxu1 %v6145_v18  ;;  %v6026_v23 = vpop.permute.xlu0 %6025  ;;  %v6032_v41 = vunpack.i.l.bf16 %v6031_v29  ;;  %v1779_v38 = vsel %vm967_vm0, %v1774_v37, %v6022_v33  ;;  %v6033_v50 = vunpack.i.h.bf16 %v6031_v29  ;;  %v1780_v60 = vsel %vm967_vm0, %v1775_v28, %v6023_v56 }
 0x1f9   : >> { %v6027_v27 = vunpack.i.l.bf16 %v6026_v23  ;;  %5438 = vmatprep.subr.bf16.mxu0 %v6394_v42  ;;  %5578 = vmatprep.subr.bf16.mxu1 %v6394_v42  ;;  %v6028_v9 = vunpack.i.h.bf16 %v6026_v23  ;;  %v7159_v48 = vpack.c.bf16 %v1779_v38, %v1778_v12 }
 0x1fb   : >> { %v1766_v1 = vsel %vm777_vm5, %v4705_v35, %v6027_v27  ;;  %v6041_v11 = vpop.permute.xlu1 %6040  ;;  %v1767_v54 = vsel %vm777_vm5, %v4706_v44, %v6028_v9 }
 0x1fc   : >> { %5439 = vmatpush3.bf16.msra.mxu0 %v6146_v25  ;;  %5579 = vmatpush3.bf16.msra.mxu1 %v6146_v25  ;;  %v6036_v43 = vpop.permute.xlu0 %6035  ;;  %v1771_v45 = vsel %vm955_vm14, %v1766_v1, %v6032_v41  ;;  %v6042_v51 = vunpack.i.l.bf16 %v6041_v11  ;;  %v6043_v61 = vunpack.i.h.bf16 %v6041_v11  ;;  %v4766_v1 = vld [vmem:[%s6686_s26 + $0xc8] sm:$0xff] }
 0x1fd   : >> { %5440 = vmatprep.subr.bf16.mxu0 %v6394_v42  ;;  %5580 = vmatprep.subr.bf16.mxu1 %v6394_v42  ;;  %v6037_v10 = vunpack.i.l.bf16 %v6036_v43  ;;  %v6038_v58 = vunpack.i.h.bf16 %v6036_v43  ;;  %v6154_v43 = vld [vmem:[%s8056_s4 + $0xe4] sm:$0xff]  }
 0x1ff   : >> { %v1776_v55 = vsel %vm961_vm15, %v1771_v45, %v6037_v10  ;;  %v6051_v14 = vpop.permute.xlu1 %6050 }
 0x200   : >> { %5441 = vmatpush3.bf16.msra.mxu0 %v1584_v6  ;;  %5581 = vmatpush3.bf16.msra.mxu1 %v1584_v6  ;;  %v1781_v32 = vsel %vm967_vm0, %v1776_v55, %v6042_v51  ;;  %v6046_v59 = vpop.permute.xlu0 %6045  ;;  %v6053_v23 = vunpack.i.h.bf16 %v6051_v14  ;;  %v6052_v25 = vunpack.i.l.bf16 %v6051_v14 }
 0x201   : >> { %5454 = vmatprep.subr.bf16.mxu0 %v6394_v42  ;;  %5594 = vmatprep.subr.bf16.mxu1 %v6394_v42  ;;  %v7188_v13 = vpack.c.bf16 %v1781_v32, %v1780_v60  ;;  %v6048_v18 = vunpack.i.h.bf16 %v6046_v59  ;;  %v6047_v19 = vunpack.i.l.bf16 %v6046_v59  ;;  %v4767_v32 = vld [vmem:[%s6686_s26 + $0xd0] sm:$0xff] }
 0x203   : >> { %5443 = vmatmul.mubr.msk.bf16.vlgmr.msra.gmra.mrb[0].mxu0 %vm1191_vm1, %v6930_v34  ;;  %5583 = vmatmul.mubr.msk.bf16.vlgmr.msra.gmra.mrb[0].mxu1 %vm1191_vm1, %v7159_v48  ;;  %v1772_v34 = vsel %vm955_vm14, %v1767_v54, %v6033_v50  ;;  %v6061_v52 = vpop.permute.xlu1 %6060  ;;  %v2037_v27 = vsel %vm777_vm5, %v4764_v22, %v6048_v18  ;;  %v2036_v29 = vsel %vm777_vm5, %v4763_v21, %v6047_v19  ;;  %v6158_v21 = vld [vmem:[%s8056_s4 + $0x100] sm:$0xff]  }
 0x204   : >> { %5455 = vmatpush3.bf16.msra.mxu0 %v6148_v46  ;;  %5595 = vmatpush3.bf16.msra.mxu1 %v6148_v46  ;;  %v1777_v63 = vsel %vm961_vm15, %v1772_v34, %v6038_v58  ;;  %v6056_v17 = vpop.permute.xlu0 %6055  ;;  %v2041_v35 = vsel %vm955_vm14, %v2036_v29, %v6052_v25  ;;  %v2042_v36 = vsel %vm955_vm14, %v2037_v27, %v6053_v23  ;;  %v6063_v40 = vunpack.i.h.bf16 %v6061_v52  ;;  %v6156_v34 = vld [vmem:[%s8056_s4 + $0xf0] sm:$0xff]  }
 0x205   : >> { %5456 = vmatprep.subr.bf16.mxu0 %v6394_v42  ;;  %5596 = vmatprep.subr.bf16.mxu1 %v6394_v42  ;;  %v1782_v15 = vsel %vm967_vm0, %v1777_v63, %v6043_v61  ;;  %v6057_v31 = vunpack.i.l.bf16 %v6056_v17  ;;  %v6062_v41 = vunpack.i.l.bf16 %v6061_v52 }
 0x206   : >> { %5446 = vmatprep.mubr.msk.bf16.mxu0 %vm6397_vm12, %v6394_v42  ;;  %5586 = vmatprep.mubr.msk.bf16.mxu1 %vm6397_vm12, %v6394_v42 }
 0x207   : >> { %v6071_v33 = vpop.permute.xlu1 %6070  ;;  %v2046_v7 = vsel %vm961_vm15, %v2041_v35, %v6057_v31  ;;  %v4839_v35 = vld [vmem:[%s6686_s26 + $0xe4] sm:$0xff] }
 0x208   : >> { %5457 = vmatpush3.bf16.msra.mxu0 %v6149_v57  ;;  %5597 = vmatpush3.bf16.msra.mxu1 %v6149_v57  ;;  %v6066_v26 = vpop.permute.xlu0 %6065  ;;  %v6073_v9 = vunpack.i.h.bf16 %v6071_v33  ;;  %v6072_v10 = vunpack.i.l.bf16 %v6071_v33  ;;  %v2051_v45 = vsel %vm967_vm0, %v2046_v7, %v6062_v41  ;;  %v4838_v33 = vld [vmem:[%s6686_s26 + $0xdc] sm:$0xff] }
 0x209   : >> { %5458 = vmatprep.subr.bf16.mxu0 %v6394_v42  ;;  %5598 = vmatprep.subr.bf16.mxu1 %v6394_v42  ;;  %v6068_v37 = vunpack.i.h.bf16 %v6066_v26  ;;  %v6067_v39 = vunpack.i.l.bf16 %v6066_v26  ;;  %v6159_v26 = vld [vmem:[%s8056_s4 + $0x108] sm:$0xff]   ;;  %v6162_v7 = vld [vmem:[%s8056_s4 + $0x120] sm:$0xff]  }
 0x20b   : >> { %5447 = vmatmul.mubr.msk.bf16.gmra.mrb[4].mxu0 %vm1191_vm1, %v6980_v24  ;;  %5587 = vmatmul.mubr.msk.bf16.gmra.mrb[4].mxu1 %vm1191_vm1, %v7188_v13  ;;  %v7206_v24 = vpack.c.bf16 %v1782_v15, %v1782_v15  ;;  %v2039_v11 = vsel %vm777_vm5, %v4766_v1, %v6068_v37  ;;  %v2038_v12 = vsel %vm777_vm5, %v4765_v0, %v6067_v39  ;;  %v6081_v44 = vpop.permute.xlu1 %6080 }
 0x20c   : >> { %5459 = vmatpush3.bf16.msra.mxu0 %v6150_v62  ;;  %5599 = vmatpush3.bf16.msra.mxu1 %v6150_v62  ;;  %v6076_v6 = vpop.permute.xlu0 %6075  ;;  %v2043_v51 = vsel %vm955_vm14, %v2038_v12, %v6072_v10  ;;  %v2044_v54 = vsel %vm955_vm14, %v2039_v11, %v6073_v9  ;;  %v6083_v28 = vunpack.i.h.bf16 %v6081_v44  ;;  %v6082_v58 = vunpack.i.l.bf16 %v6081_v44  ;;  %v6163_v9 = vld [vmem:[%s8056_s4 + $0x128] ss:$0 sps:$4 sm:$0xff]   ;;  %v4840_v11 = vld [vmem:[%s6686_s26 + $0xec] sm:$0xff]  ;;  %v4841_v12 = vld [vmem:[%s6686_s26 + $0xf4] sm:$0xff] }
 0x20d   : >> { %5460 = vmatprep.subr.bf16.mxu0 %v6394_v42  ;;  %5600 = vmatprep.subr.bf16.mxu1 %v6394_v42  ;;  %v6078_v49 = vunpack.i.h.bf16 %v6076_v6  ;;  %v6077_v50 = vunpack.i.l.bf16 %v6076_v6 }
 0x20e   : >> { %5450 = vmatprep.mubr.msk.bf16.mxu0 %vm6397_vm12, %v6394_v42  ;;  %5590 = vmatprep.mubr.msk.bf16.mxu1 %vm6397_vm12, %v6394_v42 }
 0x20f   : >> { %v2048_v59 = vsel %vm961_vm15, %v2043_v51, %v6077_v50  ;;  %v2049_v60 = vsel %vm961_vm15, %v2044_v54, %v6078_v49  ;;  %v7266_v61 = vpop.permute.xlu1 %6090  ;;  %v2130_v51 = vsel %vm1201_vm13, %v6163_v9, 0  ;;  %vm2726_vm13 = vcmask 388096  }
 0x210   : >> { %5461 = vmatpush3.bf16.msra.mxu0 %v6151_v16  ;;  %5601 = vmatpush3.bf16.msra.mxu1 %v6151_v16  ;;  %v7253_v55 = vpop.permute.xlu0 %6085  ;;  %v6092_v62 = vunpack.i.l.bf16 %v7266_v61  ;;  %v2053_v14 = vsel %vm967_vm0, %v2048_v59, %v6082_v58  ;;  %v2054_v15 = vsel %vm967_vm0, %v2049_v60, %v6083_v28  ;;  %v6157_v16 = vld [vmem:[%s8056_s4 + $0xf8] sm:$0xff]   ;;  %v6093_v37 = vunpack.i.h.bf16 %v7266_v61 }
 0x211   : >> { %5462 = vmatprep.subr.bf16.mxu0 %v6394_v42  ;;  %5602 = vmatprep.subr.bf16.mxu1 %v6394_v42  ;;  %v6087_v57 = vunpack.i.l.bf16 %v7253_v55  ;;  %v7289_v19 = vpack.c.bf16 %v2054_v15, %v2053_v14 }
 0x213   : >> { %5451 = vmatmul.mubr.msk.bf16.gmra.mrb[8].mxu0 %vm1191_vm1, %v7023_v53  ;;  %5591 = vmatmul.mubr.msk.bf16.gmra.mrb[8].mxu1 %vm1191_vm1, %v7206_v24  ;;  %v6058_v53 = vunpack.i.h.bf16 %v6056_v17  ;;  %v2040_v63 = vsel %vm777_vm5, %v4767_v32, %v6087_v57  ;;  %v7291_v52 = vpop.permute.xlu1 %6100 }
 0x214   : >> { %5463 = vmatpush3.bf16.msra.mxu0 %v6152_v20  ;;  %5603 = vmatpush3.bf16.msra.mxu1 %v6152_v20  ;;  %v7279_v17 = vpop.permute.xlu0 %6095  ;;  %v2045_v18 = vsel %vm955_vm14, %v2040_v63, %v6092_v62  ;;  %v6102_v20 = vunpack.i.l.bf16 %v7291_v52  ;;  %v6103_v10 = vunpack.i.h.bf16 %v7291_v52  ;;  %v4842_v62 = vld [vmem:[%s6686_s26 + $0xfc] sm:$0xff]  ;;  %s2722_s26 = smul.u32 20, %s6385_s19  ;;  %s832_s19 = sadd.s32 1, %s6385_s19  }
 0x215   : >> { %5464 = vmatprep.subr.bf16.mxu0 %v6394_v42  ;;  %5604 = vmatprep.subr.bf16.mxu1 %v6394_v42  ;;  %v2047_v38 = vsel %vm961_vm15, %v2042_v36, %v6058_v53  ;;  %v6088_v53 = vunpack.i.h.bf16 %v7253_v55  ;;  %v6098_v0 = vunpack.i.h.bf16 %v7279_v17  ;;  %p829_p5 = scmp.ge.s32.totalorder %s832_s19, 20  }
 0x216   : >> { %5470 = vmatprep.mubr.msk.bf16.mxu0 %vm6397_vm12, %v6394_v42  ;;  %5610 = vmatprep.mubr.msk.bf16.mxu1 %vm6397_vm12, %v6394_v42  ;;  %v2052_v46 = vsel %vm967_vm0, %v2047_v38, %v6063_v40  ;;  %v6161_v40 = vld [vmem:[%s8056_s4 + $0x118] sm:$0xff]   ;;  %s2723_s27 = scalar_lea.vmem [#allocation3], %s2722_s26  ;;  %s7428_s14 = smov (%p829_p5), 0  }
 0x217   : >> { %v7255_v56 = vpack.c.bf16 %v2052_v46, %v2051_v45  ;;  %v7308_v27 = vpop.permute.xlu1 %6110  ;;  %v2580_v41 = vsel %vm777_vm5, %v4838_v33, %v6088_v53 }
 0x218   : >> { %5465 = vmatpush3.bf16.msra.mxu0 %v6153_v30  ;;  %5605 = vmatpush3.bf16.msra.mxu1 %v6153_v30  ;;  %v6106_v23 = vpop.permute.xlu0 %6105  ;;  %v6160_v30 = vld [vmem:[%s8056_s4 + $0x110] sm:$0xff]   ;;  %v6112_v39 = vunpack.i.l.bf16 %v7308_v27  ;;  %v2585_v1 = vsel %vm955_vm14, %v2580_v41, %v6093_v37  ;;  %v6113_v46 = vunpack.i.h.bf16 %v7308_v27 }
 0x219   : >> { %5466 = vmatprep.subr.bf16.mxu0 %v6394_v42  ;;  %5606 = vmatprep.subr.bf16.mxu1 %v6394_v42  ;;  %v6107_v31 = vunpack.i.l.bf16 %v6106_v23  ;;  %v6108_v38 = vunpack.i.h.bf16 %v6106_v23  ;;  %v2590_v45 = vsel %vm961_vm15, %v2585_v1, %v6098_v0 }
 0x21a   : >> { %v2595_v54 = vsel %vm967_vm0, %v2590_v45, %v6103_v10 }
 0x21b   : >> { %v2568_v36 = vpop.permute.xlu1 %2567  ;;  %v2582_v49 = vsel %vm777_vm5, %v4840_v11, %v6108_v38 }
 0x21c   : >> { %5467 = vmatpush3.bf16.msra.mxu0 %v6154_v43  ;;  %5607 = vmatpush3.bf16.msra.mxu1 %v6154_v43  ;;  %v2548_v29 = vpop.permute.xlu0 %2547  ;;  %v2581_v43 = vsel %vm777_vm5, %v4839_v35, %v6107_v31 }
 0x21d   : >> { %5468 = vmatprep.subr.bf16.mxu0 %v6394_v42  ;;  %5608 = vmatprep.subr.bf16.mxu1 %v6394_v42  ;;  %v2586_v6 = vsel %vm955_vm14, %v2581_v43, %v6112_v39 }
 0x21e   : >> { %v2591_v44 = vsel %vm961_vm15, %v2586_v6, %v2548_v29 }
 0x21f   : >> { %v2532_v8 = vpop.permute.xlu1 %2531  ;;  %v2596_v55 = vsel %vm967_vm0, %v2591_v44, %v2568_v36 }
 0x220   : >> { %5469 = vmatpush3.bf16.msra.mxu0 %v1857_v47  ;;  %5609 = vmatpush3.bf16.msra.mxu1 %v1857_v47  ;;  %v2600_v59 = vpack.c.bf16 %v2596_v55, %v2595_v54 }
 0x221   : >> { %5482 = vmatprep.subr.bf16.mxu0 %v6394_v42  ;;  %5622 = vmatprep.subr.bf16.mxu1 %v6394_v42 }
 0x223   : >> { %5471 = vmatmul.mubr.msk.bf16.vlgmr.msra.gmra.mrb[0].mxu0 %vm1191_vm1, %v7159_v48  ;;  %5611 = vmatmul.mubr.msk.bf16.vlgmr.msra.gmra.mrb[0].mxu1 %vm1191_vm1, %v7255_v56  ;;  %v6097_v48 = vunpack.i.l.bf16 %v7279_v17  ;;  %v6121_v58 = vpop.permute.xlu1 %6120 }
 0x224   : >> { %5483 = vmatpush3.bf16.msra.mxu0 %v6156_v34  ;;  %5623 = vmatpush3.bf16.msra.mxu1 %v6156_v34  ;;  %v2587_v34 = vsel %vm955_vm14, %v2582_v49, %v6113_v46  ;;  %v6123_v60 = vunpack.i.h.bf16 %v6121_v58  ;;  %v6122_v61 = vunpack.i.l.bf16 %v6121_v58 }
 0x225   : >> { %5484 = vmatprep.subr.bf16.mxu0 %v6394_v42  ;;  %5624 = vmatprep.subr.bf16.mxu1 %v6394_v42  ;;  %v2050_v22 = vsel %vm961_vm15, %v2045_v18, %v6097_v48 }
 0x226   : >> { %5474 = vmatprep.mubr.msk.bf16.mxu0 %vm6397_vm12, %v6394_v42  ;;  %5614 = vmatprep.mubr.msk.bf16.mxu1 %vm6397_vm12, %v6394_v42  ;;  %v2055_v25 = vsel %vm967_vm0, %v2050_v22, %v6102_v20 }
 0x227   : >> { %v2534_v17 = vpop.permute.xlu1 %2533 }
 0x228   : >> { %5485 = vmatpush3.bf16.msra.mxu0 %v6157_v16  ;;  %5625 = vmatpush3.bf16.msra.mxu1 %v6157_v16 }
 0x229   : >> { %5486 = vmatprep.subr.bf16.mxu0 %v6394_v42  ;;  %5626 = vmatprep.subr.bf16.mxu1 %v6394_v42 }
 0x22b   : >> { %5475 = vmatmul.mubr.msk.bf16.gmra.mrb[4].mxu0 %vm1191_vm1, %v7188_v13  ;;  %5615 = vmatmul.mubr.msk.bf16.gmra.mrb[4].mxu1 %vm1191_vm1, %v7289_v19  ;;  %v7316_v13 = vpack.c.bf16 %v2055_v25, %v2055_v25  ;;  %v2574_v22 = vpop.permute.xlu1 %2573 }
 0x22c   : >> { %5487 = vmatpush3.bf16.msra.mxu0 %v6158_v21  ;;  %5627 = vmatpush3.bf16.msra.mxu1 %v6158_v21 }
 0x22d   : >> { %5488 = vmatprep.subr.bf16.mxu0 %v6394_v42  ;;  %5628 = vmatprep.subr.bf16.mxu1 %v6394_v42 }
 0x22e   : >> { %5478 = vmatprep.mubr.msk.bf16.mxu0 %vm6397_vm12, %v6394_v42  ;;  %5618 = vmatprep.mubr.msk.bf16.mxu1 %vm6397_vm12, %v6394_v42 }
 0x230   : >> { %5489 = vmatpush3.bf16.msra.mxu0 %v6159_v26  ;;  %5629 = vmatpush3.bf16.msra.mxu1 %v6159_v26 }
 0x231   : >> { %5490 = vmatprep.subr.bf16.mxu0 %v6394_v42  ;;  %5630 = vmatprep.subr.bf16.mxu1 %v6394_v42 }
 0x233   : >> { %5479 = vmatmul.mubr.msk.bf16.gmra.mrb[8].mxu0 %vm1191_vm1, %v7206_v24  ;;  %5619 = vmatmul.mubr.msk.bf16.gmra.mrb[8].mxu1 %vm1191_vm1, %v7316_v13  ;;  %v2512_v24 = vpop.permute.xlu0 %2511 }
 0x234   : >> { %5491 = vmatpush3.bf16.msra.mxu0 %v6160_v30  ;;  %5631 = vmatpush3.bf16.msra.mxu1 %v6160_v30  ;;  %v2583_v50 = vsel %vm777_vm5, %v4841_v12, %v2512_v24 }
 0x235   : >> { %5492 = vmatprep.subr.bf16.mxu0 %v6394_v42  ;;  %5632 = vmatprep.subr.bf16.mxu1 %v6394_v42  ;;  %v2588_v32 = vsel %vm955_vm14, %v2583_v50, %v2532_v8 }
 0x236   : >> { %5498 = vmatprep.mubr.msk.bf16.mxu0 %vm6397_vm12, %v6394_v42  ;;  %5638 = vmatprep.mubr.msk.bf16.mxu1 %vm6397_vm12, %v6394_v42 }
 0x237   : >> { %v6116_v47 = vpop.permute.xlu0 %6115 }
 0x238   : >> { %5493 = vmatpush3.bf16.msra.mxu0 %v6161_v40  ;;  %5633 = vmatpush3.bf16.msra.mxu1 %v6161_v40  ;;  %v6118_v57 = vunpack.i.h.bf16 %v6116_v47  ;;  %v6117_v28 = vunpack.i.l.bf16 %v6116_v47 }
 0x239   : >> { %5494 = vmatprep.subr.bf16.mxu0 %v6394_v42  ;;  %5634 = vmatprep.subr.bf16.mxu1 %v6394_v42 }
 0x23a   : >> { %v2593_v14 = vsel %vm961_vm15, %v2588_v32, %v6118_v57  ;;  %v2592_v15 = vsel %vm961_vm15, %v2587_v34, %v6117_v28 }
 0x23b   : >> { %v2514_v63 = vpop.permute.xlu0 %2513  ;;  %v2597_v48 = vsel %vm967_vm0, %v2592_v15, %v6122_v61  ;;  %v2598_v18 = vsel %vm967_vm0, %v2593_v14, %v6123_v60 }
 0x23c   : >> { %5495 = vmatpush3.bf16.msra.mxu0 %v6162_v7  ;;  %5635 = vmatpush3.bf16.msra.mxu1 %v6162_v7  ;;  %v2584_v16 = vsel %vm777_vm5, %v4842_v62, %v2514_v63  ;;  %v2601_v21 = vpack.c.bf16 %v2598_v18, %v2597_v48 }
 0x23d   : >> { %5496 = vmatprep.subr.bf16.mxu0 %v6394_v42  ;;  %5636 = vmatprep.subr.bf16.mxu1 %v6394_v42  ;;  %v2589_v52 = vsel %vm955_vm14, %v2584_v16, %v2534_v17 }
 0x23f   : >> { %v2554_v20 = vpop.permute.xlu0 %2553 }
 0x240   : >> { %5497 = vmatpush3.bf16.msra.mxu0 %v2130_v51  ;;  %5637 = vmatpush3.bf16.msra.mxu1 %v2130_v51 }
 0x243   : >> { %5499 = vmatmul.mubr.msk.bf16.vlgmr.msra.gmra.mrb[0].mxu0 %vm1191_vm1, %v7255_v56  ;;  %5639 = vmatmul.mubr.msk.bf16.vlgmr.msra.gmra.mrb[0].mxu1 %vm1191_vm1, %v2600_v59  ;;  %v2594_v56 = vsel %vm961_vm15, %v2589_v52, %v2554_v20 }
 0x244   : >> { %5502 = vmatprep.mubr.msk.bf16.mxu0 %vm6397_vm12, %v6394_v42  ;;  %5642 = vmatprep.mubr.msk.bf16.mxu1 %vm6397_vm12, %v6394_v42  ;;  %v2599_v23 = vsel %vm967_vm0, %v2594_v56, %v2574_v22 }
 0x245   : >> { %v2602_v25 = vpack.c.bf16 %v2599_v23, %v2599_v23 }
 0x24b   : >> { %5503 = vmatmul.mubr.msk.bf16.gmra.mrb[4].mxu0 %vm1191_vm1, %v7289_v19  ;;  %5643 = vmatmul.mubr.msk.bf16.gmra.mrb[4].mxu1 %vm1191_vm1, %v2601_v21 }
 0x24c   : >> { %5506 = vmatprep.mubr.msk.bf16.mxu0 %vm6397_vm12, %v6394_v42  ;;  %5646 = vmatprep.mubr.msk.bf16.mxu1 %vm6397_vm12, %v6394_v42 }
 0x253   : >> { %5507 = vmatmul.mubr.msk.bf16.gmra.mrb[8].mxu0 %vm1191_vm1, %v7316_v13  ;;  %5647 = vmatmul.mubr.msk.bf16.gmra.mrb[8].mxu1 %vm1191_vm1, %v2602_v25 }
 0x316   : >> { %v2166_v19 = vpop.f32.mrb[0].mxu0  ;;  %v2646_v26 = vpop.f32.mrb[0].mxu1 }
 0x317   : >> { %v2199_v27 = vmul.f32 %v6481_v2, %v2166_v19  ;;  %v2673_v29 = vmul.f32 %v6481_v2, %v2646_v26  ;;  %v5500_v30 = vpop.f32.mrb[1].mxu0  ;;  %v5640_v53 = vpop.f32.mrb[1].mxu1 }
 0x318   : >> { %v2169_v31 = vpop.f32.mrb[2].mxu0  ;;  %v2649_v33 = vpop.f32.mrb[2].mxu1 }
 0x319   : >> { %v2210_v42 = vadd.f32 %v6486_v3, %v2199_v27  ;;  %v2678_v35 = vadd.f32 %v6486_v3, %v2673_v29  ;;  %v2200_v36 = vmul.f32 %v6481_v2, %v2169_v31  ;;  %v2674_v13 = vmul.f32 %v6481_v2, %v2649_v33  ;;  %v5501_v37 = vpop.f32.mrb[3].mxu0  ;;  %v5641_v39 = vpop.f32.mrb[3].mxu1 }
 0x31b   : >> { %vm2215_vm2 = vcmp.gt.f32.partialorder %v2210_v42, 0.0  ;;  %v2220_v40 = vmul.f32 0.01, %v2210_v42  ;;  %vm2683_vm3 = vcmp.gt.f32.partialorder %v2678_v35, 0.0  ;;  %v2688_v41 = vmul.f32 0.01, %v2678_v35 }
 0x31c   : >> { %v2211_v43 = vadd.f32 %v6486_v3, %v2200_v36  ;;  %v2679_v24 = vadd.f32 %v6486_v3, %v2674_v13 }
 0x31d   : >> { %v2225_v0 = vsel %vm2215_vm2, %v2210_v42, %v2220_v40  ;;  %v2693_v1 = vsel %vm2683_vm3, %v2678_v35, %v2688_v41 }
 0x31e   : >> { %v2698_v6 = vmax.f32 %v2225_v0, %v2693_v1  ;;  %vm2216_vm4 = vcmp.gt.f32.partialorder %v2211_v43, 0.0  ;;  %v2221_v7 = vmul.f32 0.01, %v2211_v43  ;;  %vm2684_vm6 = vcmp.gt.f32.partialorder %v2679_v24, 0.0  ;;  %v2174_v38 = vpop.f32.mrb[4].mxu0  ;;  %v2654_v8 = vpop.f32.mrb[4].mxu1 }
 0x31f   : >> { %v2689_v9 = vmul.f32 0.01, %v2679_v24  ;;  %v2201_v10 = vmul.f32 %v6481_v2, %v2174_v38  ;;  %v2675_v11 = vmul.f32 %v6481_v2, %v2654_v8  ;;  %v5504_v12 = vpop.f32.mrb[5].mxu0  ;;  %v5644_v44 = vpop.f32.mrb[5].mxu1 }
 0x320   : >> { %2703 = vst.msk [vmem:[#allocation5] sm:$0xff] %vm955_vm14, %v2698_v6  ;;  %v2226_v45 = vsel %vm2216_vm4, %v2211_v43, %v2221_v7  ;;  %v2177_v46 = vpop.f32.mrb[6].mxu0  ;;  %v2657_v47 = vpop.f32.mrb[6].mxu1 }
 0x321   : >> { %v2694_v49 = vsel %vm2684_vm6, %v2679_v24, %v2689_v9  ;;  %v2212_v50 = vadd.f32 %v6486_v3, %v2201_v10  ;;  %v2680_v51 = vadd.f32 %v6486_v3, %v2675_v11  ;;  %v2202_v54 = vmul.f32 %v6481_v2, %v2177_v46  ;;  %v5505_v55 = vpop.f32.mrb[7].mxu0  ;;  %v5645_v57 = vpop.f32.mrb[7].mxu1 }
 0x322   : >> { %v2699_v28 = vmax.f32 %v2226_v45, %v2694_v49  ;;  %v2676_v58 = vmul.f32 %v6481_v2, %v2657_v47 }
 0x323   : >> { %vm2217_vm7 = vcmp.gt.f32.partialorder %v2212_v50, 0.0  ;;  %v2222_v34 = vmul.f32 0.01, %v2212_v50  ;;  %vm2685_vm8 = vcmp.gt.f32.partialorder %v2680_v51, 0.0  ;;  %v2690_v32 = vmul.f32 0.01, %v2680_v51 }
 0x324   : >> { %2704 = vst.msk [vmem:[#allocation5 + $0x8] sm:$0xff] %vm955_vm14, %v2699_v28  ;;  %v2213_v59 = vadd.f32 %v6486_v3, %v2202_v54  ;;  %v2681_v60 = vadd.f32 %v6486_v3, %v2676_v58 }
 0x325   : >> { %v2227_v61 = vsel %vm2217_vm7, %v2212_v50, %v2222_v34  ;;  %v2695_v62 = vsel %vm2685_vm8, %v2680_v51, %v2690_v32 }
 0x326   : >> { %v2700_v63 = vmax.f32 %v2227_v61, %v2695_v62  ;;  %vm2218_vm9 = vcmp.gt.f32.partialorder %v2213_v59, 0.0  ;;  %v2223_v14 = vmul.f32 0.01, %v2213_v59  ;;  %vm2686_vm10 = vcmp.gt.f32.partialorder %v2681_v60, 0.0  ;;  %v2182_v15 = vpop.f32.mrb[8].mxu0  ;;  %v2662_v16 = vpop.f32.mrb[8].mxu1 }
 0x327   : >> { %v2691_v17 = vmul.f32 0.01, %v2681_v60  ;;  %v2203_v48 = vmul.f32 %v6481_v2, %v2182_v15  ;;  %v2677_v18 = vmul.f32 %v6481_v2, %v2662_v16  ;;  %v5508_v52 = vpop.f32.mrb[9].mxu0  ;;  %v5648_v20 = vpop.f32.mrb[9].mxu1 }
 0x328   : >> { %2705 = vst.msk [vmem:[#allocation5 + $0x10] sm:$0xff] %vm955_vm14, %v2700_v63  ;;  %v2228_v21 = vsel %vm2218_vm9, %v2213_v59, %v2223_v14  ;;  %v2185_v56 = vpop.f32.mrb[10].mxu0  ;;  %v2665_v22 = vpop.f32.mrb[10].mxu1 }
 0x329   : >> { %v2696_v23 = vsel %vm2686_vm10, %v2681_v60, %v2691_v17  ;;  %v2214_v25 = vadd.f32 %v6486_v3, %v2203_v48  ;;  %v2682_v19 = vadd.f32 %v6486_v3, %v2677_v18  ;;  %v5509_v26 = vpop.f32.mrb[11].mxu0  ;;  %v5649_v27 = vpop.f32.mrb[11].mxu1 }
 0x32a   : >> { %v2701_v29 = vmax.f32 %v2228_v21, %v2696_v23 }
 0x32b   : >> { %v2708_v30 = vld [vmem:[#allocation5] ss:$2 sm:$0xff]  ;;  %v2714_v53 = vld [vmem:[#allocation5 + $0x1] ss:$2 sm:$0xff]  ;;  %vm2219_vm11 = vcmp.gt.f32.partialorder %v2214_v25, 0.0  ;;  %vm2687_vm12 = vcmp.gt.f32.partialorder %v2682_v19, 0.0 }
 0x32c   : >> { %v2719_v31 = vmax.f32 %v2708_v30, %v2714_v53  ;;  %2706 = vst.msk [vmem:[#allocation5 + $0x18] sm:$0xff] %vm955_vm14, %v2701_v29  ;;  %v2224_v33 = vmul.f32 0.01, %v2214_v25  ;;  %v2692_v42 = vmul.f32 0.01, %v2682_v19 }
 0x32e   : >> { %2724 = vst.msk [vmem:[%s2723_s27] sm:$0xff] %vm955_vm14, %v2719_v31  ;;  %v2229_v35 = vsel %vm2219_vm11, %v2214_v25, %v2224_v33  ;;  %v2697_v36 = vsel %vm2687_vm12, %v2682_v19, %v2692_v42 }
 0x32f   : >> { %v2702_v13 = vmax.f32 %v2229_v35, %v2697_v36 }
 0x331   : >> { %2707 = vst.msk [vmem:[#allocation5 + $0x20] sm:$0xff] %vm955_vm14, %v2702_v13 }
 0x333   : >> { %v2710_v37 = vld [vmem:[#allocation5 + $0x10] ss:$2 sm:$0xff]  ;;  %v2716_v39 = vld [vmem:[#allocation5 + $0x11] ss:$2 sm:$0xff] }
 0x334   : >> { %v2720_v40 = vmax.f32 %v2710_v37, %v2716_v39 }
 0x335   : > { %831 = sbr.rel (!%p829_p5) target bundleno = 308 (0x134), region = 211 }
 0x336   : >> { %2725 = vst.msk [vmem:[%s2723_s27 + $0x8] sm:$0xff] %vm955_vm14, %v2720_v40 }
 0x338   : >> { %v2712_v41 = vld [vmem:[#allocation5 + $0x20] ss:$2 sm:$0xf]  ;;  %v2718_v43 = vld [vmem:[#allocation5 + $0x21] ss:$2 sm:$0xf] }
 0x339   : >> { %v2721_v24 = vmax.f32 %v2712_v41, %v2718_v43 }
 0x33b   : >> { %2727 = vst.msk [vmem:[%s2723_s27 + $0x10] sm:$0xf] %vm2726_vm13, %v2721_v24 }
 0x33c LB: >> { %v6400_v0 = vmov 0   ;;  %v6284_v1 = vld [vmem:[%s8059_s7 + $0x78] sm:$0xff]   ;;  %s2735_s30 = smul.u32 40, %s6389_s14  ;;  %v6285_v2 = vld [vmem:[%s8059_s7 + $0x80] sm:$0xff]   ;;  %v6286_v45 = vld [vmem:[%s8059_s7 + $0x88] sm:$0xff]   ;;  %s6401_s17 = smov 96   ;;  %s6389_s14 = sphi %s7428_s14, %s2733_s14  }
 0x33d   : >> { %3019 = vmatprep.subr.bf16.mxu0 %v6400_v0  ;;  %3906 = vmatprep.subr.bf16.mxu1 %v6400_v0  ;;  %v6287_v55 = vld [vmem:[%s8059_s7 + $0x90] sm:$0xff]   ;;  %s6402_s21 = smov 16   ;;  %v6288_v59 = vld [vmem:[%s8059_s7 + $0x98] sm:$0xff]   ;;  %s6403_s24 = smov 64   ;;  %v6289_v17 = vld [vmem:[%s8059_s7 + $0xa0] sm:$0xff]   ;;  %vm2793_vm5 = vcmask 130048  }
 0x33e   : >> { %3020 = vmatpush1.bf16.msra.mxu0 %v6284_v1  ;;  %3907 = vmatpush1.bf16.msra.mxu1 %v6284_v1  ;;  %s7444_s12 = scalar_lea.vmem [#allocation3], %s2735_s30  ;;  %s6404_s26 = smov 48   ;;  %v6290_v22 = vld [vmem:[%s8059_s7 + $0xa8] sm:$0xff]   ;;  %v6291_v30 = vld [vmem:[%s8059_s7 + $0xb0] sm:$0xff]   ;;  %v6292_v13 = vld [vmem:[%s8059_s7 + $0xb8] sm:$0xff]   ;;  %vm2796_vm15 = vcmask 523264  }
 0x33f   : >> { %3021 = vmatprep.subr.bf16.mxu0 %v6400_v0  ;;  %3908 = vmatprep.subr.bf16.mxu1 %v6400_v0  ;;  %v6293_v40 = vld [vmem:[%s8059_s7 + $0xc0] sm:$0xff]   ;;  %v6294_v41 = vld [vmem:[%s8059_s7 + $0xc8] sm:$0xff]   ;;  %v6295_v43 = vld [vmem:[%s8059_s7 + $0xd0] sm:$0xff]   ;;  %vm3015_vm1 = vcmask 916480  }
 0x340   : >> { %v6296_v24 = vld [vmem:[%s8059_s7 + $0xd8] sm:$0xff]   ;;  %v6297_v1 = vld [vmem:[%s8059_s7 + $0xe0] sm:$0xff]  }
 0x342   : >> { %v4974_v3 = vld [vmem:[%s7444_s12 + $0x2a] sm:$0xff]  ;;  %v4975_v6 = vld [vmem:[%s7444_s12 + $0x32] sm:$0xff]  ;;  %v4893_v8 = vld [vmem:[%s7444_s12 + $0x1e] sm:$0xff]  ;;  %3022 = vmatpush1.bf16.msra.mxu0 %v6285_v2  ;;  %3909 = vmatpush1.bf16.msra.mxu1 %v6285_v2 }
 0x343   : >> { %v4892_v7 = vld [vmem:[%s7444_s12 + $0x16] sm:$0xff]  ;;  %v6174_v38 = vpack.i.bf16 %v4975_v6, %v4974_v3  ;;  %v4978_v9 = vld [vmem:[%s7444_s12 + $0x2b] sm:$0xff]  ;;  %v4897_v44 = vld [vmem:[%s7444_s12 + $0x1f] sm:$0xff]  ;;  %3023 = vmatprep.subr.bf16.mxu0 %v6400_v0  ;;  %3910 = vmatprep.subr.bf16.mxu1 %v6400_v0 }
 0x344   : >> { %v4979_v10 = vld [vmem:[%s7444_s12 + $0x33] sm:$0xff]  ;;  %v6164_v11 = vpack.i.bf16 %v4893_v8, %v4892_v7  ;;  %v4901_v50 = vld [vmem:[%s7444_s12 + $0x20] sm:$0xff]  ;;  %v4970_v34 = vld [vmem:[%s7444_s12 + $0x29] sm:$0xff] }
 0x345   : >> { %v4896_v12 = vld [vmem:[%s7444_s12 + $0x17] sm:$0xff]  ;;  %6175 = vrot.lane.b32.xlu1 %v6174_v38, %s6401_s17  ;;  %v6179_v46 = vpack.i.bf16 %v4979_v10, %v4978_v9  ;;  %v4982_v28 = vld [vmem:[%s7444_s12 + $0x2c] sm:$0xff]  ;;  %v4878_v61 = vld [vmem:[%s7444_s12 + $0x3] sm:$0xff] }
 0x346   : >> { %6165 = vrot.lane.b32.xlu0 %v6164_v11, %s6401_s17  ;;  %v6169_v47 = vpack.i.bf16 %v4897_v44, %v4896_v12  ;;  %v4900_v49 = vld [vmem:[%s7444_s12 + $0x18] sm:$0xff]  ;;  %3024 = vmatpush1.bf16.msra.mxu0 %v6286_v45  ;;  %v4879_v63 = vld [vmem:[%s7444_s12 + $0xb] sm:$0xff]  ;;  %v4876_v15 = vld [vmem:[%s7444_s12 + $0x2] sm:$0xff] }
 0x347   : >> { %v4888_v51 = vld [vmem:[%s7444_s12 + $0x15] sm:$0xff]  ;;  %v4889_v54 = vld [vmem:[%s7444_s12 + $0x1d] sm:$0xff]  ;;  %3911 = vmatpush1.bf16.msra.mxu1 %v6286_v45  ;;  %v6189_v57 = vpack.i.bf16 %v4901_v50, %v4900_v49  ;;  %3025 = vmatprep.subr.bf16.mxu0 %v6400_v0  ;;  %v4877_v16 = vld [vmem:[%s7444_s12 + $0xa] sm:$0xff]  ;;  %v6209_v48 = vpack.i.bf16 %v4879_v63, %v4878_v61 }
 0x348   : >> { %v4983_v58 = vld [vmem:[%s7444_s12 + $0x34] sm:$0xff]  ;;  %v6184_v32 = vpack.i.bf16 %v4889_v54, %v4888_v51  ;;  %3912 = vmatprep.subr.bf16.mxu1 %v6400_v0  ;;  %v4880_v18 = vld [vmem:[%s7444_s12 + $0x4] sm:$0xff]  ;;  %v6204_v52 = vpack.i.bf16 %v4877_v16, %v4876_v15  ;;  %v4881_v20 = vld [vmem:[%s7444_s12 + $0xc] sm:$0xff] }
 0x349   : >> { %6180 = vrot.lane.b32.xlu1 %v6179_v46, %s6402_s21  ;;  %v4971_v60 = vld [vmem:[%s7444_s12 + $0x31] sm:$0xff]  ;;  %v6199_v62 = vpack.i.bf16 %v4983_v58, %v4982_v28  ;;  %v4874_v21 = vld [vmem:[%s7444_s12 + $0x1] sm:$0xff]  ;;  %v4875_v56 = vld [vmem:[%s7444_s12 + $0x9] sm:$0xff]  ;;  %v6219_v23 = vpack.i.bf16 %v4881_v20, %v4880_v18 }
 0x34a   : >> { %6170 = vrot.lane.b32.xlu0 %v6169_v47, %s6402_s21  ;;  %3026 = vmatpush1.bf16.msra.mxu0 %v6287_v55  ;;  %v6194_v14 = vpack.i.bf16 %v4971_v60, %v4970_v34  ;;  %v6214_v25 = vpack.i.bf16 %v4875_v56, %v4874_v21  ;;  %v5040_v19 = vld [vmem:[%s7444_s12 + $0x3e] sm:$0xff]  ;;  %v5041_v26 = vld [vmem:[%s7444_s12 + $0x46] sm:$0xff]  ;;  %v5106_v3 = vld [vmem:[%s7444_s12 + $0x52] sm:$0xff] }
 0x34b   : >> { %3913 = vmatpush1.bf16.msra.mxu1 %v6287_v55  ;;  %3027 = vmatprep.subr.bf16.mxu0 %v6400_v0  ;;  %v5044_v27 = vld [vmem:[%s7444_s12 + $0x3f] sm:$0xff]  ;;  %v5045_v29 = vld [vmem:[%s7444_s12 + $0x47] sm:$0xff]  ;;  %v6224_v33 = vpack.i.bf16 %v5041_v26, %v5040_v19  ;;  %v5110_v38 = vld [vmem:[%s7444_s12 + $0x53] sm:$0xff] }
 0x34c   : >> { %3914 = vmatprep.subr.bf16.mxu1 %v6400_v0  ;;  %v5036_v53 = vld [vmem:[%s7444_s12 + $0x3d] sm:$0xff]  ;;  %v5037_v31 = vld [vmem:[%s7444_s12 + $0x45] sm:$0xff]  ;;  %v6229_v42 = vpack.i.bf16 %v5045_v29, %v5044_v27  ;;  %v5102_v10 = vld [vmem:[%s7444_s12 + $0x51] sm:$0xff] }
 0x34d   : >> { %6190 = vrot.lane.b32.xlu1 %v6189_v57, %s6403_s24  ;;  %v5048_v35 = vld [vmem:[%s7444_s12 + $0x40] sm:$0xff]  ;;  %v5049_v36 = vld [vmem:[%s7444_s12 + $0x48] sm:$0xff]  ;;  %v6234_v37 = vpack.i.bf16 %v5037_v31, %v5036_v53  ;;  %v5114_v44 = vld [vmem:[%s7444_s12 + $0x54] sm:$0xff] }
 0x34e   : >> { %6185 = vrot.lane.b32.xlu0 %v6184_v32, %s6404_s26  ;;  %3028 = vmatpush1.bf16.msra.mxu0 %v6288_v59  ;;  %v6239_v39 = vpack.i.bf16 %v5049_v36, %v5048_v35  ;;  %v6298_v2 = vld [vmem:[%s8059_s7 + $0xe8] sm:$0xff]   ;;  %v5107_v6 = vld [vmem:[%s7444_s12 + $0x5a] sm:$0xff] }
 0x34f   : >> { %3915 = vmatpush1.bf16.msra.mxu1 %v6288_v59  ;;  %3029 = vmatprep.subr.bf16.mxu0 %v6400_v0  ;;  %v6244_v7 = vpack.i.bf16 %v5107_v6, %v5106_v3  ;;  %v5111_v8 = vld [vmem:[%s7444_s12 + $0x5b] sm:$0xff]  ;;  %v5178_v49 = vld [vmem:[%s7444_s12 + $0x66] sm:$0xff]  ;;  %v5179_v50 = vld [vmem:[%s7444_s12 + $0x6e] sm:$0xff] }
 0x350   : >> { %3916 = vmatprep.subr.bf16.mxu1 %v6400_v0  ;;  %v6249_v9 = vpack.i.bf16 %v5111_v8, %v5110_v38  ;;  %v5103_v11 = vld [vmem:[%s7444_s12 + $0x59] sm:$0xff]  ;;  %v6264_v54 = vpack.i.bf16 %v5179_v50, %v5178_v49  ;;  %v5182_v55 = vld [vmem:[%s7444_s12 + $0x67] sm:$0xff]  ;;  %v5183_v57 = vld [vmem:[%s7444_s12 + $0x6f] sm:$0xff] }
 0x351   : >> { %6200 = vrot.lane.b32.xlu1 %v6199_v62, %s6403_s24  ;;  %v6254_v12 = vpack.i.bf16 %v5103_v11, %v5102_v10  ;;  %v5115_v45 = vld [vmem:[%s7444_s12 + $0x5c] sm:$0xff]  ;;  %v6269_v28 = vpack.i.bf16 %v5183_v57, %v5182_v55  ;;  %v5174_v34 = vld [vmem:[%s7444_s12 + $0x65] sm:$0xff]  ;;  %v5175_v32 = vld [vmem:[%s7444_s12 + $0x6d] sm:$0xff] }
 0x352   : >> { %6195 = vrot.lane.b32.xlu0 %v6194_v14, %s6404_s26  ;;  %3030 = vmatpush1.bf16.msra.mxu0 %v6289_v17  ;;  %v6259_v46 = vpack.i.bf16 %v5115_v45, %v5114_v44  ;;  %v6274_v60 = vpack.i.bf16 %v5175_v32, %v5174_v34  ;;  %v5186_v63 = vld [vmem:[%s7444_s12 + $0x68] sm:$0xff]  ;;  %v5187_v14 = vld [vmem:[%s7444_s12 + $0x70] sm:$0xff] }
 0x353   : >> { %3917 = vmatpush1.bf16.msra.mxu1 %v6289_v17  ;;  %3031 = vmatprep.subr.bf16.mxu0 %v6400_v0  ;;  %v6279_v15 = vpack.i.bf16 %v5187_v14, %v5186_v63  ;;  %v6301_v32 = vld [vmem:[%s8059_s7 + $0x10] sm:$0xff]   ;;  %v6302_v14 = vld [vmem:[%s8059_s7 + $0x18] sm:$0xff]  }
 0x354   : >> { %3918 = vmatprep.subr.bf16.mxu1 %v6400_v0 }
 0x355   : >> { %6210 = vrot.lane.b32.xlu1 %v6209_v48, %s6402_s21 }
 0x356   : >> { %6205 = vrot.lane.b32.xlu0 %v6204_v52, %s6401_s17  ;;  %3032 = vmatpush1.bf16.msra.mxu0 %v6290_v22 }
 0x357   : >> { %3919 = vmatpush1.bf16.msra.mxu1 %v6290_v22  ;;  %3033 = vmatprep.subr.bf16.mxu0 %v6400_v0 }
 0x358   : >> { %3920 = vmatprep.subr.bf16.mxu1 %v6400_v0 }
 0x359   : >> { %6220 = vrot.lane.b32.xlu1 %v6219_v23, %s6403_s24  ;;  %v4884_v23 = vld [vmem:[%s7444_s12 + $0x14] sm:$0xff] }
 0x35a   : >> { %6215 = vrot.lane.b32.xlu0 %v6214_v25, %s6404_s26  ;;  %3034 = vmatpush1.bf16.msra.mxu0 %v6291_v30  ;;  %v4885_v25 = vld [vmem:[%s7444_s12 + $0x1c] sm:$0xff] }
 0x35b   : >> { %3921 = vmatpush1.bf16.msra.mxu1 %v6291_v30  ;;  %3035 = vmatprep.subr.bf16.mxu0 %v6400_v0 }
 0x35c   : >> { %3922 = vmatprep.subr.bf16.mxu1 %v6400_v0 }
 0x35d   : >> { %6230 = vrot.lane.b32.xlu1 %v6229_v42, %s6402_s21 }
 0x35e   : >> { %6225 = vrot.lane.b32.xlu0 %v6224_v33, %s6401_s17  ;;  %3036 = vmatpush1.bf16.msra.mxu0 %v6292_v13 }
 0x35f   : >> { %3923 = vmatpush1.bf16.msra.mxu1 %v6292_v13  ;;  %3037 = vmatprep.subr.bf16.mxu0 %v6400_v0 }
 0x360   : >> { %3924 = vmatprep.subr.bf16.mxu1 %v6400_v0 }
 0x361   : >> { %6240 = vrot.lane.b32.xlu1 %v6239_v39, %s6403_s24 }
 0x362   : >> { %6235 = vrot.lane.b32.xlu0 %v6234_v37, %s6404_s26  ;;  %3038 = vmatpush1.bf16.msra.mxu0 %v6293_v40 }
 0x363   : >> { %3925 = vmatpush1.bf16.msra.mxu1 %v6293_v40  ;;  %3039 = vmatprep.subr.bf16.mxu0 %v6400_v0 }
 0x364   : >> { %3926 = vmatprep.subr.bf16.mxu1 %v6400_v0 }
 0x365   : >> { %6250 = vrot.lane.b32.xlu1 %v6249_v9, %s6402_s21 }
 0x366   : >> { %3040 = vmatpush1.bf16.msra.mxu0 %v6294_v41  ;;  %6245 = vrot.lane.b32.xlu0 %v6244_v7, %s6401_s17 }
 0x367   : >> { %3927 = vmatpush1.bf16.msra.mxu1 %v6294_v41  ;;  %3041 = vmatprep.subr.bf16.mxu0 %v6400_v0 }
 0x368   : >> { %3928 = vmatprep.subr.bf16.mxu1 %v6400_v0 }
 0x369   : >> { %6260 = vrot.lane.b32.xlu1 %v6259_v46, %s6403_s24 }
 0x36a   : >> { %3042 = vmatpush1.bf16.msra.mxu0 %v6295_v43  ;;  %6255 = vrot.lane.b32.xlu0 %v6254_v12, %s6404_s26 }
 0x36b   : >> { %3929 = vmatpush1.bf16.msra.mxu1 %v6295_v43  ;;  %3043 = vmatprep.subr.bf16.mxu0 %v6400_v0  ;;  %v4966_v43 = vld [vmem:[%s7444_s12 + $0x28] sm:$0xff] }
 0x36c   : >> { %3930 = vmatprep.subr.bf16.mxu1 %v6400_v0 }
 0x36d   : >> { %6270 = vrot.lane.b32.xlu1 %v6269_v28, %s6402_s21 }
 0x36e   : >> { %3044 = vmatpush1.bf16.msra.mxu0 %v6296_v24  ;;  %6265 = vrot.lane.b32.xlu0 %v6264_v54, %s6401_s17 }
 0x36f   : >> { %3931 = vmatpush1.bf16.msra.mxu1 %v6296_v24  ;;  %3045 = vmatprep.subr.bf16.mxu0 %v6400_v0  ;;  %v4967_v24 = vld [vmem:[%s7444_s12 + $0x30] sm:$0xff] }
 0x370   : >> { %3932 = vmatprep.subr.bf16.mxu1 %v6400_v0 }
 0x371   : >> { %6280 = vrot.lane.b32.xlu1 %v6279_v15, %s6403_s24  ;;  %v6303_v15 = vld [vmem:[%s8059_s7 + $0x20] sm:$0xff]  }
 0x372   : >> { %3046 = vmatpush1.bf16.msra.mxu0 %v6297_v1  ;;  %6275 = vrot.lane.b32.xlu0 %v6274_v60, %s6404_s26 }
 0x373   : >> { %3933 = vmatpush1.bf16.msra.mxu1 %v6297_v1  ;;  %3047 = vmatprep.subr.bf16.mxu0 %v6400_v0 }
 0x374   : >> { %3934 = vmatprep.subr.bf16.mxu1 %v6400_v0 }
 0x376   : >> { %3048 = vmatpush1.bf16.msra.mxu0 %v6298_v2 }
 0x377   : >> { %3935 = vmatpush1.bf16.msra.mxu1 %v6298_v2  ;;  %3153 = vmatprep.subr.bf16.mxu0 %v6400_v0  ;;  %v6299_v2 = vld [vmem:[%s8059_s7] sm:$0xff]  }
 0x378   : >> { %3947 = vmatprep.subr.bf16.mxu1 %v6400_v0 }
 0x3b7   : >> { %v7573_v47 = vpop.permute.xlu1 %6175 }
 0x3b8   : >> { %v6166_v51 = vpop.permute.xlu0 %6165  ;;  %v6177_v52 = vunpack.i.l.bf16 %v7573_v47  ;;  %v6178_v30 = vunpack.i.h.bf16 %v7573_v47  ;;  %v6300_v47 = vld [vmem:[%s8059_s7 + $0x8] sm:$0xff]  }
 0x3b9   : >> { %v6168_v16 = vunpack.i.h.bf16 %v6166_v51  ;;  %v6167_v17 = vunpack.i.l.bf16 %v6166_v51 }
 0x3bb   : >> { %v6181_v58 = vpop.permute.xlu1 %6180 }
 0x3bc   : >> { %v6171_v59 = vpop.permute.xlu0 %6170  ;;  %v6182_v48 = vunpack.i.l.bf16 %v6181_v58  ;;  %v6183_v20 = vunpack.i.h.bf16 %v6181_v58 }
 0x3bd   : >> { %v6173_v61 = vunpack.i.h.bf16 %v6171_v59  ;;  %v6172_v62 = vunpack.i.l.bf16 %v6171_v59 }
 0x3be   : >> { %v3251_v13 = vsel %vm2793_vm5, %v6177_v52, %v6182_v48  ;;  %v3252_v38 = vsel %vm2793_vm5, %v6178_v30, %v6183_v20  ;;  %v6306_v48 = vld [vmem:[%s8059_s7 + $0x38] sm:$0xff]   ;;  %v6309_v20 = vld [vmem:[%s8059_s7 + $0x50] sm:$0xff]  }
 0x3bf   : >> { %v6191_v18 = vpop.permute.xlu1 %6190  ;;  %v2888_v27 = vsel %vm2793_vm5, %v6167_v17, %v6172_v62  ;;  %v2889_v29 = vsel %vm2793_vm5, %v6168_v16, %v6173_v61 }
 0x3c0   : >> { %v6193_v21 = vunpack.i.h.bf16 %v6191_v18  ;;  %v6192_v56 = vunpack.i.l.bf16 %v6191_v18  ;;  %v6186_v22 = vpop.permute.xlu0 %6185  ;;  %v6307_v18 = vld [vmem:[%s8059_s7 + $0x40] sm:$0xff]  }
 0x3c1   : >> { %v6188_v19 = vunpack.i.h.bf16 %v6186_v22  ;;  %v6187_v26 = vunpack.i.l.bf16 %v6186_v22  ;;  %v6311_v22 = vld [vmem:[%s8059_s7 + $0x60] sm:$0xff]  }
 0x3c2   : >> { %v2890_v53 = vsel %vm2796_vm15, %v2888_v27, %v6192_v56  ;;  %v2891_v31 = vsel %vm2796_vm15, %v2889_v29, %v6193_v21  ;;  %v6310_v21 = vld [vmem:[%s8059_s7 + $0x58] sm:$0xff]   ;;  %v6312_v29 = vld [vmem:[%s8059_s7 + $0x68] sm:$0xff]  }
 0x3c3   : >> { %v2884_v33 = vsel %vm955_vm14, %v4884_v23, %v6187_v26  ;;  %v2885_v42 = vsel %vm955_vm14, %v4885_v25, %v6188_v19  ;;  %v6201_v35 = vpop.permute.xlu1 %6200  ;;  %v2893_v36 = vpack.c.bf16 %v2891_v31, %v2890_v53  ;;  %v2737_v19 = vld [vmem:[%s7444_s12] sm:$0xff]  ;;  %v2738_v26 = vld [vmem:[%s7444_s12 + $0x8] sm:$0xff] }
 0x3c4   : >> { %v2886_v37 = vsel %vm967_vm0, %v2884_v33, %v6167_v17  ;;  %v2887_v39 = vsel %vm967_vm0, %v2885_v42, %v6168_v16  ;;  %v6203_v40 = vunpack.i.h.bf16 %v6201_v35  ;;  %v6202_v41 = vunpack.i.l.bf16 %v6201_v35  ;;  %v6196_v1 = vpop.permute.xlu0 %6195  ;;  %v6304_v16 = vld [vmem:[%s8059_s7 + $0x28] sm:$0xff]   ;;  %v6305_v17 = vld [vmem:[%s8059_s7 + $0x30] sm:$0xff]  }
 0x3c5   : >> { %v6198_v3 = vunpack.i.h.bf16 %v6196_v1  ;;  %v6197_v6 = vunpack.i.l.bf16 %v6196_v1  ;;  %4947 = vmatprep.mubr.msk.bf16.mxu0 %vm3015_vm1, %v2893_v36  ;;  %v7606_v7 = vpack.c.bf16 %v2887_v39, %v2886_v37  ;;  %v6313_v35 = vld [vmem:[%s8059_s7 + $0x70] sm:$0xff]  }
 0x3c6   : >> { %v3253_v8 = vsel %vm2796_vm15, %v3251_v13, %v6202_v41  ;;  %v3254_v9 = vsel %vm2796_vm15, %v3252_v38, %v6203_v40  ;;  %v6314_v1 = vld [vmem:[%s8059_s7 + $0xf0] sm:$0xff]  }
 0x3c7   : >> { %v3248_v10 = vsel %vm955_vm14, %v4967_v24, %v6198_v3  ;;  %v3247_v11 = vsel %vm955_vm14, %v4966_v43, %v6197_v6  ;;  %3052 = vmatmul.mubr.bf16.vlgmr.msra.gmra.mrb[0].mxu0 %v7606_v7  ;;  %v7614_v12 = vpack.c.bf16 %v3254_v9, %v3253_v8  ;;  %v6211_v44 = vpop.permute.xlu1 %6210  ;;  %v6315_v8 = vld [vmem:[%s8059_s7 + $0xf8] sm:$0xff]  }
 0x3c8   : >> { %v3250_v45 = vsel %vm967_vm0, %v3248_v10, %v6178_v30  ;;  %v3249_v46 = vsel %vm967_vm0, %v3247_v11, %v6177_v52  ;;  %3154 = vmatpush1.bf16.msra.mxu0 %v6299_v2  ;;  %v6213_v49 = vunpack.i.h.bf16 %v6211_v44  ;;  %v6212_v50 = vunpack.i.l.bf16 %v6211_v44  ;;  %v7621_v51 = vpop.permute.xlu0 %6205  ;;  %v6308_v52 = vld [vmem:[%s8059_s7 + $0x48] sm:$0xff]   ;;  %v6316_v10 = vld [vmem:[%s8059_s7 + $0x100] sm:$0xff]  }
 0x3c9   : >> { %3155 = vmatprep.subr.bf16.mxu0 %v6400_v0  ;;  %5164 = vmatprep.mubr.msk.bf16.mxu1 %vm3015_vm1, %v7614_v12  ;;  %v7626_v54 = vpack.c.bf16 %v3250_v45, %v3249_v46  ;;  %v6208_v55 = vunpack.i.h.bf16 %v7621_v51  ;;  %v6207_v57 = vunpack.i.l.bf16 %v7621_v51  ;;  %v6317_v11 = vld [vmem:[%s8059_s7 + $0x108] sm:$0xff]   ;;  %v6320_v44 = vld [vmem:[%s8059_s7 + $0x120] sm:$0xff]   ;;  %v6322_v46 = vld [vmem:[%s8059_s7 + $0x130] sm:$0xff]  }
 0x3ca   : >> { %v6321_v45 = vld [vmem:[%s8059_s7 + $0x128] sm:$0xff]   ;;  %v6326_v51 = vld [vmem:[%s8059_s7 + $0x150] sm:$0xff]  }
 0x3cb   : >> { %3939 = vmatmul.mubr.bf16.vlgmr.msra.gmra.mrb[0].mxu1 %v7626_v54  ;;  %v2795_v28 = vsel %vm2793_vm5, %v6208_v55, %v6213_v49  ;;  %v2794_v58 = vsel %vm2793_vm5, %v6207_v57, %v6212_v50  ;;  %v6221_v34 = vpop.permute.xlu1 %6220  ;;  %v6324_v49 = vld [vmem:[%s8059_s7 + $0x140] sm:$0xff]   ;;  %v6325_v50 = vld [vmem:[%s8059_s7 + $0x148] sm:$0xff]  }
 0x3cc   : >> { %3156 = vmatpush1.bf16.msra.mxu0 %v6300_v47  ;;  %3948 = vmatpush1.bf16.msra.mxu1 %v6299_v2  ;;  %v6223_v59 = vunpack.i.h.bf16 %v6221_v34  ;;  %v6222_v60 = vunpack.i.l.bf16 %v6221_v34  ;;  %v6216_v56 = vpop.permute.xlu0 %6215 }
 0x3cd   : >> { %5165 = vmatprep.mubr.msk.bf16.mxu1 %vm3015_vm1, %v2893_v36  ;;  %3157 = vmatprep.subr.bf16.mxu0 %v6400_v0  ;;  %v6218_v23 = vunpack.i.h.bf16 %v6216_v56  ;;  %v6217_v25 = vunpack.i.l.bf16 %v6216_v56 }
 0x3ce   : >> { %3949 = vmatprep.subr.bf16.mxu1 %v6400_v0  ;;  %v2797_v61 = vsel %vm2796_vm15, %v2794_v58, %v6222_v60  ;;  %v2798_v62 = vsel %vm2796_vm15, %v2795_v28, %v6223_v59  ;;  %v6327_v28 = vld [vmem:[%s8059_s7 + $0x158] sm:$0xff]   ;;  %v5033_v59 = vld [vmem:[%s7444_s12 + $0x44] sm:$0xff] }
 0x3cf   : >> { %v2800_v63 = vpack.c.bf16 %v2798_v62, %v2797_v61  ;;  %v6231_v27 = vpop.permute.xlu1 %6230  ;;  %v2788_v30 = vsel %vm955_vm14, %v2737_v19, %v6217_v25  ;;  %v2789_v53 = vsel %vm955_vm14, %v2738_v26, %v6218_v23  ;;  %v6328_v60 = vld [vmem:[%s8059_s7 + $0x160] sm:$0xff]   ;;  %v6330_v26 = vld [vmem:[%s8059_s7 + $0x170] sm:$0xff]  }
 0x3d0   : >> { %3158 = vmatpush1.bf16.msra.mxu0 %v6301_v32  ;;  %3950 = vmatpush1.bf16.msra.mxu1 %v6300_v47  ;;  %v2791_v31 = vsel %vm967_vm0, %v2788_v30, %v6207_v57  ;;  %v2792_v33 = vsel %vm967_vm0, %v2789_v53, %v6208_v55  ;;  %v7711_v42 = vpop.permute.xlu0 %6225  ;;  %v6233_v37 = vunpack.i.h.bf16 %v6231_v27  ;;  %v6232_v39 = vunpack.i.l.bf16 %v6231_v27  ;;  %v6323_v47 = vld [vmem:[%s8059_s7 + $0x138] sm:$0xff]   ;;  %v6332_v30 = vld [vmem:[%s8059_s7 + $0x180] sm:$0xff]   ;;  %v6333_v53 = vld [vmem:[%s8059_s7 + $0x188] sm:$0xff]  }
 0x3d1   : >> { %3159 = vmatprep.subr.bf16.mxu0 %v6400_v0  ;;  %3951 = vmatprep.subr.bf16.mxu1 %v6400_v0  ;;  %v6228_v36 = vunpack.i.h.bf16 %v7711_v42  ;;  %v6227_v13 = vunpack.i.l.bf16 %v7711_v42  ;;  %v2799_v41 = vpack.c.bf16 %v2792_v33, %v2791_v31  ;;  %v6334_v31 = vld [vmem:[%s8059_s7 + $0x190] sm:$0xff]   ;;  %v6335_v33 = vld [vmem:[%s8059_s7 + $0x198] sm:$0xff]   ;;  %v6336_v42 = vld [vmem:[%s8059_s7 + $0x1a0] sm:$0xff]  }
 0x3d2   : >> { %4963 = vmatprep.mubr.msk.bf16.mxu0 %vm3015_vm1, %v2800_v63 }
 0x3d3   : >> { %v6241_v40 = vpop.permute.xlu1 %6240  ;;  %v3481_v2 = vsel %vm2793_vm5, %v6227_v13, %v6232_v39  ;;  %v3482_v3 = vsel %vm2793_vm5, %v6228_v36, %v6233_v37  ;;  %v6340_v37 = vld [vmem:[%s8059_s7 + $0x1c0] sm:$0xff]   ;;  %v6341_v39 = vld [vmem:[%s8059_s7 + $0x1c8] sm:$0xff]  }
 0x3d4   : >> { %3160 = vmatpush1.bf16.msra.mxu0 %v6302_v14  ;;  %3952 = vmatpush1.bf16.msra.mxu1 %v6301_v32  ;;  %v6243_v43 = vunpack.i.h.bf16 %v6241_v40  ;;  %v6242_v24 = vunpack.i.l.bf16 %v6241_v40  ;;  %v6236_v57 = vpop.permute.xlu0 %6235 }
 0x3d5   : >> { %3161 = vmatprep.subr.bf16.mxu0 %v6400_v0  ;;  %3953 = vmatprep.subr.bf16.mxu1 %v6400_v0  ;;  %v6238_v58 = vunpack.i.h.bf16 %v6236_v57  ;;  %v6237_v34 = vunpack.i.l.bf16 %v6236_v57 }
 0x3d6   : >> { %v3483_v6 = vsel %vm2796_vm15, %v3481_v2, %v6242_v24  ;;  %v3484_v38 = vsel %vm2796_vm15, %v3482_v3, %v6243_v43  ;;  %v6342_v43 = vld [vmem:[%s8059_s7 + $0x1d0] sm:$0xff]   ;;  %v6343_v3 = vld [vmem:[%s8059_s7 + $0x1d8] sm:$0xff]  }
 0x3d7   : >> { %v7740_v9 = vpack.c.bf16 %v3484_v38, %v3483_v6  ;;  %v6251_v55 = vpop.permute.xlu1 %6250 }
 0x3d8   : >> { %3162 = vmatpush1.bf16.msra.mxu0 %v6303_v15  ;;  %3954 = vmatpush1.bf16.msra.mxu1 %v6302_v14  ;;  %v7805_v32 = vpop.permute.xlu0 %6245  ;;  %v6253_v63 = vunpack.i.h.bf16 %v6251_v55  ;;  %v6252_v14 = vunpack.i.l.bf16 %v6251_v55 }
 0x3d9   : >> { %3163 = vmatprep.subr.bf16.mxu0 %v6400_v0  ;;  %3955 = vmatprep.subr.bf16.mxu1 %v6400_v0  ;;  %v6248_v61 = vunpack.i.h.bf16 %v7805_v32  ;;  %v6247_v62 = vunpack.i.l.bf16 %v7805_v32 }
 0x3db   : >> { %v3712_v56 = vsel %vm2793_vm5, %v6248_v61, %v6253_v63  ;;  %v6350_v63 = vld [vmem:[%s8059_s7 + $0x210] sm:$0xff]  }
 0x3dc   : >> { %3164 = vmatpush1.bf16.msra.mxu0 %v6304_v16  ;;  %3956 = vmatpush1.bf16.msra.mxu1 %v6303_v15  ;;  %v6261_v15 = vpop.permute.xlu1 %6260 }
 0x3dd   : >> { %3165 = vmatprep.subr.bf16.mxu0 %v6400_v0  ;;  %3957 = vmatprep.subr.bf16.mxu1 %v6400_v0 }
 0x3e0   : >> { %3166 = vmatpush1.bf16.msra.mxu0 %v6305_v17  ;;  %3958 = vmatpush1.bf16.msra.mxu1 %v6304_v16  ;;  %v5032_v16 = vld [vmem:[%s7444_s12 + $0x3c] sm:$0xff]  ;;  %v6271_v40 = vpop.permute.xlu1 %6270 }
 0x3e1   : >> { %3167 = vmatprep.subr.bf16.mxu0 %v6400_v0  ;;  %3959 = vmatprep.subr.bf16.mxu1 %v6400_v0 }
 0x3e4   : >> { %3168 = vmatpush1.bf16.msra.mxu0 %v6306_v48  ;;  %3960 = vmatpush1.bf16.msra.mxu1 %v6305_v17  ;;  %v3478_v17 = vsel %vm955_vm14, %v5033_v59, %v6238_v58  ;;  %v6345_v58 = vld [vmem:[%s8059_s7 + $0x1e8] sm:$0xff]   ;;  %v6346_v59 = vld [vmem:[%s8059_s7 + $0x1f0] sm:$0xff]  }
 0x3e5   : >> { %3169 = vmatprep.subr.bf16.mxu0 %v6400_v0  ;;  %3961 = vmatprep.subr.bf16.mxu1 %v6400_v0  ;;  %v3480_v23 = vsel %vm967_vm0, %v3478_v17, %v6228_v36  ;;  %v6338_v36 = vld [vmem:[%s8059_s7 + $0x1b0] sm:$0xff]  }
 0x3e6   : >> { %v6354_v17 = vld [vmem:[%s8059_s7 + $0x230] sm:$0xff]  }
 0x3e8   : >> { %3170 = vmatpush1.bf16.msra.mxu0 %v6307_v18  ;;  %3962 = vmatpush1.bf16.msra.mxu1 %v6306_v48  ;;  %v6263_v48 = vunpack.i.h.bf16 %v6261_v15 }
 0x3e9   : >> { %3171 = vmatprep.subr.bf16.mxu0 %v6400_v0  ;;  %3963 = vmatprep.subr.bf16.mxu1 %v6400_v0 }
 0x3ea   : >> { %v3714_v19 = vsel %vm2796_vm15, %v3712_v56, %v6263_v48  ;;  %v6355_v48 = vld [vmem:[%s8059_s7 + $0x238] sm:$0xff]  }
 0x3ec   : >> { %3172 = vmatpush1.bf16.msra.mxu0 %v6308_v52  ;;  %3964 = vmatpush1.bf16.msra.mxu1 %v6307_v18  ;;  %v6262_v18 = vunpack.i.l.bf16 %v6261_v15  ;;  %v6352_v15 = vld [vmem:[%s8059_s7 + $0x220] sm:$0xff]  }
 0x3ed   : >> { %3173 = vmatprep.subr.bf16.mxu0 %v6400_v0  ;;  %3965 = vmatprep.subr.bf16.mxu1 %v6400_v0 }
 0x3f0   : >> { %3174 = vmatpush1.bf16.msra.mxu0 %v6309_v20  ;;  %3966 = vmatpush1.bf16.msra.mxu1 %v6308_v52  ;;  %v3477_v52 = vsel %vm955_vm14, %v5032_v16, %v6237_v34  ;;  %v6353_v16 = vld [vmem:[%s8059_s7 + $0x228] sm:$0xff]  }
 0x3f1   : >> { %3175 = vmatprep.subr.bf16.mxu0 %v6400_v0  ;;  %3967 = vmatprep.subr.bf16.mxu1 %v6400_v0 }
 0x3f4   : >> { %3176 = vmatpush1.bf16.msra.mxu0 %v6310_v21  ;;  %3968 = vmatpush1.bf16.msra.mxu1 %v6309_v20  ;;  %v6329_v20 = vld [vmem:[%s8059_s7 + $0x168] sm:$0xff]  }
 0x3f5   : >> { %3177 = vmatprep.subr.bf16.mxu0 %v6400_v0  ;;  %3969 = vmatprep.subr.bf16.mxu1 %v6400_v0 }
 0x3f8   : >> { %3178 = vmatpush1.bf16.msra.mxu0 %v6311_v22  ;;  %3970 = vmatpush1.bf16.msra.mxu1 %v6310_v21  ;;  %v3711_v21 = vsel %vm2793_vm5, %v6247_v62, %v6252_v14  ;;  %v6351_v14 = vld [vmem:[%s8059_s7 + $0x218] sm:$0xff]  }
 0x3f9   : >> { %3179 = vmatprep.subr.bf16.mxu0 %v6400_v0  ;;  %3971 = vmatprep.subr.bf16.mxu1 %v6400_v0  ;;  %v3713_v25 = vsel %vm2796_vm15, %v3711_v21, %v6262_v18  ;;  %v6356_v18 = vld [vmem:[%s8059_s7 + $0x240] sm:$0xff]  }
 0x3fc   : >> { %3180 = vmatpush1.bf16.msra.mxu0 %v6312_v29  ;;  %3972 = vmatpush1.bf16.msra.mxu1 %v6311_v22  ;;  %v3479_v22 = vsel %vm967_vm0, %v3477_v52, %v6227_v13  ;;  %v6339_v13 = vld [vmem:[%s8059_s7 + $0x1b8] sm:$0xff]   ;;  %v6357_v52 = vld [vmem:[%s8059_s7 + $0x248] sm:$0xff]  }
 0x3fd   : >> { %3181 = vmatprep.subr.bf16.mxu0 %v6400_v0  ;;  %3973 = vmatprep.subr.bf16.mxu1 %v6400_v0  ;;  %v7844_v27 = vpack.c.bf16 %v3480_v23, %v3479_v22  ;;  %v6358_v22 = vld [vmem:[%s8059_s7 + $0x250] sm:$0xff]   ;;  %v5170_v23 = vld [vmem:[%s7444_s12 + $0x64] sm:$0xff] }
 0x400   : >> { %3182 = vmatpush1.bf16.msra.mxu0 %v6313_v35  ;;  %3974 = vmatpush1.bf16.msra.mxu1 %v6312_v29  ;;  %v6331_v29 = vld [vmem:[%s8059_s7 + $0x178] sm:$0xff]  }
 0x401   : >> { %3381 = vmatprep.subr.bf16.mxu0 %v6400_v0  ;;  %3975 = vmatprep.subr.bf16.mxu1 %v6400_v0 }
 0x403   : >> { %3186 = vmatmul.mubr.bf16.vlgmr.msra.gmra.mrb[0].mxu0 %v2799_v41  ;;  %v6256_v41 = vpop.permute.xlu0 %6255 }
 0x404   : >> { %3976 = vmatpush1.bf16.msra.mxu1 %v6313_v35  ;;  %3382 = vmatpush1.bf16.msra.mxu0 %v6314_v1  ;;  %v6337_v35 = vld [vmem:[%s8059_s7 + $0x1a8] sm:$0xff]   ;;  %v6258_v24 = vunpack.i.h.bf16 %v6256_v41 }
 0x405   : >> { %5029 = vmatprep.mubr.msk.bf16.mxu0 %vm3015_vm1, %v7614_v12  ;;  %3383 = vmatprep.subr.bf16.mxu0 %v6400_v0  ;;  %v6319_v12 = vld [vmem:[%s8059_s7 + $0x118] sm:$0xff]  }
 0x406   : >> { %3988 = vmatprep.subr.bf16.mxu1 %v6400_v0 }
 0x407   : >> { %3980 = vmatmul.mubr.bf16.vlgmr.msra.gmra.mrb[0].mxu1 %v7606_v7  ;;  %v6318_v7 = vld [vmem:[%s8059_s7 + $0x110] sm:$0xff]   ;;  %v7912_v2 = vpop.permute.xlu0 %6265 }
 0x408   : >> { %3384 = vmatpush1.bf16.msra.mxu0 %v6315_v8  ;;  %3989 = vmatpush1.bf16.msra.mxu1 %v6314_v1  ;;  %v6257_v1 = vunpack.i.l.bf16 %v6256_v41  ;;  %v6268_v6 = vunpack.i.h.bf16 %v7912_v2  ;;  %v6267_v38 = vunpack.i.l.bf16 %v7912_v2 }
 0x409   : >> { %3385 = vmatprep.subr.bf16.mxu0 %v6400_v0  ;;  %3990 = vmatprep.subr.bf16.mxu1 %v6400_v0 }
 0x40a   : >> { %5166 = vmatprep.mubr.msk.bf16.mxu1 %vm3015_vm1, %v7740_v9 }
 0x40c   : >> { %3386 = vmatpush1.bf16.msra.mxu0 %v6316_v10  ;;  %3991 = vmatpush1.bf16.msra.mxu1 %v6315_v8  ;;  %v6273_v8 = vunpack.i.h.bf16 %v6271_v40 }
 0x40d   : >> { %3387 = vmatprep.subr.bf16.mxu0 %v6400_v0  ;;  %3992 = vmatprep.subr.bf16.mxu1 %v6400_v0 }
 0x410   : >> { %3388 = vmatpush1.bf16.msra.mxu0 %v6317_v11  ;;  %3993 = vmatpush1.bf16.msra.mxu1 %v6316_v10  ;;  %v6281_v10 = vpop.permute.xlu1 %6280 }
 0x411   : >> { %3389 = vmatprep.subr.bf16.mxu0 %v6400_v0  ;;  %3994 = vmatprep.subr.bf16.mxu1 %v6400_v0 }
 0x414   : >> { %3390 = vmatpush1.bf16.msra.mxu0 %v6318_v7  ;;  %3995 = vmatpush1.bf16.msra.mxu1 %v6317_v11  ;;  %v5098_v11 = vld [vmem:[%s7444_s12 + $0x50] sm:$0xff] }
 0x415   : >> { %3391 = vmatprep.subr.bf16.mxu0 %v6400_v0  ;;  %3996 = vmatprep.subr.bf16.mxu1 %v6400_v0 }
 0x418   : >> { %3392 = vmatpush1.bf16.msra.mxu0 %v6319_v12  ;;  %3997 = vmatpush1.bf16.msra.mxu1 %v6318_v7  ;;  %v5099_v7 = vld [vmem:[%s7444_s12 + $0x58] sm:$0xff] }
 0x419   : >> { %3393 = vmatprep.subr.bf16.mxu0 %v6400_v0  ;;  %3998 = vmatprep.subr.bf16.mxu1 %v6400_v0 }
 0x41c   : >> { %3394 = vmatpush1.bf16.msra.mxu0 %v6320_v44  ;;  %3999 = vmatpush1.bf16.msra.mxu1 %v6319_v12  ;;  %v6283_v12 = vunpack.i.h.bf16 %v6281_v10 }
 0x41d   : >> { %3395 = vmatprep.subr.bf16.mxu0 %v6400_v0  ;;  %4000 = vmatprep.subr.bf16.mxu1 %v6400_v0 }
 0x420   : >> { %3396 = vmatpush1.bf16.msra.mxu0 %v6321_v45  ;;  %4001 = vmatpush1.bf16.msra.mxu1 %v6320_v44  ;;  %v6282_v44 = vunpack.i.l.bf16 %v6281_v10 }
 0x421   : >> { %3397 = vmatprep.subr.bf16.mxu0 %v6400_v0  ;;  %4002 = vmatprep.subr.bf16.mxu1 %v6400_v0 }
 0x424   : >> { %3398 = vmatpush1.bf16.msra.mxu0 %v6322_v46  ;;  %4003 = vmatpush1.bf16.msra.mxu1 %v6321_v45  ;;  %v3708_v45 = vsel %vm955_vm14, %v5099_v7, %v6258_v24 }
 0x425   : >> { %3399 = vmatprep.subr.bf16.mxu0 %v6400_v0  ;;  %4004 = vmatprep.subr.bf16.mxu1 %v6400_v0  ;;  %v3710_v55 = vsel %vm967_vm0, %v3708_v45, %v6248_v61  ;;  %v6348_v61 = vld [vmem:[%s8059_s7 + $0x200] sm:$0xff]  }
 0x428   : >> { %3400 = vmatpush1.bf16.msra.mxu0 %v6323_v47  ;;  %4005 = vmatpush1.bf16.msra.mxu1 %v6322_v46  ;;  %v3707_v46 = vsel %vm955_vm14, %v5098_v11, %v6257_v1 }
 0x429   : >> { %3401 = vmatprep.subr.bf16.mxu0 %v6400_v0  ;;  %4006 = vmatprep.subr.bf16.mxu1 %v6400_v0 }
 0x42c   : >> { %3402 = vmatpush1.bf16.msra.mxu0 %v6324_v49  ;;  %4007 = vmatpush1.bf16.msra.mxu1 %v6323_v47  ;;  %v6344_v47 = vld [vmem:[%s8059_s7 + $0x1e0] sm:$0xff]  }
 0x42d   : >> { %3403 = vmatprep.subr.bf16.mxu0 %v6400_v0  ;;  %4008 = vmatprep.subr.bf16.mxu1 %v6400_v0 }
 0x430   : >> { %3404 = vmatpush1.bf16.msra.mxu0 %v6325_v50  ;;  %4009 = vmatpush1.bf16.msra.mxu1 %v6324_v49 }
 0x431   : >> { %3405 = vmatprep.subr.bf16.mxu0 %v6400_v0  ;;  %4010 = vmatprep.subr.bf16.mxu1 %v6400_v0 }
 0x434   : >> { %4011 = vmatpush1.bf16.msra.mxu1 %v6325_v50  ;;  %3406 = vmatpush1.bf16.msra.mxu0 %v6326_v51  ;;  %v4132_v50 = vsel %vm2793_vm5, %v6268_v6, %v6273_v8 }
 0x435   : >> { %3407 = vmatprep.subr.bf16.mxu0 %v6400_v0  ;;  %4012 = vmatprep.subr.bf16.mxu1 %v6400_v0 }
 0x438   : >> { %4013 = vmatpush1.bf16.msra.mxu1 %v6326_v51  ;;  %3408 = vmatpush1.bf16.msra.mxu0 %v6327_v28  ;;  %v3709_v51 = vsel %vm967_vm0, %v3707_v46, %v6247_v62  ;;  %v6349_v62 = vld [vmem:[%s8059_s7 + $0x208] sm:$0xff]  }
 0x439   : >> { %4014 = vmatprep.subr.bf16.mxu1 %v6400_v0  ;;  %3409 = vmatprep.subr.bf16.mxu0 %v6400_v0  ;;  %v7951_v34 = vpack.c.bf16 %v3710_v55, %v3709_v51 }
 0x43c   : >> { %3410 = vmatpush1.bf16.msra.mxu0 %v6328_v60  ;;  %4015 = vmatpush1.bf16.msra.mxu1 %v6327_v28  ;;  %v4134_v28 = vsel %vm2796_vm15, %v4132_v50, %v6283_v12 }
 0x43d   : >> { %4016 = vmatprep.subr.bf16.mxu1 %v6400_v0  ;;  %3611 = vmatprep.subr.bf16.mxu0 %v6400_v0 }
 0x43f   : >> { %3414 = vmatmul.mubr.bf16.vlgmr.msra.gmra.mrb[0].mxu0 %v7626_v54  ;;  %v7847_v54 = vpack.c.bf16 %v3714_v19, %v3713_v25  ;;  %v5171_v25 = vld [vmem:[%s7444_s12 + $0x6c] sm:$0xff]  ;;  %s5189_s12 = sshll.u32 %s6389_s14, 3  ;;  %s2733_s14 = sadd.s32 1, %s6389_s14  }
 0x440   : >> { %3612 = vmatpush1.bf16.msra.mxu0 %v6329_v20  ;;  %5095 = vmatprep.mubr.msk.bf16.mxu0 %vm3015_vm1, %v7740_v9  ;;  %v6272_v9 = vunpack.i.l.bf16 %v6271_v40  ;;  %s4202_s27 = scalar_lea.vmem %s6531_s25, %s5189_s12  ;;  %p2730_p6 = scmp.ge.s32.totalorder %s2733_s14, 8  }
 0x441   : >> { %4017 = vmatpush1.bf16.msra.mxu1 %v6328_v60  ;;  %3613 = vmatprep.subr.bf16.mxu0 %v6400_v0  ;;  %v6347_v60 = vld [vmem:[%s8059_s7 + $0x1f8] sm:$0xff]  }
 0x442   : >> { %4031 = vmatprep.subr.bf16.mxu1 %v6400_v0  ;;  %v4131_v49 = vsel %vm2793_vm5, %v6267_v38, %v6272_v9 }
 0x443   : >> { %v4133_v57 = vsel %vm2796_vm15, %v4131_v49, %v6282_v44 }
 0x444   : >> { %4021 = vmatmul.mubr.bf16.vlgmr.msra.gmra.mrb[0].mxu1 %v7844_v27  ;;  %3614 = vmatpush1.bf16.msra.mxu0 %v6330_v26  ;;  %v4136_v32 = vpack.c.bf16 %v4134_v28, %v4133_v57 }
 0x445   : >> { %4032 = vmatpush1.bf16.msra.mxu1 %v6329_v20  ;;  %3615 = vmatprep.subr.bf16.mxu0 %v6400_v0  ;;  %v6276_v20 = vpop.permute.xlu0 %6275 }
 0x446   : >> { %4033 = vmatprep.subr.bf16.mxu1 %v6400_v0  ;;  %5167 = vmatprep.mubr.msk.bf16.mxu1 %vm3015_vm1, %v7847_v54  ;;  %v6278_v21 = vunpack.i.h.bf16 %v6276_v20  ;;  %v6277_v56 = vunpack.i.l.bf16 %v6276_v20 }
 0x448   : >> { %3616 = vmatpush1.bf16.msra.mxu0 %v6331_v29  ;;  %v4128_v19 = vsel %vm955_vm14, %v5171_v25, %v6278_v21 }
 0x449   : >> { %4034 = vmatpush1.bf16.msra.mxu1 %v6330_v26  ;;  %3617 = vmatprep.subr.bf16.mxu0 %v6400_v0  ;;  %v4127_v26 = vsel %vm955_vm14, %v5170_v23, %v6277_v56 }
 0x44a   : >> { %4035 = vmatprep.subr.bf16.mxu1 %v6400_v0 }
 0x44c   : >> { %3618 = vmatpush1.bf16.msra.mxu0 %v6332_v30 }
 0x44d   : >> { %4036 = vmatpush1.bf16.msra.mxu1 %v6331_v29  ;;  %3619 = vmatprep.subr.bf16.mxu0 %v6400_v0 }
 0x44e   : >> { %4037 = vmatprep.subr.bf16.mxu1 %v6400_v0 }
 0x450   : >> { %3620 = vmatpush1.bf16.msra.mxu0 %v6333_v53 }
 0x451   : >> { %4038 = vmatpush1.bf16.msra.mxu1 %v6332_v30  ;;  %3621 = vmatprep.subr.bf16.mxu0 %v6400_v0 }
 0x452   : >> { %4039 = vmatprep.subr.bf16.mxu1 %v6400_v0 }
 0x454   : >> { %3622 = vmatpush1.bf16.msra.mxu0 %v6334_v31 }
 0x455   : >> { %4040 = vmatpush1.bf16.msra.mxu1 %v6333_v53  ;;  %3623 = vmatprep.subr.bf16.mxu0 %v6400_v0 }
 0x456   : >> { %4041 = vmatprep.subr.bf16.mxu1 %v6400_v0 }
 0x458   : >> { %3624 = vmatpush1.bf16.msra.mxu0 %v6335_v33 }
 0x459   : >> { %4042 = vmatpush1.bf16.msra.mxu1 %v6334_v31  ;;  %3625 = vmatprep.subr.bf16.mxu0 %v6400_v0 }
 0x45a   : >> { %4043 = vmatprep.subr.bf16.mxu1 %v6400_v0 }
 0x45c   : >> { %3626 = vmatpush1.bf16.msra.mxu0 %v6336_v42 }
 0x45d   : >> { %4044 = vmatpush1.bf16.msra.mxu1 %v6335_v33  ;;  %3627 = vmatprep.subr.bf16.mxu0 %v6400_v0 }
 0x45e   : >> { %4045 = vmatprep.subr.bf16.mxu1 %v6400_v0 }
 0x460   : >> { %3628 = vmatpush1.bf16.msra.mxu0 %v6337_v35 }
 0x461   : >> { %4046 = vmatpush1.bf16.msra.mxu1 %v6336_v42  ;;  %3629 = vmatprep.subr.bf16.mxu0 %v6400_v0 }
 0x462   : >> { %4047 = vmatprep.subr.bf16.mxu1 %v6400_v0 }
 0x464   : >> { %3630 = vmatpush1.bf16.msra.mxu0 %v6338_v36 }
 0x465   : >> { %4048 = vmatpush1.bf16.msra.mxu1 %v6337_v35  ;;  %3631 = vmatprep.subr.bf16.mxu0 %v6400_v0 }
 0x466   : >> { %4049 = vmatprep.subr.bf16.mxu1 %v6400_v0 }
 0x468   : >> { %3632 = vmatpush1.bf16.msra.mxu0 %v6339_v13 }
 0x469   : >> { %4050 = vmatpush1.bf16.msra.mxu1 %v6338_v36  ;;  %3633 = vmatprep.subr.bf16.mxu0 %v6400_v0 }
 0x46a   : >> { %4051 = vmatprep.subr.bf16.mxu1 %v6400_v0 }
 0x46c   : >> { %3634 = vmatpush1.bf16.msra.mxu0 %v6340_v37 }
 0x46d   : >> { %4052 = vmatpush1.bf16.msra.mxu1 %v6339_v13  ;;  %3635 = vmatprep.subr.bf16.mxu0 %v6400_v0 }
 0x46e   : >> { %4053 = vmatprep.subr.bf16.mxu1 %v6400_v0 }
 0x470   : >> { %3636 = vmatpush1.bf16.msra.mxu0 %v6341_v39 }
 0x471   : >> { %4054 = vmatpush1.bf16.msra.mxu1 %v6340_v37  ;;  %3637 = vmatprep.subr.bf16.mxu0 %v6400_v0 }
 0x472   : >> { %4055 = vmatprep.subr.bf16.mxu1 %v6400_v0 }
 0x474   : >> { %3638 = vmatpush1.bf16.msra.mxu0 %v6342_v43 }
 0x475   : >> { %4056 = vmatpush1.bf16.msra.mxu1 %v6341_v39  ;;  %3639 = vmatprep.subr.bf16.mxu0 %v6400_v0 }
 0x476   : >> { %4057 = vmatprep.subr.bf16.mxu1 %v6400_v0 }
 0x478   : >> { %3640 = vmatpush1.bf16.msra.mxu0 %v6343_v3 }
 0x479   : >> { %4058 = vmatpush1.bf16.msra.mxu1 %v6342_v43  ;;  %3841 = vmatprep.subr.bf16.mxu0 %v6400_v0 }
 0x47a   : >> { %4059 = vmatprep.subr.bf16.mxu1 %v6400_v0 }
 0x47b   : >> { %3644 = vmatmul.mubr.bf16.vlgmr.msra.gmra.mrb[0].mxu0 %v7844_v27  ;;  %v4129_v27 = vsel %vm967_vm0, %v4127_v26, %v6267_v38 }
 0x47c   : >> { %3842 = vmatpush1.bf16.msra.mxu0 %v6344_v47  ;;  %5161 = vmatprep.mubr.msk.bf16.mxu0 %vm3015_vm1, %v7847_v54  ;;  %v4130_v54 = vsel %vm967_vm0, %v4128_v19, %v6268_v6 }
 0x47d   : >> { %4060 = vmatpush1.bf16.msra.mxu1 %v6343_v3  ;;  %3843 = vmatprep.subr.bf16.mxu0 %v6400_v0  ;;  %v4135_v29 = vpack.c.bf16 %v4130_v54, %v4129_v27 }
 0x47e   : >> { %4140 = vmatprep.subr.bf16.mxu1 %v6400_v0 }
 0x480   : >> { %4064 = vmatmul.mubr.bf16.vlgmr.msra.gmra.mrb[0].mxu1 %v7951_v34  ;;  %3844 = vmatpush1.bf16.msra.mxu0 %v6345_v58 }
 0x481   : >> { %4141 = vmatpush1.bf16.msra.mxu1 %v6344_v47  ;;  %3845 = vmatprep.subr.bf16.mxu0 %v6400_v0 }
 0x482   : >> { %4142 = vmatprep.subr.bf16.mxu1 %v6400_v0  ;;  %5188 = vmatprep.mubr.msk.bf16.mxu1 %vm3015_vm1, %v4136_v32 }
 0x484   : >> { %3846 = vmatpush1.bf16.msra.mxu0 %v6346_v59 }
 0x485   : >> { %4143 = vmatpush1.bf16.msra.mxu1 %v6345_v58  ;;  %3847 = vmatprep.subr.bf16.mxu0 %v6400_v0 }
 0x486   : >> { %4144 = vmatprep.subr.bf16.mxu1 %v6400_v0 }
 0x488   : >> { %3848 = vmatpush1.bf16.msra.mxu0 %v6347_v60 }
 0x489   : >> { %4145 = vmatpush1.bf16.msra.mxu1 %v6346_v59  ;;  %3849 = vmatprep.subr.bf16.mxu0 %v6400_v0 }
 0x48a   : >> { %4146 = vmatprep.subr.bf16.mxu1 %v6400_v0 }
 0x48c   : >> { %3850 = vmatpush1.bf16.msra.mxu0 %v6348_v61 }
 0x48d   : >> { %4147 = vmatpush1.bf16.msra.mxu1 %v6347_v60  ;;  %3851 = vmatprep.subr.bf16.mxu0 %v6400_v0 }
 0x48e   : >> { %4148 = vmatprep.subr.bf16.mxu1 %v6400_v0 }
 0x490   : >> { %3852 = vmatpush1.bf16.msra.mxu0 %v6349_v62 }
 0x491   : >> { %4149 = vmatpush1.bf16.msra.mxu1 %v6348_v61  ;;  %3853 = vmatprep.subr.bf16.mxu0 %v6400_v0 }
 0x492   : >> { %4150 = vmatprep.subr.bf16.mxu1 %v6400_v0 }
 0x494   : >> { %3854 = vmatpush1.bf16.msra.mxu0 %v6350_v63 }
 0x495   : >> { %4151 = vmatpush1.bf16.msra.mxu1 %v6349_v62  ;;  %3855 = vmatprep.subr.bf16.mxu0 %v6400_v0 }
 0x496   : >> { %4152 = vmatprep.subr.bf16.mxu1 %v6400_v0 }
 0x498   : >> { %3856 = vmatpush1.bf16.msra.mxu0 %v6351_v14 }
 0x499   : >> { %4153 = vmatpush1.bf16.msra.mxu1 %v6350_v63  ;;  %3857 = vmatprep.subr.bf16.mxu0 %v6400_v0 }
 0x49a   : >> { %4154 = vmatprep.subr.bf16.mxu1 %v6400_v0 }
 0x49c   : >> { %3858 = vmatpush1.bf16.msra.mxu0 %v6352_v15 }
 0x49d   : >> { %4155 = vmatpush1.bf16.msra.mxu1 %v6351_v14  ;;  %3859 = vmatprep.subr.bf16.mxu0 %v6400_v0 }
 0x49e   : >> { %4156 = vmatprep.subr.bf16.mxu1 %v6400_v0 }
 0x4a0   : >> { %3860 = vmatpush1.bf16.msra.mxu0 %v6353_v16 }
 0x4a1   : >> { %4157 = vmatpush1.bf16.msra.mxu1 %v6352_v15  ;;  %3861 = vmatprep.subr.bf16.mxu0 %v6400_v0 }
 0x4a2   : >> { %4158 = vmatprep.subr.bf16.mxu1 %v6400_v0 }
 0x4a4   : >> { %3862 = vmatpush1.bf16.msra.mxu0 %v6354_v17 }
 0x4a5   : >> { %4159 = vmatpush1.bf16.msra.mxu1 %v6353_v16  ;;  %3863 = vmatprep.subr.bf16.mxu0 %v6400_v0 }
 0x4a6   : >> { %4160 = vmatprep.subr.bf16.mxu1 %v6400_v0 }
 0x4a8   : >> { %3864 = vmatpush1.bf16.msra.mxu0 %v6355_v48 }
 0x4a9   : >> { %4161 = vmatpush1.bf16.msra.mxu1 %v6354_v17  ;;  %3865 = vmatprep.subr.bf16.mxu0 %v6400_v0 }
 0x4aa   : >> { %4162 = vmatprep.subr.bf16.mxu1 %v6400_v0 }
 0x4ac   : >> { %3866 = vmatpush1.bf16.msra.mxu0 %v6356_v18 }
 0x4ad   : >> { %4163 = vmatpush1.bf16.msra.mxu1 %v6355_v48  ;;  %3867 = vmatprep.subr.bf16.mxu0 %v6400_v0 }
 0x4ae   : >> { %4164 = vmatprep.subr.bf16.mxu1 %v6400_v0 }
 0x4b0   : >> { %3868 = vmatpush1.bf16.msra.mxu0 %v6357_v52 }
 0x4b1   : >> { %4165 = vmatpush1.bf16.msra.mxu1 %v6356_v18  ;;  %3869 = vmatprep.subr.bf16.mxu0 %v6400_v0 }
 0x4b2   : >> { %4166 = vmatprep.subr.bf16.mxu1 %v6400_v0 }
 0x4b4   : >> { %3870 = vmatpush1.bf16.msra.mxu0 %v6358_v22 }
 0x4b5   : >> { %4167 = vmatpush1.bf16.msra.mxu1 %v6357_v52 }
 0x4b6   : >> { %4168 = vmatprep.subr.bf16.mxu1 %v6400_v0 }
 0x4b7   : >> { %3874 = vmatmul.mubr.bf16.vlgmr.msra.gmra.mrb[0].mxu0 %v7951_v34 }
 0x4b9   : >> { %4169 = vmatpush1.bf16.msra.mxu1 %v6358_v22 }
 0x4bc   : >> { %4173 = vmatmul.mubr.bf16.vlgmr.msra.gmra.mrb[0].mxu1 %v4135_v29 }
 0x58a   : >> { %v3875_v30 = vpop.f32.mrb[0].mxu0 }
 0x58b   : >> { %v3890_v53 = vmul.f32 %v6491_v4, %v3875_v30  ;;  %v3877_v31 = vpop.f32.mrb[1].mxu0 }
 0x58c   : >> { %v3878_v33 = vpop.f32.mrb[2].mxu0 }
 0x58d   : >> { %v3891_v0 = vmul.f32 %v6491_v4, %v3878_v33  ;;  %v3880_v42 = vpop.f32.mrb[3].mxu0  ;;  %v3898_v35 = vadd.f32 %v6496_v5, %v3890_v53 }
 0x58f   : >> { %v4174_v36 = vpop.f32.mrb[0].mxu1  ;;  %v3899_v13 = vadd.f32 %v6496_v5, %v3891_v0  ;;  %v3902_v41 = vmul.f32 0.01, %v3898_v35  ;;  %vm3900_vm2 = vcmp.gt.f32.partialorder %v3898_v35, 0.0 }
 0x590   : >> { %v4183_v37 = vmul.f32 %v6491_v4, %v4174_v36  ;;  %v4176_v39 = vpop.f32.mrb[1].mxu1 }
 0x591   : >> { %v4177_v40 = vpop.f32.mrb[2].mxu1  ;;  %v3903_v2 = vmul.f32 0.01, %v3899_v13  ;;  %vm3901_vm4 = vcmp.gt.f32.partialorder %v3899_v13, 0.0  ;;  %v3904_v38 = vsel %vm3900_vm2, %v3898_v35, %v3902_v41 }
 0x592   : >> { %v4185_v43 = vadd.f32 %v6496_v5, %v4183_v37  ;;  %v4184_v24 = vmul.f32 %v6491_v4, %v4177_v40  ;;  %v4179_v1 = vpop.f32.mrb[3].mxu1 }
 0x593   : >> { %v3905_v11 = vsel %vm3901_vm4, %v3899_v13, %v3903_v2 }
 0x594   : >> { %vm4187_vm3 = vcmp.gt.f32.partialorder %v4185_v43, 0.0  ;;  %v4189_v3 = vmul.f32 0.01, %v4185_v43  ;;  %v4186_v6 = vadd.f32 %v6496_v5, %v4184_v24 }
 0x596   : >> { %v4191_v8 = vsel %vm4187_vm3, %v4185_v43, %v4189_v3  ;;  %vm4188_vm6 = vcmp.gt.f32.partialorder %v4186_v6, 0.0  ;;  %v4190_v9 = vmul.f32 0.01, %v4186_v6 }
 0x597   : >> { %v4193_v10 = vmax.f32 %v3904_v38, %v4191_v8 }
 0x598   : >> { %v4192_v7 = vsel %vm4188_vm6, %v4186_v6, %v4190_v9 }
 0x599   : >> { %4195 = vst.msk [vmem:[#allocation6] sm:$0xff] %vm2796_vm15, %v4193_v10  ;;  %v4194_v12 = vmax.f32 %v3905_v11, %v4192_v7 }
 0x59b   : >> { %4196 = vst.msk [vmem:[#allocation6 + $0x8] sm:$0xff] %vm2796_vm15, %v4194_v12 }
 0x59f   : > { %2732 = sbr.rel (!%p2730_p6) target bundleno = 828 (0x33c), region = 222 }
 0x5a2   : >> { %v4197_v44 = vld [vmem:[#allocation6] ss:$2 sm:$0xff]  ;;  %v4199_v45 = vld [vmem:[#allocation6 + $0x1] ss:$2 sm:$0xff] }
 0x5a3   : >> { %v4200_v46 = vmax.f32 %v4197_v44, %v4199_v45 }
 0x5a5   : >> { %4203 = vst.msk [vmem:[%s4202_s27] sm:$0xff] %vm2796_vm15, %v4200_v46 }
 0x5a6 PF: > { %s20_s13 = sadd.s32 1, %s6377_s13  }
 0x5a7   : > { %p17_p7 = scmp.ge.s32.totalorder %s20_s13, 4  }
 0x5a9   :  { %19 = sbr.rel (!%p17_p7) target bundleno = 1 (0x1), region = 233 }

</bundles_post_ra>
